<compile_context>
chip_gen: v7x
topology: tpu7x:2x2x1
jax: 0.10.0
libtpu: 0.0.40
codegen_flags: <defaults>
</compile_context>

<pallas_src>
import math

import numpy as np

import jax
import jax.numpy as jnp
from jax.experimental import pallas as pl
from jax.experimental.pallas import tpu as pltpu


# --------------------------------------------------------------------------- kernel
def make_kernel(num_layers, L, B, H):
    H2, H4, H6 = 2 * H, 4 * H, 6 * H
    n_w = 6 * num_layers + 3
    full_unroll = L <= 32          # demo sizes: fully static time loop (static slices)
    dyn_unroll = 8                 # sweep 4/8 at production block lengths

    def kernel(x_ref, *rest):
        w_refs = rest[:n_w]
        o_ref = rest[n_w]
        xpf, xpb, hf, hb = rest[n_w + 1:]

        # One bidirectional, both-branch GRU recurrence over hoisted gate projections.
        #   h_cat layout (4H):               [h_fwd_br1 | h_fwd_br2 | h_bwd_br1 | h_bwd_br2]
        #   gate layout per direction (6H):  [r_br1|r_br2 | z_br1|z_br2 | n_br1|n_br2]
        # b_ih and b_hh_{r,z} are pre-folded into the projection bias; b_hh_n is applied
        # per step inside r * (...), matching PyTorch GRU exactly.
        def recurrence(w_hh_ref, b_hn_ref):
            whh = w_hh_ref[...]                                    # (4H, 12H) block-diag
            bhn_f = jnp.broadcast_to(b_hn_ref[:, :H2], (B, H2))    # hoisted broadcasts
            bhn_b = jnp.broadcast_to(b_hn_ref[:, H2:], (B, H2))

            def step(s, h_cat):
                tb = L - 1 - s
                gh = jnp.dot(h_cat, whh, preferred_element_type=jnp.float32)  # (B, 12H)
                gxf = xpf[pl.ds(s * B, B), :]                      # (B, 6H)
                gxb = xpb[pl.ds(tb * B, B), :]
                ghf, ghb = gh[:, :H6], gh[:, H6:]
                r_f = jax.nn.sigmoid(gxf[:, :H2] + ghf[:, :H2])
                z_f = jax.nn.sigmoid(gxf[:, H2:H4] + ghf[:, H2:H4])
                n_f = jnp.tanh(gxf[:, H4:] + r_f * (ghf[:, H4:] + bhn_f))
                h_f = (1.0 - z_f) * n_f + z_f * h_cat[:, :H2]
                r_b = jax.nn.sigmoid(gxb[:, :H2] + ghb[:, :H2])
                z_b = jax.nn.sigmoid(gxb[:, H2:H4] + ghb[:, H2:H4])
                n_b = jnp.tanh(gxb[:, H4:] + r_b * (ghb[:, H4:] + bhn_b))
                h_b = (1.0 - z_b) * n_b + z_b * h_cat[:, H2:]
                hf[pl.ds(s * B, B), :] = h_f
                hb[pl.ds(tb * B, B), :] = h_b
                return jnp.concatenate([h_f, h_b], axis=-1)        # (B, 4H)

            h0 = jnp.zeros((B, H4), jnp.float32)
            if full_unroll:
                h_cat = h0
                for s in range(L):
                    h_cat = step(s, h_cat)
            else:
                jax.lax.fori_loop(0, L, step, h0, unroll=dyn_unroll)

        # ---- layer 0: input width 1 -> whole-sequence VPU broadcast projection
        w0f, w0b, b0f, b0b, whh0, bhn0 = w_refs[0:6]
        xb1 = x_ref[:, 0:1]                         # systematic-branch input, (L*B, 1)
        xb2 = x_ref[:, 1:2]                         # interleaved-branch input
        xpf[...] = xb1 * w0f[0:1, :] + xb2 * w0f[1:2, :] + b0f[...]
        xpb[...] = xb1 * w0b[0:1, :] + xb2 * w0b[1:2, :] + b0b[...]
        recurrence(whh0, bhn0)

        # ---- deeper layers: whole-sequence MXU projections from stored hidden states
        for l in range(1, num_layers):
            wlf, wlb, blf, blb, whhl, bhnl = w_refs[6 * l:6 * (l + 1)]
            hfa = hf[...]                           # (L*B, 2H) prev-layer fwd states
            hba = hb[...]                           # (L*B, 2H) prev-layer bwd states
            pf = (jnp.dot(hfa, wlf[:H2, :], preferred_element_type=jnp.float32)
                  + jnp.dot(hba, wlf[H2:, :], preferred_element_type=jnp.float32)
                  + blf[...])
            pb = (jnp.dot(hfa, wlb[:H2, :], preferred_element_type=jnp.float32)
                  + jnp.dot(hba, wlb[H2:, :], preferred_element_type=jnp.float32)
                  + blb[...])
            xpf[...] = pf
            xpb[...] = pb
            recurrence(whhl, bhnl)

        # ---- fused Linear(2H -> 1) + ELU head (VPU multiply + lane reduce per branch)
        w_hf, w_hb, b_h = w_refs[6 * num_layers:]
        hfa = hf[...]
        hba = hb[...]
        y1 = (jnp.sum(hfa * w_hf[0:1, :], axis=-1, keepdims=True)
              + jnp.sum(hba * w_hb[0:1, :], axis=-1, keepdims=True))
        y2 = (jnp.sum(hfa * w_hf[1:2, :], axis=-1, keepdims=True)
              + jnp.sum(hba * w_hb[1:2, :], axis=-1, keepdims=True))
        y = jnp.concatenate([y1, y2], axis=-1) + b_h[...]          # (L*B, 2)
        # ELU (exp argument clamped so the dead branch never produces inf)
        o_ref[...] = jnp.where(y > 0.0, y, jnp.exp(jnp.minimum(y, 0.0)) - 1.0)

    return kernel


# -------------------------------------------------------------------------- wrapper
def enc_turbofy_rate2(x, weights, p_array):
    """x: (B, L, 1) float32 bits -> codes: (B, L, 2)."""
    B, L, _ = x.shape
    H = weights[-3].shape[1] // 2            # w_head_f: (2, 2H)
    num_layers = (len(weights) - 3) // 6

    x_tm = jnp.transpose(x[:, :, 0]).astype(jnp.float32)           # (L, B) time-major
    x_perm = jnp.take(x_tm, p_array.astype(jnp.int32), axis=0)     # interleaved input (XLA gather)
    x2 = jnp.stack([x_tm, x_perm], axis=-1).reshape(L * B, 2)      # (L*B, 2), branch last

    y = pl.pallas_call(
        make_kernel(num_layers, L, B, H),
        out_shape=jax.ShapeDtypeStruct((L * B, 2), jnp.float32),
        scratch_shapes=[
            pltpu.VMEM((L * B, 6 * H), jnp.float32),   # fwd gate projections (both branches)
            pltpu.VMEM((L * B, 6 * H), jnp.float32),   # bwd gate projections (both branches)
            pltpu.VMEM((L * B, 2 * H), jnp.float32),   # fwd hidden states   (both branches)
            pltpu.VMEM((L * B, 2 * H), jnp.float32),   # bwd hidden states   (both branches)
        ],
    )(x2, *weights)

    y = jnp.transpose(y.reshape(L, B, 2), (1, 0, 2))               # (B, L, 2)
    # power constraint: whole-tensor (x - mean) / unbiased std (tiny global reduce, XLA)
    mean = jnp.mean(y)
    std = jnp.std(y, ddof=1)
    return (y - mean) / std


# -------------------------------------------------- raw (PyTorch-layout) parameters
def init_raw_params(key, hidden, num_layers):
    def uni(k, shape, bound):
        return jax.random.uniform(k, shape, jnp.float32, -bound, bound)

    bound = 1.0 / math.sqrt(hidden)           # PyTorch GRU init range
    raw = {}
    for name in ("rnn1", "rnn2"):
        layers = []
        for l in range(num_layers):
            in_sz = 1 if l == 0 else 2 * hidden
            layer = {}
            for d in ("fwd", "bwd"):
                key, k0, k1, k2, k3 = jax.random.split(key, 5)
                layer[d] = dict(
                    w_ih=uni(k0, (3 * hidden, in_sz), bound),
                    w_hh=uni(k1, (3 * hidden, hidden), bound),
                    b_ih=uni(k2, (3 * hidden,), bound),
                    b_hh=uni(k3, (3 * hidden,), bound),
                )
            layers.append(layer)
        raw[name] = layers

    lb = 1.0 / math.sqrt(2 * hidden)          # PyTorch Linear init range
    for name in ("lin1", "lin2"):
        key, k0, k1 = jax.random.split(key, 3)
        raw[name] = dict(w=uni(k0, (1, 2 * hidden), lb), b=uni(k1, (1,), lb))
    return raw


# ---------------------------------------------------- pack params for the kernel
def pack_params(raw, H, num_layers):
    """Pack raw (PyTorch-layout) params into the kernel's branch/direction-folded layouts.

    Gate-column layout per direction (6H): [r_br1|r_br2 | z_br1|z_br2 | n_br1|n_br2].
    Hidden-state layout (4H):              [h_fwd_br1 | h_fwd_br2 | h_bwd_br1 | h_bwd_br2].
    """
    H2, H4, H6, H12 = 2 * H, 4 * H, 6 * H, 12 * H
    br_names = ("rnn1", "rnn2")
    weights = []

    for l in range(num_layers):
        in_rows = 2 if l == 0 else H4
        w_in = {"fwd": np.zeros((in_rows, H6), np.float32),
                "bwd": np.zeros((in_rows, H6), np.float32)}
        b_in = {"fwd": np.zeros((1, H6), np.float32),
                "bwd": np.zeros((1, H6), np.float32)}
        w_hh = np.zeros((H4, H12), np.float32)    # block-diag over branch x direction
        b_hn = np.zeros((1, H4), np.float32)

        for k, name in enumerate(br_names):
            for d_idx, d in enumerate(("fwd", "bwd")):
                p = raw[name][l][d]
                wih_t = np.asarray(p["w_ih"]).T          # (in_sz, 3H), gates r|z|n
                whh_t = np.asarray(p["w_hh"]).T          # (H, 3H)
                bih = np.asarray(p["b_ih"])
                bhh = np.asarray(p["b_hh"])
                row_off = d_idx * H2                     # fwd rows 0:2H, bwd rows 2H:4H
                col_off = d_idx * H6                     # fwd cols 0:6H, bwd cols 6H:12H
                for g in range(3):
                    col = slice(g * H2 + k * H, g * H2 + (k + 1) * H)
                    # hidden -> gates
                    w_hh[row_off + k * H:row_off + (k + 1) * H,
                         col_off + g * H2 + k * H:col_off + g * H2 + (k + 1) * H] = \
                        whh_t[:, g * H:(g + 1) * H]
                    # input -> gates
                    if l == 0:
                        w_in[d][k, col] = wih_t[0, g * H:(g + 1) * H]
                    else:
                        # rows 0:2H multiply prev-layer fwd states, rows 2H:4H the bwd states
                        w_in[d][k * H:(k + 1) * H, col] = wih_t[0:H, g * H:(g + 1) * H]
                        w_in[d][H2 + k * H:H2 + (k + 1) * H, col] = \
                            wih_t[H:H2, g * H:(g + 1) * H]
                    # fold b_ih (+ b_hh for r,z) into the projection bias; b_hh_n per step
                    if g < 2:
                        b_in[d][0, col] = bih[g * H:(g + 1) * H] + bhh[g * H:(g + 1) * H]
                    else:
                        b_in[d][0, col] = bih[g * H:(g + 1) * H]
                b_hn[0, row_off + k * H:row_off + (k + 1) * H] = bhh[H2:3 * H]

        weights += [w_in["fwd"], w_in["bwd"], b_in["fwd"], b_in["bwd"], w_hh, b_hn]

    # head: Linear(2H -> 1) per branch, split into fwd-state / bwd-state halves
    w_hf = np.zeros((2, H2), np.float32)
    w_hb = np.zeros((2, H2), np.float32)
    b_h = np.zeros((1, 2), np.float32)
    for k, name in enumerate(("lin1", "lin2")):
        w = np.asarray(raw[name]["w"])               # (1, 2H)
        w_hf[k, k * H:(k + 1) * H] = w[0, :H]
        w_hb[k, k * H:(k + 1) * H] = w[0, H:]
        b_h[0, k] = float(np.asarray(raw[name]["b"])[0])
    weights += [w_hf, w_hb, b_h]

    return [jnp.asarray(w) for w in weights]


# ----------------------------------------------------------- pure-JAX reference
def _hdot(a, b):
    return jnp.dot(a, b, precision=jax.lax.Precision.HIGHEST)


def _gru_ref_dir(x_seq, p, reverse):
    H = p["w_hh"].shape[1]
    w_ih, w_hh, b_ih, b_hh = p["w_ih"], p["w_hh"], p["b_ih"], p["b_hh"]

    def cell(h, x_t):
        gi = _hdot(x_t, w_ih.T) + b_ih
        gh = _hdot(h, w_hh.T) + b_hh
        r = jax.nn.sigmoid(gi[:, :H] + gh[:, :H])
        z = jax.nn.sigmoid(gi[:, H:2 * H] + gh[:, H:2 * H])
        n = jnp.tanh(gi[:, 2 * H:] + r * gh[:, 2 * H:])
        h_new = (1.0 - z) * n + z * h
        return h_new, h_new

    xs = x_seq[::-1] if reverse else x_seq
    h0 = jnp.zeros((x_seq.shape[1], H), jnp.float32)
    _, hs = jax.lax.scan(cell, h0, xs)
    return hs[::-1] if reverse else hs


def _bigru_ref(x_seq, layers):
    h = x_seq
    for layer in layers:
        hf = _gru_ref_dir(h, layer["fwd"], False)
        hb = _gru_ref_dir(h, layer["bwd"], True)
        h = jnp.concatenate([hf, hb], axis=-1)
    return h


def enc_turbofy_rate2_ref(x, raw, p_array):
    x_tm = jnp.transpose(x, (1, 0, 2)).astype(jnp.float32)
    h1 = _bigru_ref(x_tm, raw["rnn1"])
    xs = _hdot(h1, raw["lin1"]["w"].T) + raw["lin1"]["b"]
    xs = jnp.where(xs > 0, xs, jnp.expm1(xs))
    h2 = _bigru_ref(x_tm[p_array], raw["rnn2"])
    xp = _hdot(h2, raw["lin2"]["w"].T) + raw["lin2"]["b"]
    xp = jnp.where(xp > 0, xp, jnp.expm1(xp))
    x_tx = jnp.concatenate([jnp.transpose(xs, (1, 0, 2)),
                            jnp.transpose(xp, (1, 0, 2))], axis=-1)   # (B, L, 2)
    mean = jnp.mean(x_tx)
    std = jnp.std(x_tx, ddof=1)
    return (x_tx - mean) / std


# ----------------------------------------------------------------------------- main
if __name__ == "__main__":
    B, L, H, NLAYERS = 2, 8, 16, 2   # batch, block_len, enc_num_unit, enc_num_layer

    key = jax.random.PRNGKey(0)
    key, kp, kx, kperm = jax.random.split(key, 4)

    raw = init_raw_params(kp, H, NLAYERS)
    weights = pack_params(raw, H, NLAYERS)
    x = jax.random.bernoulli(kx, 0.5, (B, L, 1)).astype(jnp.float32)  # message bits
    p_array = jax.random.permutation(kperm, L)                        # interleaver perm

    codes = jax.jit(enc_turbofy_rate2)(x, weights, p_array)
    codes = jax.block_until_ready(codes)

    assert codes.shape == (B, L, 2)
    assert bool(jnp.all(jnp.isfinite(codes)))

    codes_ref = enc_turbofy_rate2_ref(x, raw, p_array)
    err = float(jnp.max(jnp.abs(codes - codes_ref)))
    assert err < 1e-2, f"mismatch vs pure-JAX reference: {err}"

    print("KERNEL_OK")
</pallas_src>

<mosaic_0001>
module attributes {stable_mosaic.version = 11 : i64} {
  func.func @kernel(%arg0: memref<16x2xf32, #tpu.memory_space<vmem>>, %arg1: memref<2x96xf32, #tpu.memory_space<vmem>>, %arg2: memref<2x96xf32, #tpu.memory_space<vmem>>, %arg3: memref<1x96xf32, #tpu.memory_space<vmem>>, %arg4: memref<1x96xf32, #tpu.memory_space<vmem>>, %arg5: memref<64x192xf32, #tpu.memory_space<vmem>>, %arg6: memref<1x64xf32, #tpu.memory_space<vmem>>, %arg7: memref<64x96xf32, #tpu.memory_space<vmem>>, %arg8: memref<64x96xf32, #tpu.memory_space<vmem>>, %arg9: memref<1x96xf32, #tpu.memory_space<vmem>>, %arg10: memref<1x96xf32, #tpu.memory_space<vmem>>, %arg11: memref<64x192xf32, #tpu.memory_space<vmem>>, %arg12: memref<1x64xf32, #tpu.memory_space<vmem>>, %arg13: memref<2x32xf32, #tpu.memory_space<vmem>>, %arg14: memref<2x32xf32, #tpu.memory_space<vmem>>, %arg15: memref<1x2xf32, #tpu.memory_space<vmem>>, %arg16: memref<16x2xf32, #tpu.memory_space<vmem>>, %arg17: memref<16x96xf32, #tpu.memory_space<vmem>>, %arg18: memref<16x96xf32, #tpu.memory_space<vmem>>, %arg19: memref<16x32xf32, #tpu.memory_space<vmem>>, %arg20: memref<16x32xf32, #tpu.memory_space<vmem>>) attributes {dimension_semantics = [], scalar_prefetch = 0 : i64, scratch_operands = 4 : i64, tpu.core_type = #tpu.core_type<tc>} {
    %c0 = arith.constant 0 : index
    %c0_0 = arith.constant 0 : index
    %0 = vector.load %arg0[%c0, %c0_0] : memref<16x2xf32, #tpu.memory_space<vmem>>, vector<16x1xf32>
    %c0_1 = arith.constant 0 : index
    %c1 = arith.constant 1 : index
    %1 = vector.load %arg0[%c0_1, %c1] : memref<16x2xf32, #tpu.memory_space<vmem>>, vector<16x1xf32>
    %c0_2 = arith.constant 0 : index
    %c0_3 = arith.constant 0 : index
    %2 = vector.load %arg1[%c0_2, %c0_3] : memref<2x96xf32, #tpu.memory_space<vmem>>, vector<1x96xf32>
    %3 = vector.broadcast %0 : vector<16x1xf32> to vector<16x96xf32>
    %4 = vector.broadcast %2 : vector<1x96xf32> to vector<16x96xf32>
    %5 = arith.mulf %3, %4 : vector<16x96xf32>
    %c1_4 = arith.constant 1 : index
    %c0_5 = arith.constant 0 : index
    %6 = vector.load %arg1[%c1_4, %c0_5] : memref<2x96xf32, #tpu.memory_space<vmem>>, vector<1x96xf32>
    %7 = vector.broadcast %1 : vector<16x1xf32> to vector<16x96xf32>
    %8 = vector.broadcast %6 : vector<1x96xf32> to vector<16x96xf32>
    %9 = arith.mulf %7, %8 : vector<16x96xf32>
    %10 = arith.addf %5, %9 : vector<16x96xf32>
    %c0_6 = arith.constant 0 : index
    %c0_7 = arith.constant 0 : index
    %11 = vector.load %arg3[%c0_6, %c0_7] : memref<1x96xf32, #tpu.memory_space<vmem>>, vector<1x96xf32>
    %12 = vector.broadcast %11 : vector<1x96xf32> to vector<16x96xf32>
    %13 = arith.addf %10, %12 : vector<16x96xf32>
    %c0_8 = arith.constant 0 : index
    %c0_9 = arith.constant 0 : index
    %14 = vector.load %arg17[%c0_8, %c0_9] : memref<16x96xf32, #tpu.memory_space<vmem>>, vector<16x96xf32>
    tpu.vector_store %arg17[%c0_8, %c0_9], %13 {strides = array<i32>} : memref<16x96xf32, #tpu.memory_space<vmem>>, vector<16x96xf32>,
    %c0_10 = arith.constant 0 : index
    %c0_11 = arith.constant 0 : index
    %15 = vector.load %arg2[%c0_10, %c0_11] : memref<2x96xf32, #tpu.memory_space<vmem>>, vector<1x96xf32>
    %16 = vector.broadcast %0 : vector<16x1xf32> to vector<16x96xf32>
    %17 = vector.broadcast %15 : vector<1x96xf32> to vector<16x96xf32>
    %18 = arith.mulf %16, %17 : vector<16x96xf32>
    %c1_12 = arith.constant 1 : index
    %c0_13 = arith.constant 0 : index
    %19 = vector.load %arg2[%c1_12, %c0_13] : memref<2x96xf32, #tpu.memory_space<vmem>>, vector<1x96xf32>
    %20 = vector.broadcast %1 : vector<16x1xf32> to vector<16x96xf32>
    %21 = vector.broadcast %19 : vector<1x96xf32> to vector<16x96xf32>
    %22 = arith.mulf %20, %21 : vector<16x96xf32>
    %23 = arith.addf %18, %22 : vector<16x96xf32>
    %c0_14 = arith.constant 0 : index
    %c0_15 = arith.constant 0 : index
    %24 = vector.load %arg4[%c0_14, %c0_15] : memref<1x96xf32, #tpu.memory_space<vmem>>, vector<1x96xf32>
    %25 = vector.broadcast %24 : vector<1x96xf32> to vector<16x96xf32>
    %26 = arith.addf %23, %25 : vector<16x96xf32>
    %c0_16 = arith.constant 0 : index
    %c0_17 = arith.constant 0 : index
    %27 = vector.load %arg18[%c0_16, %c0_17] : memref<16x96xf32, #tpu.memory_space<vmem>>, vector<16x96xf32>
    tpu.vector_store %arg18[%c0_16, %c0_17], %26 {strides = array<i32>} : memref<16x96xf32, #tpu.memory_space<vmem>>, vector<16x96xf32>,
    %c0_18 = arith.constant 0 : index
    %c0_19 = arith.constant 0 : index
    %28 = vector.load %arg5[%c0_18, %c0_19] : memref<64x192xf32, #tpu.memory_space<vmem>>, vector<64x192xf32>
    %c0_20 = arith.constant 0 : index
    %c0_21 = arith.constant 0 : index
    %29 = vector.load %arg6[%c0_20, %c0_21] : memref<1x64xf32, #tpu.memory_space<vmem>>, vector<1x32xf32>
    %30 = vector.shape_cast %29 : vector<1x32xf32> to vector<1x32xf32>
    %31 = vector.broadcast %30 : vector<1x32xf32> to vector<2x32xf32>
    %c0_22 = arith.constant 0 : index
    %c32 = arith.constant 32 : index
    %32 = vector.load %arg6[%c0_22, %c32] : memref<1x64xf32, #tpu.memory_space<vmem>>, vector<1x32xf32>
    %33 = vector.shape_cast %32 : vector<1x32xf32> to vector<1x32xf32>
    %34 = vector.broadcast %33 : vector<1x32xf32> to vector<2x32xf32>
    %cst = arith.constant 0.000000e+00 : f32
    %35 = vector.broadcast %cst : f32 to vector<2x64xf32>
    %cst_23 = arith.constant dense<0.000000e+00> : vector<2x192xf32>
    %36 = tpu.matmul %35, %28, %cst_23 {dimension_numbers = #tpu.dot_dimension_numbers<[1], [0], [0], [1], [0, 0, 1, 1], [], []>} : vector<2x64xf32>, vector<64x192xf32>, vector<2x192xf32> -> vector<2x192xf32>
    %c0_24 = arith.constant 0 : index
    %c0_25 = arith.constant 0 : index
    %37 = vector.load %arg17[%c0_24, %c0_25] : memref<16x96xf32, #tpu.memory_space<vmem>>, vector<2x96xf32>
    %c14 = arith.constant 14 : index
    %c0_26 = arith.constant 0 : index
    %38 = vector.load %arg18[%c14, %c0_26] : memref<16x96xf32, #tpu.memory_space<vmem>>, vector<2x96xf32>
    %39 = vector.extract_strided_slice %36 {offsets = [0, 0], sizes = [2, 96], strides = [1, 1]} : vector<2x192xf32> to vector<2x96xf32>
    %40 = vector.extract_strided_slice %36 {offsets = [0, 96], sizes = [2, 96], strides = [1, 1]} : vector<2x192xf32> to vector<2x96xf32>
    %41 = vector.extract_strided_slice %37 {offsets = [0, 0], sizes = [2, 32], strides = [1, 1]} : vector<2x96xf32> to vector<2x32xf32>
    %42 = vector.extract_strided_slice %39 {offsets = [0, 0], sizes = [2, 32], strides = [1, 1]} : vector<2x96xf32> to vector<2x32xf32>
    %43 = arith.addf %41, %42 : vector<2x32xf32>
    %44 = arith.negf %43 : vector<2x32xf32>
    %45 = math.exp %44 : vector<2x32xf32>
    %cst_27 = arith.constant 1.000000e+00 : f32
    %46 = vector.broadcast %cst_27 : f32 to vector<2x32xf32>
    %47 = arith.addf %46, %45 : vector<2x32xf32>
    %48 = arith.divf %46, %47 : vector<2x32xf32>
    %49 = vector.extract_strided_slice %37 {offsets = [0, 32], sizes = [2, 32], strides = [1, 1]} : vector<2x96xf32> to vector<2x32xf32>
    %50 = vector.extract_strided_slice %39 {offsets = [0, 32], sizes = [2, 32], strides = [1, 1]} : vector<2x96xf32> to vector<2x32xf32>
    %51 = arith.addf %49, %50 : vector<2x32xf32>
    %52 = arith.negf %51 : vector<2x32xf32>
    %53 = math.exp %52 : vector<2x32xf32>
    %cst_28 = arith.constant 1.000000e+00 : f32
    %54 = vector.broadcast %cst_28 : f32 to vector<2x32xf32>
    %55 = arith.addf %54, %53 : vector<2x32xf32>
    %56 = arith.divf %54, %55 : vector<2x32xf32>
    %57 = vector.extract_strided_slice %37 {offsets = [0, 64], sizes = [2, 32], strides = [1, 1]} : vector<2x96xf32> to vector<2x32xf32>
    %58 = vector.extract_strided_slice %39 {offsets = [0, 64], sizes = [2, 32], strides = [1, 1]} : vector<2x96xf32> to vector<2x32xf32>
    %59 = arith.addf %58, %31 : vector<2x32xf32>
    %60 = arith.mulf %48, %59 : vector<2x32xf32>
    %61 = arith.addf %57, %60 : vector<2x32xf32>
    %62 = math.tanh %61 : vector<2x32xf32>
    %cst_29 = arith.constant 1.000000e+00 : f32
    %63 = vector.broadcast %cst_29 : f32 to vector<2x32xf32>
    %64 = arith.subf %63, %56 : vector<2x32xf32>
    %65 = arith.mulf %64, %62 : vector<2x32xf32>
    %66 = vector.extract_strided_slice %35 {offsets = [0, 0], sizes = [2, 32], strides = [1, 1]} : vector<2x64xf32> to vector<2x32xf32>
    %67 = arith.mulf %56, %66 : vector<2x32xf32>
    %68 = arith.addf %65, %67 : vector<2x32xf32>
    %69 = vector.extract_strided_slice %38 {offsets = [0, 0], sizes = [2, 32], strides = [1, 1]} : vector<2x96xf32> to vector<2x32xf32>
    %70 = vector.extract_strided_slice %40 {offsets = [0, 0], sizes = [2, 32], strides = [1, 1]} : vector<2x96xf32> to vector<2x32xf32>
    %71 = arith.addf %69, %70 : vector<2x32xf32>
    %72 = arith.negf %71 : vector<2x32xf32>
    %73 = math.exp %72 : vector<2x32xf32>
    %cst_30 = arith.constant 1.000000e+00 : f32
    %74 = vector.broadcast %cst_30 : f32 to vector<2x32xf32>
    %75 = arith.addf %74, %73 : vector<2x32xf32>
    %76 = arith.divf %74, %75 : vector<2x32xf32>
    %77 = vector.extract_strided_slice %38 {offsets = [0, 32], sizes = [2, 32], strides = [1, 1]} : vector<2x96xf32> to vector<2x32xf32>
    %78 = vector.extract_strided_slice %40 {offsets = [0, 32], sizes = [2, 32], strides = [1, 1]} : vector<2x96xf32> to vector<2x32xf32>
    %79 = arith.addf %77, %78 : vector<2x32xf32>
    %80 = arith.negf %79 : vector<2x32xf32>
    %81 = math.exp %80 : vector<2x32xf32>
    %cst_31 = arith.constant 1.000000e+00 : f32
    %82 = vector.broadcast %cst_31 : f32 to vector<2x32xf32>
    %83 = arith.addf %82, %81 : vector<2x32xf32>
    %84 = arith.divf %82, %83 : vector<2x32xf32>
    %85 = vector.extract_strided_slice %38 {offsets = [0, 64], sizes = [2, 32], strides = [1, 1]} : vector<2x96xf32> to vector<2x32xf32>
    %86 = vector.extract_strided_slice %40 {offsets = [0, 64], sizes = [2, 32], strides = [1, 1]} : vector<2x96xf32> to vector<2x32xf32>
    %87 = arith.addf %86, %34 : vector<2x32xf32>
    %88 = arith.mulf %76, %87 : vector<2x32xf32>
    %89 = arith.addf %85, %88 : vector<2x32xf32>
    %90 = math.tanh %89 : vector<2x32xf32>
    %cst_32 = arith.constant 1.000000e+00 : f32
    %91 = vector.broadcast %cst_32 : f32 to vector<2x32xf32>
    %92 = arith.subf %91, %84 : vector<2x32xf32>
    %93 = arith.mulf %92, %90 : vector<2x32xf32>
    %94 = vector.extract_strided_slice %35 {offsets = [0, 32], sizes = [2, 32], strides = [1, 1]} : vector<2x64xf32> to vector<2x32xf32>
    %95 = arith.mulf %84, %94 : vector<2x32xf32>
    %96 = arith.addf %93, %95 : vector<2x32xf32>
    %c0_33 = arith.constant 0 : index
    %c0_34 = arith.constant 0 : index
    %97 = vector.load %arg19[%c0_33, %c0_34] : memref<16x32xf32, #tpu.memory_space<vmem>>, vector<2x32xf32>
    tpu.vector_store %arg19[%c0_33, %c0_34], %68 {strides = array<i32>} : memref<16x32xf32, #tpu.memory_space<vmem>>, vector<2x32xf32>,
    %c14_35 = arith.constant 14 : index
    %c0_36 = arith.constant 0 : index
    %98 = vector.load %arg20[%c14_35, %c0_36] : memref<16x32xf32, #tpu.memory_space<vmem>>, vector<2x32xf32>
    tpu.vector_store %arg20[%c14_35, %c0_36], %96 {strides = array<i32>} : memref<16x32xf32, #tpu.memory_space<vmem>>, vector<2x32xf32>,
    %99 = tpu.concatenate %68, %96 in 1 : vector<2x32xf32>, vector<2x32xf32> -> vector<2x64xf32>
    %cst_37 = arith.constant dense<0.000000e+00> : vector<2x192xf32>
    %100 = tpu.matmul %99, %28, %cst_37 {dimension_numbers = #tpu.dot_dimension_numbers<[1], [0], [0], [1], [0, 0, 1, 1], [], []>} : vector<2x64xf32>, vector<64x192xf32>, vector<2x192xf32> -> vector<2x192xf32>
    %c2 = arith.constant 2 : index
    %c0_38 = arith.constant 0 : index
    %101 = vector.load %arg17[%c2, %c0_38] : memref<16x96xf32, #tpu.memory_space<vmem>>, vector<2x96xf32>
    %c12 = arith.constant 12 : index
    %c0_39 = arith.constant 0 : index
    %102 = vector.load %arg18[%c12, %c0_39] : memref<16x96xf32, #tpu.memory_space<vmem>>, vector<2x96xf32>
    %103 = vector.extract_strided_slice %100 {offsets = [0, 0], sizes = [2, 96], strides = [1, 1]} : vector<2x192xf32> to vector<2x96xf32>
    %104 = vector.extract_strided_slice %100 {offsets = [0, 96], sizes = [2, 96], strides = [1, 1]} : vector<2x192xf32> to vector<2x96xf32>
    %105 = vector.extract_strided_slice %101 {offsets = [0, 0], sizes = [2, 32], strides = [1, 1]} : vector<2x96xf32> to vector<2x32xf32>
    %106 = vector.extract_strided_slice %103 {offsets = [0, 0], sizes = [2, 32], strides = [1, 1]} : vector<2x96xf32> to vector<2x32xf32>
    %107 = arith.addf %105, %106 : vector<2x32xf32>
    %108 = arith.negf %107 : vector<2x32xf32>
    %109 = math.exp %108 : vector<2x32xf32>
    %cst_40 = arith.constant 1.000000e+00 : f32
    %110 = vector.broadcast %cst_40 : f32 to vector<2x32xf32>
    %111 = arith.addf %110, %109 : vector<2x32xf32>
    %112 = arith.divf %110, %111 : vector<2x32xf32>
    %113 = vector.extract_strided_slice %101 {offsets = [0, 32], sizes = [2, 32], strides = [1, 1]} : vector<2x96xf32> to vector<2x32xf32>
    %114 = vector.extract_strided_slice %103 {offsets = [0, 32], sizes = [2, 32], strides = [1, 1]} : vector<2x96xf32> to vector<2x32xf32>
    %115 = arith.addf %113, %114 : vector<2x32xf32>
    %116 = arith.negf %115 : vector<2x32xf32>
    %117 = math.exp %116 : vector<2x32xf32>
    %cst_41 = arith.constant 1.000000e+00 : f32
    %118 = vector.broadcast %cst_41 : f32 to vector<2x32xf32>
    %119 = arith.addf %118, %117 : vector<2x32xf32>
    %120 = arith.divf %118, %119 : vector<2x32xf32>
    %121 = vector.extract_strided_slice %101 {offsets = [0, 64], sizes = [2, 32], strides = [1, 1]} : vector<2x96xf32> to vector<2x32xf32>
    %122 = vector.extract_strided_slice %103 {offsets = [0, 64], sizes = [2, 32], strides = [1, 1]} : vector<2x96xf32> to vector<2x32xf32>
    %123 = arith.addf %122, %31 : vector<2x32xf32>
    %124 = arith.mulf %112, %123 : vector<2x32xf32>
    %125 = arith.addf %121, %124 : vector<2x32xf32>
    %126 = math.tanh %125 : vector<2x32xf32>
    %cst_42 = arith.constant 1.000000e+00 : f32
    %127 = vector.broadcast %cst_42 : f32 to vector<2x32xf32>
    %128 = arith.subf %127, %120 : vector<2x32xf32>
    %129 = arith.mulf %128, %126 : vector<2x32xf32>
    %130 = vector.extract_strided_slice %99 {offsets = [0, 0], sizes = [2, 32], strides = [1, 1]} : vector<2x64xf32> to vector<2x32xf32>
    %131 = arith.mulf %120, %130 : vector<2x32xf32>
    %132 = arith.addf %129, %131 : vector<2x32xf32>
    %133 = vector.extract_strided_slice %102 {offsets = [0, 0], sizes = [2, 32], strides = [1, 1]} : vector<2x96xf32> to vector<2x32xf32>
    %134 = vector.extract_strided_slice %104 {offsets = [0, 0], sizes = [2, 32], strides = [1, 1]} : vector<2x96xf32> to vector<2x32xf32>
    %135 = arith.addf %133, %134 : vector<2x32xf32>
    %136 = arith.negf %135 : vector<2x32xf32>
    %137 = math.exp %136 : vector<2x32xf32>
    %cst_43 = arith.constant 1.000000e+00 : f32
    %138 = vector.broadcast %cst_43 : f32 to vector<2x32xf32>
    %139 = arith.addf %138, %137 : vector<2x32xf32>
    %140 = arith.divf %138, %139 : vector<2x32xf32>
    %141 = vector.extract_strided_slice %102 {offsets = [0, 32], sizes = [2, 32], strides = [1, 1]} : vector<2x96xf32> to vector<2x32xf32>
    %142 = vector.extract_strided_slice %104 {offsets = [0, 32], sizes = [2, 32], strides = [1, 1]} : vector<2x96xf32> to vector<2x32xf32>
    %143 = arith.addf %141, %142 : vector<2x32xf32>
    %144 = arith.negf %143 : vector<2x32xf32>
    %145 = math.exp %144 : vector<2x32xf32>
    %cst_44 = arith.constant 1.000000e+00 : f32
    %146 = vector.broadcast %cst_44 : f32 to vector<2x32xf32>
    %147 = arith.addf %146, %145 : vector<2x32xf32>
    %148 = arith.divf %146, %147 : vector<2x32xf32>
    %149 = vector.extract_strided_slice %102 {offsets = [0, 64], sizes = [2, 32], strides = [1, 1]} : vector<2x96xf32> to vector<2x32xf32>
    %150 = vector.extract_strided_slice %104 {offsets = [0, 64], sizes = [2, 32], strides = [1, 1]} : vector<2x96xf32> to vector<2x32xf32>
    %151 = arith.addf %150, %34 : vector<2x32xf32>
    %152 = arith.mulf %140, %151 : vector<2x32xf32>
    %153 = arith.addf %149, %152 : vector<2x32xf32>
    %154 = math.tanh %153 : vector<2x32xf32>
    %cst_45 = arith.constant 1.000000e+00 : f32
    %155 = vector.broadcast %cst_45 : f32 to vector<2x32xf32>
    %156 = arith.subf %155, %148 : vector<2x32xf32>
    %157 = arith.mulf %156, %154 : vector<2x32xf32>
    %158 = vector.extract_strided_slice %99 {offsets = [0, 32], sizes = [2, 32], strides = [1, 1]} : vector<2x64xf32> to vector<2x32xf32>
    %159 = arith.mulf %148, %158 : vector<2x32xf32>
    %160 = arith.addf %157, %159 : vector<2x32xf32>
    %c2_46 = arith.constant 2 : index
    %c0_47 = arith.constant 0 : index
    %161 = vector.load %arg19[%c2_46, %c0_47] : memref<16x32xf32, #tpu.memory_space<vmem>>, vector<2x32xf32>
    tpu.vector_store %arg19[%c2_46, %c0_47], %132 {strides = array<i32>} : memref<16x32xf32, #tpu.memory_space<vmem>>, vector<2x32xf32>,
    %c12_48 = arith.constant 12 : index
    %c0_49 = arith.constant 0 : index
    %162 = vector.load %arg20[%c12_48, %c0_49] : memref<16x32xf32, #tpu.memory_space<vmem>>, vector<2x32xf32>
    tpu.vector_store %arg20[%c12_48, %c0_49], %160 {strides = array<i32>} : memref<16x32xf32, #tpu.memory_space<vmem>>, vector<2x32xf32>,
    %163 = tpu.concatenate %132, %160 in 1 : vector<2x32xf32>, vector<2x32xf32> -> vector<2x64xf32>
    %cst_50 = arith.constant dense<0.000000e+00> : vector<2x192xf32>
    %164 = tpu.matmul %163, %28, %cst_50 {dimension_numbers = #tpu.dot_dimension_numbers<[1], [0], [0], [1], [0, 0, 1, 1], [], []>} : vector<2x64xf32>, vector<64x192xf32>, vector<2x192xf32> -> vector<2x192xf32>
    %c4 = arith.constant 4 : index
    %c0_51 = arith.constant 0 : index
    %165 = vector.load %arg17[%c4, %c0_51] : memref<16x96xf32, #tpu.memory_space<vmem>>, vector<2x96xf32>
    %c10 = arith.constant 10 : index
    %c0_52 = arith.constant 0 : index
    %166 = vector.load %arg18[%c10, %c0_52] : memref<16x96xf32, #tpu.memory_space<vmem>>, vector<2x96xf32>
    %167 = vector.extract_strided_slice %164 {offsets = [0, 0], sizes = [2, 96], strides = [1, 1]} : vector<2x192xf32> to vector<2x96xf32>
    %168 = vector.extract_strided_slice %164 {offsets = [0, 96], sizes = [2, 96], strides = [1, 1]} : vector<2x192xf32> to vector<2x96xf32>
    %169 = vector.extract_strided_slice %165 {offsets = [0, 0], sizes = [2, 32], strides = [1, 1]} : vector<2x96xf32> to vector<2x32xf32>
    %170 = vector.extract_strided_slice %167 {offsets = [0, 0], sizes = [2, 32], strides = [1, 1]} : vector<2x96xf32> to vector<2x32xf32>
    %171 = arith.addf %169, %170 : vector<2x32xf32>
    %172 = arith.negf %171 : vector<2x32xf32>
    %173 = math.exp %172 : vector<2x32xf32>
    %cst_53 = arith.constant 1.000000e+00 : f32
    %174 = vector.broadcast %cst_53 : f32 to vector<2x32xf32>
    %175 = arith.addf %174, %173 : vector<2x32xf32>
    %176 = arith.divf %174, %175 : vector<2x32xf32>
    %177 = vector.extract_strided_slice %165 {offsets = [0, 32], sizes = [2, 32], strides = [1, 1]} : vector<2x96xf32> to vector<2x32xf32>
    %178 = vector.extract_strided_slice %167 {offsets = [0, 32], sizes = [2, 32], strides = [1, 1]} : vector<2x96xf32> to vector<2x32xf32>
    %179 = arith.addf %177, %178 : vector<2x32xf32>
    %180 = arith.negf %179 : vector<2x32xf32>
    %181 = math.exp %180 : vector<2x32xf32>
    %cst_54 = arith.constant 1.000000e+00 : f32
    %182 = vector.broadcast %cst_54 : f32 to vector<2x32xf32>
    %183 = arith.addf %182, %181 : vector<2x32xf32>
    %184 = arith.divf %182, %183 : vector<2x32xf32>
    %185 = vector.extract_strided_slice %165 {offsets = [0, 64], sizes = [2, 32], strides = [1, 1]} : vector<2x96xf32> to vector<2x32xf32>
    %186 = vector.extract_strided_slice %167 {offsets = [0, 64], sizes = [2, 32], strides = [1, 1]} : vector<2x96xf32> to vector<2x32xf32>
    %187 = arith.addf %186, %31 : vector<2x32xf32>
    %188 = arith.mulf %176, %187 : vector<2x32xf32>
    %189 = arith.addf %185, %188 : vector<2x32xf32>
    %190 = math.tanh %189 : vector<2x32xf32>
    %cst_55 = arith.constant 1.000000e+00 : f32
    %191 = vector.broadcast %cst_55 : f32 to vector<2x32xf32>
    %192 = arith.subf %191, %184 : vector<2x32xf32>
    %193 = arith.mulf %192, %190 : vector<2x32xf32>
    %194 = vector.extract_strided_slice %163 {offsets = [0, 0], sizes = [2, 32], strides = [1, 1]} : vector<2x64xf32> to vector<2x32xf32>
    %195 = arith.mulf %184, %194 : vector<2x32xf32>
    %196 = arith.addf %193, %195 : vector<2x32xf32>
    %197 = vector.extract_strided_slice %166 {offsets = [0, 0], sizes = [2, 32], strides = [1, 1]} : vector<2x96xf32> to vector<2x32xf32>
    %198 = vector.extract_strided_slice %168 {offsets = [0, 0], sizes = [2, 32], strides = [1, 1]} : vector<2x96xf32> to vector<2x32xf32>
    %199 = arith.addf %197, %198 : vector<2x32xf32>
    %200 = arith.negf %199 : vector<2x32xf32>
    %201 = math.exp %200 : vector<2x32xf32>
    %cst_56 = arith.constant 1.000000e+00 : f32
    %202 = vector.broadcast %cst_56 : f32 to vector<2x32xf32>
    %203 = arith.addf %202, %201 : vector<2x32xf32>
    %204 = arith.divf %202, %203 : vector<2x32xf32>
    %205 = vector.extract_strided_slice %166 {offsets = [0, 32], sizes = [2, 32], strides = [1, 1]} : vector<2x96xf32> to vector<2x32xf32>
    %206 = vector.extract_strided_slice %168 {offsets = [0, 32], sizes = [2, 32], strides = [1, 1]} : vector<2x96xf32> to vector<2x32xf32>
    %207 = arith.addf %205, %206 : vector<2x32xf32>
    %208 = arith.negf %207 : vector<2x32xf32>
    %209 = math.exp %208 : vector<2x32xf32>
    %cst_57 = arith.constant 1.000000e+00 : f32
    %210 = vector.broadcast %cst_57 : f32 to vector<2x32xf32>
    %211 = arith.addf %210, %209 : vector<2x32xf32>
    %212 = arith.divf %210, %211 : vector<2x32xf32>
    %213 = vector.extract_strided_slice %166 {offsets = [0, 64], sizes = [2, 32], strides = [1, 1]} : vector<2x96xf32> to vector<2x32xf32>
    %214 = vector.extract_strided_slice %168 {offsets = [0, 64], sizes = [2, 32], strides = [1, 1]} : vector<2x96xf32> to vector<2x32xf32>
    %215 = arith.addf %214, %34 : vector<2x32xf32>
    %216 = arith.mulf %204, %215 : vector<2x32xf32>
    %217 = arith.addf %213, %216 : vector<2x32xf32>
    %218 = math.tanh %217 : vector<2x32xf32>
    %cst_58 = arith.constant 1.000000e+00 : f32
    %219 = vector.broadcast %cst_58 : f32 to vector<2x32xf32>
    %220 = arith.subf %219, %212 : vector<2x32xf32>
    %221 = arith.mulf %220, %218 : vector<2x32xf32>
    %222 = vector.extract_strided_slice %163 {offsets = [0, 32], sizes = [2, 32], strides = [1, 1]} : vector<2x64xf32> to vector<2x32xf32>
    %223 = arith.mulf %212, %222 : vector<2x32xf32>
    %224 = arith.addf %221, %223 : vector<2x32xf32>
    %c4_59 = arith.constant 4 : index
    %c0_60 = arith.constant 0 : index
    %225 = vector.load %arg19[%c4_59, %c0_60] : memref<16x32xf32, #tpu.memory_space<vmem>>, vector<2x32xf32>
    tpu.vector_store %arg19[%c4_59, %c0_60], %196 {strides = array<i32>} : memref<16x32xf32, #tpu.memory_space<vmem>>, vector<2x32xf32>,
    %c10_61 = arith.constant 10 : index
    %c0_62 = arith.constant 0 : index
    %226 = vector.load %arg20[%c10_61, %c0_62] : memref<16x32xf32, #tpu.memory_space<vmem>>, vector<2x32xf32>
    tpu.vector_store %arg20[%c10_61, %c0_62], %224 {strides = array<i32>} : memref<16x32xf32, #tpu.memory_space<vmem>>, vector<2x32xf32>,
    %227 = tpu.concatenate %196, %224 in 1 : vector<2x32xf32>, vector<2x32xf32> -> vector<2x64xf32>
    %cst_63 = arith.constant dense<0.000000e+00> : vector<2x192xf32>
    %228 = tpu.matmul %227, %28, %cst_63 {dimension_numbers = #tpu.dot_dimension_numbers<[1], [0], [0], [1], [0, 0, 1, 1], [], []>} : vector<2x64xf32>, vector<64x192xf32>, vector<2x192xf32> -> vector<2x192xf32>
    %c6 = arith.constant 6 : index
    %c0_64 = arith.constant 0 : index
    %229 = vector.load %arg17[%c6, %c0_64] : memref<16x96xf32, #tpu.memory_space<vmem>>, vector<2x96xf32>
    %c8 = arith.constant 8 : index
    %c0_65 = arith.constant 0 : index
    %230 = vector.load %arg18[%c8, %c0_65] : memref<16x96xf32, #tpu.memory_space<vmem>>, vector<2x96xf32>
    %231 = vector.extract_strided_slice %228 {offsets = [0, 0], sizes = [2, 96], strides = [1, 1]} : vector<2x192xf32> to vector<2x96xf32>
    %232 = vector.extract_strided_slice %228 {offsets = [0, 96], sizes = [2, 96], strides = [1, 1]} : vector<2x192xf32> to vector<2x96xf32>
    %233 = vector.extract_strided_slice %229 {offsets = [0, 0], sizes = [2, 32], strides = [1, 1]} : vector<2x96xf32> to vector<2x32xf32>
    %234 = vector.extract_strided_slice %231 {offsets = [0, 0], sizes = [2, 32], strides = [1, 1]} : vector<2x96xf32> to vector<2x32xf32>
    %235 = arith.addf %233, %234 : vector<2x32xf32>
    %236 = arith.negf %235 : vector<2x32xf32>
    %237 = math.exp %236 : vector<2x32xf32>
    %cst_66 = arith.constant 1.000000e+00 : f32
    %238 = vector.broadcast %cst_66 : f32 to vector<2x32xf32>
    %239 = arith.addf %238, %237 : vector<2x32xf32>
    %240 = arith.divf %238, %239 : vector<2x32xf32>
    %241 = vector.extract_strided_slice %229 {offsets = [0, 32], sizes = [2, 32], strides = [1, 1]} : vector<2x96xf32> to vector<2x32xf32>
    %242 = vector.extract_strided_slice %231 {offsets = [0, 32], sizes = [2, 32], strides = [1, 1]} : vector<2x96xf32> to vector<2x32xf32>
    %243 = arith.addf %241, %242 : vector<2x32xf32>
    %244 = arith.negf %243 : vector<2x32xf32>
    %245 = math.exp %244 : vector<2x32xf32>
    %cst_67 = arith.constant 1.000000e+00 : f32
    %246 = vector.broadcast %cst_67 : f32 to vector<2x32xf32>
    %247 = arith.addf %246, %245 : vector<2x32xf32>
    %248 = arith.divf %246, %247 : vector<2x32xf32>
    %249 = vector.extract_strided_slice %229 {offsets = [0, 64], sizes = [2, 32], strides = [1, 1]} : vector<2x96xf32> to vector<2x32xf32>
    %250 = vector.extract_strided_slice %231 {offsets = [0, 64], sizes = [2, 32], strides = [1, 1]} : vector<2x96xf32> to vector<2x32xf32>
    %251 = arith.addf %250, %31 : vector<2x32xf32>
    %252 = arith.mulf %240, %251 : vector<2x32xf32>
    %253 = arith.addf %249, %252 : vector<2x32xf32>
    %254 = math.tanh %253 : vector<2x32xf32>
    %cst_68 = arith.constant 1.000000e+00 : f32
    %255 = vector.broadcast %cst_68 : f32 to vector<2x32xf32>
    %256 = arith.subf %255, %248 : vector<2x32xf32>
    %257 = arith.mulf %256, %254 : vector<2x32xf32>
    %258 = vector.extract_strided_slice %227 {offsets = [0, 0], sizes = [2, 32], strides = [1, 1]} : vector<2x64xf32> to vector<2x32xf32>
    %259 = arith.mulf %248, %258 : vector<2x32xf32>
    %260 = arith.addf %257, %259 : vector<2x32xf32>
    %261 = vector.extract_strided_slice %230 {offsets = [0, 0], sizes = [2, 32], strides = [1, 1]} : vector<2x96xf32> to vector<2x32xf32>
    %262 = vector.extract_strided_slice %232 {offsets = [0, 0], sizes = [2, 32], strides = [1, 1]} : vector<2x96xf32> to vector<2x32xf32>
    %263 = arith.addf %261, %262 : vector<2x32xf32>
    %264 = arith.negf %263 : vector<2x32xf32>
    %265 = math.exp %264 : vector<2x32xf32>
    %cst_69 = arith.constant 1.000000e+00 : f32
    %266 = vector.broadcast %cst_69 : f32 to vector<2x32xf32>
    %267 = arith.addf %266, %265 : vector<2x32xf32>
    %268 = arith.divf %266, %267 : vector<2x32xf32>
    %269 = vector.extract_strided_slice %230 {offsets = [0, 32], sizes = [2, 32], strides = [1, 1]} : vector<2x96xf32> to vector<2x32xf32>
    %270 = vector.extract_strided_slice %232 {offsets = [0, 32], sizes = [2, 32], strides = [1, 1]} : vector<2x96xf32> to vector<2x32xf32>
    %271 = arith.addf %269, %270 : vector<2x32xf32>
    %272 = arith.negf %271 : vector<2x32xf32>
    %273 = math.exp %272 : vector<2x32xf32>
    %cst_70 = arith.constant 1.000000e+00 : f32
    %274 = vector.broadcast %cst_70 : f32 to vector<2x32xf32>
    %275 = arith.addf %274, %273 : vector<2x32xf32>
    %276 = arith.divf %274, %275 : vector<2x32xf32>
    %277 = vector.extract_strided_slice %230 {offsets = [0, 64], sizes = [2, 32], strides = [1, 1]} : vector<2x96xf32> to vector<2x32xf32>
    %278 = vector.extract_strided_slice %232 {offsets = [0, 64], sizes = [2, 32], strides = [1, 1]} : vector<2x96xf32> to vector<2x32xf32>
    %279 = arith.addf %278, %34 : vector<2x32xf32>
    %280 = arith.mulf %268, %279 : vector<2x32xf32>
    %281 = arith.addf %277, %280 : vector<2x32xf32>
    %282 = math.tanh %281 : vector<2x32xf32>
    %cst_71 = arith.constant 1.000000e+00 : f32
    %283 = vector.broadcast %cst_71 : f32 to vector<2x32xf32>
    %284 = arith.subf %283, %276 : vector<2x32xf32>
    %285 = arith.mulf %284, %282 : vector<2x32xf32>
    %286 = vector.extract_strided_slice %227 {offsets = [0, 32], sizes = [2, 32], strides = [1, 1]} : vector<2x64xf32> to vector<2x32xf32>
    %287 = arith.mulf %276, %286 : vector<2x32xf32>
    %288 = arith.addf %285, %287 : vector<2x32xf32>
    %c6_72 = arith.constant 6 : index
    %c0_73 = arith.constant 0 : index
    %289 = vector.load %arg19[%c6_72, %c0_73] : memref<16x32xf32, #tpu.memory_space<vmem>>, vector<2x32xf32>
    tpu.vector_store %arg19[%c6_72, %c0_73], %260 {strides = array<i32>} : memref<16x32xf32, #tpu.memory_space<vmem>>, vector<2x32xf32>,
    %c8_74 = arith.constant 8 : index
    %c0_75 = arith.constant 0 : index
    %290 = vector.load %arg20[%c8_74, %c0_75] : memref<16x32xf32, #tpu.memory_space<vmem>>, vector<2x32xf32>
    tpu.vector_store %arg20[%c8_74, %c0_75], %288 {strides = array<i32>} : memref<16x32xf32, #tpu.memory_space<vmem>>, vector<2x32xf32>,
    %291 = tpu.concatenate %260, %288 in 1 : vector<2x32xf32>, vector<2x32xf32> -> vector<2x64xf32>
    %cst_76 = arith.constant dense<0.000000e+00> : vector<2x192xf32>
    %292 = tpu.matmul %291, %28, %cst_76 {dimension_numbers = #tpu.dot_dimension_numbers<[1], [0], [0], [1], [0, 0, 1, 1], [], []>} : vector<2x64xf32>, vector<64x192xf32>, vector<2x192xf32> -> vector<2x192xf32>
    %c8_77 = arith.constant 8 : index
    %c0_78 = arith.constant 0 : index
    %293 = vector.load %arg17[%c8_77, %c0_78] : memref<16x96xf32, #tpu.memory_space<vmem>>, vector<2x96xf32>
    %c6_79 = arith.constant 6 : index
    %c0_80 = arith.constant 0 : index
    %294 = vector.load %arg18[%c6_79, %c0_80] : memref<16x96xf32, #tpu.memory_space<vmem>>, vector<2x96xf32>
    %295 = vector.extract_strided_slice %292 {offsets = [0, 0], sizes = [2, 96], strides = [1, 1]} : vector<2x192xf32> to vector<2x96xf32>
    %296 = vector.extract_strided_slice %292 {offsets = [0, 96], sizes = [2, 96], strides = [1, 1]} : vector<2x192xf32> to vector<2x96xf32>
    %297 = vector.extract_strided_slice %293 {offsets = [0, 0], sizes = [2, 32], strides = [1, 1]} : vector<2x96xf32> to vector<2x32xf32>
    %298 = vector.extract_strided_slice %295 {offsets = [0, 0], sizes = [2, 32], strides = [1, 1]} : vector<2x96xf32> to vector<2x32xf32>
    %299 = arith.addf %297, %298 : vector<2x32xf32>
    %300 = arith.negf %299 : vector<2x32xf32>
    %301 = math.exp %300 : vector<2x32xf32>
    %cst_81 = arith.constant 1.000000e+00 : f32
    %302 = vector.broadcast %cst_81 : f32 to vector<2x32xf32>
    %303 = arith.addf %302, %301 : vector<2x32xf32>
    %304 = arith.divf %302, %303 : vector<2x32xf32>
    %305 = vector.extract_strided_slice %293 {offsets = [0, 32], sizes = [2, 32], strides = [1, 1]} : vector<2x96xf32> to vector<2x32xf32>
    %306 = vector.extract_strided_slice %295 {offsets = [0, 32], sizes = [2, 32], strides = [1, 1]} : vector<2x96xf32> to vector<2x32xf32>
    %307 = arith.addf %305, %306 : vector<2x32xf32>
    %308 = arith.negf %307 : vector<2x32xf32>
    %309 = math.exp %308 : vector<2x32xf32>
    %cst_82 = arith.constant 1.000000e+00 : f32
    %310 = vector.broadcast %cst_82 : f32 to vector<2x32xf32>
    %311 = arith.addf %310, %309 : vector<2x32xf32>
    %312 = arith.divf %310, %311 : vector<2x32xf32>
    %313 = vector.extract_strided_slice %293 {offsets = [0, 64], sizes = [2, 32], strides = [1, 1]} : vector<2x96xf32> to vector<2x32xf32>
    %314 = vector.extract_strided_slice %295 {offsets = [0, 64], sizes = [2, 32], strides = [1, 1]} : vector<2x96xf32> to vector<2x32xf32>
    %315 = arith.addf %314, %31 : vector<2x32xf32>
    %316 = arith.mulf %304, %315 : vector<2x32xf32>
    %317 = arith.addf %313, %316 : vector<2x32xf32>
    %318 = math.tanh %317 : vector<2x32xf32>
    %cst_83 = arith.constant 1.000000e+00 : f32
    %319 = vector.broadcast %cst_83 : f32 to vector<2x32xf32>
    %320 = arith.subf %319, %312 : vector<2x32xf32>
    %321 = arith.mulf %320, %318 : vector<2x32xf32>
    %322 = vector.extract_strided_slice %291 {offsets = [0, 0], sizes = [2, 32], strides = [1, 1]} : vector<2x64xf32> to vector<2x32xf32>
    %323 = arith.mulf %312, %322 : vector<2x32xf32>
    %324 = arith.addf %321, %323 : vector<2x32xf32>
    %325 = vector.extract_strided_slice %294 {offsets = [0, 0], sizes = [2, 32], strides = [1, 1]} : vector<2x96xf32> to vector<2x32xf32>
    %326 = vector.extract_strided_slice %296 {offsets = [0, 0], sizes = [2, 32], strides = [1, 1]} : vector<2x96xf32> to vector<2x32xf32>
    %327 = arith.addf %325, %326 : vector<2x32xf32>
    %328 = arith.negf %327 : vector<2x32xf32>
    %329 = math.exp %328 : vector<2x32xf32>
    %cst_84 = arith.constant 1.000000e+00 : f32
    %330 = vector.broadcast %cst_84 : f32 to vector<2x32xf32>
    %331 = arith.addf %330, %329 : vector<2x32xf32>
    %332 = arith.divf %330, %331 : vector<2x32xf32>
    %333 = vector.extract_strided_slice %294 {offsets = [0, 32], sizes = [2, 32], strides = [1, 1]} : vector<2x96xf32> to vector<2x32xf32>
    %334 = vector.extract_strided_slice %296 {offsets = [0, 32], sizes = [2, 32], strides = [1, 1]} : vector<2x96xf32> to vector<2x32xf32>
    %335 = arith.addf %333, %334 : vector<2x32xf32>
    %336 = arith.negf %335 : vector<2x32xf32>
    %337 = math.exp %336 : vector<2x32xf32>
    %cst_85 = arith.constant 1.000000e+00 : f32
    %338 = vector.broadcast %cst_85 : f32 to vector<2x32xf32>
    %339 = arith.addf %338, %337 : vector<2x32xf32>
    %340 = arith.divf %338, %339 : vector<2x32xf32>
    %341 = vector.extract_strided_slice %294 {offsets = [0, 64], sizes = [2, 32], strides = [1, 1]} : vector<2x96xf32> to vector<2x32xf32>
    %342 = vector.extract_strided_slice %296 {offsets = [0, 64], sizes = [2, 32], strides = [1, 1]} : vector<2x96xf32> to vector<2x32xf32>
    %343 = arith.addf %342, %34 : vector<2x32xf32>
    %344 = arith.mulf %332, %343 : vector<2x32xf32>
    %345 = arith.addf %341, %344 : vector<2x32xf32>
    %346 = math.tanh %345 : vector<2x32xf32>
    %cst_86 = arith.constant 1.000000e+00 : f32
    %347 = vector.broadcast %cst_86 : f32 to vector<2x32xf32>
    %348 = arith.subf %347, %340 : vector<2x32xf32>
    %349 = arith.mulf %348, %346 : vector<2x32xf32>
    %350 = vector.extract_strided_slice %291 {offsets = [0, 32], sizes = [2, 32], strides = [1, 1]} : vector<2x64xf32> to vector<2x32xf32>
    %351 = arith.mulf %340, %350 : vector<2x32xf32>
    %352 = arith.addf %349, %351 : vector<2x32xf32>
    %c8_87 = arith.constant 8 : index
    %c0_88 = arith.constant 0 : index
    %353 = vector.load %arg19[%c8_87, %c0_88] : memref<16x32xf32, #tpu.memory_space<vmem>>, vector<2x32xf32>
    tpu.vector_store %arg19[%c8_87, %c0_88], %324 {strides = array<i32>} : memref<16x32xf32, #tpu.memory_space<vmem>>, vector<2x32xf32>,
    %c6_89 = arith.constant 6 : index
    %c0_90 = arith.constant 0 : index
    %354 = vector.load %arg20[%c6_89, %c0_90] : memref<16x32xf32, #tpu.memory_space<vmem>>, vector<2x32xf32>
    tpu.vector_store %arg20[%c6_89, %c0_90], %352 {strides = array<i32>} : memref<16x32xf32, #tpu.memory_space<vmem>>, vector<2x32xf32>,
    %355 = tpu.concatenate %324, %352 in 1 : vector<2x32xf32>, vector<2x32xf32> -> vector<2x64xf32>
    %cst_91 = arith.constant dense<0.000000e+00> : vector<2x192xf32>
    %356 = tpu.matmul %355, %28, %cst_91 {dimension_numbers = #tpu.dot_dimension_numbers<[1], [0], [0], [1], [0, 0, 1, 1], [], []>} : vector<2x64xf32>, vector<64x192xf32>, vector<2x192xf32> -> vector<2x192xf32>
    %c10_92 = arith.constant 10 : index
    %c0_93 = arith.constant 0 : index
    %357 = vector.load %arg17[%c10_92, %c0_93] : memref<16x96xf32, #tpu.memory_space<vmem>>, vector<2x96xf32>
    %c4_94 = arith.constant 4 : index
    %c0_95 = arith.constant 0 : index
    %358 = vector.load %arg18[%c4_94, %c0_95] : memref<16x96xf32, #tpu.memory_space<vmem>>, vector<2x96xf32>
    %359 = vector.extract_strided_slice %356 {offsets = [0, 0], sizes = [2, 96], strides = [1, 1]} : vector<2x192xf32> to vector<2x96xf32>
    %360 = vector.extract_strided_slice %356 {offsets = [0, 96], sizes = [2, 96], strides = [1, 1]} : vector<2x192xf32> to vector<2x96xf32>
    %361 = vector.extract_strided_slice %357 {offsets = [0, 0], sizes = [2, 32], strides = [1, 1]} : vector<2x96xf32> to vector<2x32xf32>
    %362 = vector.extract_strided_slice %359 {offsets = [0, 0], sizes = [2, 32], strides = [1, 1]} : vector<2x96xf32> to vector<2x32xf32>
    %363 = arith.addf %361, %362 : vector<2x32xf32>
    %364 = arith.negf %363 : vector<2x32xf32>
    %365 = math.exp %364 : vector<2x32xf32>
    %cst_96 = arith.constant 1.000000e+00 : f32
    %366 = vector.broadcast %cst_96 : f32 to vector<2x32xf32>
    %367 = arith.addf %366, %365 : vector<2x32xf32>
    %368 = arith.divf %366, %367 : vector<2x32xf32>
    %369 = vector.extract_strided_slice %357 {offsets = [0, 32], sizes = [2, 32], strides = [1, 1]} : vector<2x96xf32> to vector<2x32xf32>
    %370 = vector.extract_strided_slice %359 {offsets = [0, 32], sizes = [2, 32], strides = [1, 1]} : vector<2x96xf32> to vector<2x32xf32>
    %371 = arith.addf %369, %370 : vector<2x32xf32>
    %372 = arith.negf %371 : vector<2x32xf32>
    %373 = math.exp %372 : vector<2x32xf32>
    %cst_97 = arith.constant 1.000000e+00 : f32
    %374 = vector.broadcast %cst_97 : f32 to vector<2x32xf32>
    %375 = arith.addf %374, %373 : vector<2x32xf32>
    %376 = arith.divf %374, %375 : vector<2x32xf32>
    %377 = vector.extract_strided_slice %357 {offsets = [0, 64], sizes = [2, 32], strides = [1, 1]} : vector<2x96xf32> to vector<2x32xf32>
    %378 = vector.extract_strided_slice %359 {offsets = [0, 64], sizes = [2, 32], strides = [1, 1]} : vector<2x96xf32> to vector<2x32xf32>
    %379 = arith.addf %378, %31 : vector<2x32xf32>
    %380 = arith.mulf %368, %379 : vector<2x32xf32>
    %381 = arith.addf %377, %380 : vector<2x32xf32>
    %382 = math.tanh %381 : vector<2x32xf32>
    %cst_98 = arith.constant 1.000000e+00 : f32
    %383 = vector.broadcast %cst_98 : f32 to vector<2x32xf32>
    %384 = arith.subf %383, %376 : vector<2x32xf32>
    %385 = arith.mulf %384, %382 : vector<2x32xf32>
    %386 = vector.extract_strided_slice %355 {offsets = [0, 0], sizes = [2, 32], strides = [1, 1]} : vector<2x64xf32> to vector<2x32xf32>
    %387 = arith.mulf %376, %386 : vector<2x32xf32>
    %388 = arith.addf %385, %387 : vector<2x32xf32>
    %389 = vector.extract_strided_slice %358 {offsets = [0, 0], sizes = [2, 32], strides = [1, 1]} : vector<2x96xf32> to vector<2x32xf32>
    %390 = vector.extract_strided_slice %360 {offsets = [0, 0], sizes = [2, 32], strides = [1, 1]} : vector<2x96xf32> to vector<2x32xf32>
    %391 = arith.addf %389, %390 : vector<2x32xf32>
    %392 = arith.negf %391 : vector<2x32xf32>
    %393 = math.exp %392 : vector<2x32xf32>
    %cst_99 = arith.constant 1.000000e+00 : f32
    %394 = vector.broadcast %cst_99 : f32 to vector<2x32xf32>
    %395 = arith.addf %394, %393 : vector<2x32xf32>
    %396 = arith.divf %394, %395 : vector<2x32xf32>
    %397 = vector.extract_strided_slice %358 {offsets = [0, 32], sizes = [2, 32], strides = [1, 1]} : vector<2x96xf32> to vector<2x32xf32>
    %398 = vector.extract_strided_slice %360 {offsets = [0, 32], sizes = [2, 32], strides = [1, 1]} : vector<2x96xf32> to vector<2x32xf32>
    %399 = arith.addf %397, %398 : vector<2x32xf32>
    %400 = arith.negf %399 : vector<2x32xf32>
    %401 = math.exp %400 : vector<2x32xf32>
    %cst_100 = arith.constant 1.000000e+00 : f32
    %402 = vector.broadcast %cst_100 : f32 to vector<2x32xf32>
    %403 = arith.addf %402, %401 : vector<2x32xf32>
    %404 = arith.divf %402, %403 : vector<2x32xf32>
    %405 = vector.extract_strided_slice %358 {offsets = [0, 64], sizes = [2, 32], strides = [1, 1]} : vector<2x96xf32> to vector<2x32xf32>
    %406 = vector.extract_strided_slice %360 {offsets = [0, 64], sizes = [2, 32], strides = [1, 1]} : vector<2x96xf32> to vector<2x32xf32>
    %407 = arith.addf %406, %34 : vector<2x32xf32>
    %408 = arith.mulf %396, %407 : vector<2x32xf32>
    %409 = arith.addf %405, %408 : vector<2x32xf32>
    %410 = math.tanh %409 : vector<2x32xf32>
    %cst_101 = arith.constant 1.000000e+00 : f32
    %411 = vector.broadcast %cst_101 : f32 to vector<2x32xf32>
    %412 = arith.subf %411, %404 : vector<2x32xf32>
    %413 = arith.mulf %412, %410 : vector<2x32xf32>
    %414 = vector.extract_strided_slice %355 {offsets = [0, 32], sizes = [2, 32], strides = [1, 1]} : vector<2x64xf32> to vector<2x32xf32>
    %415 = arith.mulf %404, %414 : vector<2x32xf32>
    %416 = arith.addf %413, %415 : vector<2x32xf32>
    %c10_102 = arith.constant 10 : index
    %c0_103 = arith.constant 0 : index
    %417 = vector.load %arg19[%c10_102, %c0_103] : memref<16x32xf32, #tpu.memory_space<vmem>>, vector<2x32xf32>
    tpu.vector_store %arg19[%c10_102, %c0_103], %388 {strides = array<i32>} : memref<16x32xf32, #tpu.memory_space<vmem>>, vector<2x32xf32>,
    %c4_104 = arith.constant 4 : index
    %c0_105 = arith.constant 0 : index
    %418 = vector.load %arg20[%c4_104, %c0_105] : memref<16x32xf32, #tpu.memory_space<vmem>>, vector<2x32xf32>
    tpu.vector_store %arg20[%c4_104, %c0_105], %416 {strides = array<i32>} : memref<16x32xf32, #tpu.memory_space<vmem>>, vector<2x32xf32>,
    %419 = tpu.concatenate %388, %416 in 1 : vector<2x32xf32>, vector<2x32xf32> -> vector<2x64xf32>
    %cst_106 = arith.constant dense<0.000000e+00> : vector<2x192xf32>
    %420 = tpu.matmul %419, %28, %cst_106 {dimension_numbers = #tpu.dot_dimension_numbers<[1], [0], [0], [1], [0, 0, 1, 1], [], []>} : vector<2x64xf32>, vector<64x192xf32>, vector<2x192xf32> -> vector<2x192xf32>
    %c12_107 = arith.constant 12 : index
    %c0_108 = arith.constant 0 : index
    %421 = vector.load %arg17[%c12_107, %c0_108] : memref<16x96xf32, #tpu.memory_space<vmem>>, vector<2x96xf32>
    %c2_109 = arith.constant 2 : index
    %c0_110 = arith.constant 0 : index
    %422 = vector.load %arg18[%c2_109, %c0_110] : memref<16x96xf32, #tpu.memory_space<vmem>>, vector<2x96xf32>
    %423 = vector.extract_strided_slice %420 {offsets = [0, 0], sizes = [2, 96], strides = [1, 1]} : vector<2x192xf32> to vector<2x96xf32>
    %424 = vector.extract_strided_slice %420 {offsets = [0, 96], sizes = [2, 96], strides = [1, 1]} : vector<2x192xf32> to vector<2x96xf32>
    %425 = vector.extract_strided_slice %421 {offsets = [0, 0], sizes = [2, 32], strides = [1, 1]} : vector<2x96xf32> to vector<2x32xf32>
    %426 = vector.extract_strided_slice %423 {offsets = [0, 0], sizes = [2, 32], strides = [1, 1]} : vector<2x96xf32> to vector<2x32xf32>
    %427 = arith.addf %425, %426 : vector<2x32xf32>
    %428 = arith.negf %427 : vector<2x32xf32>
    %429 = math.exp %428 : vector<2x32xf32>
    %cst_111 = arith.constant 1.000000e+00 : f32
    %430 = vector.broadcast %cst_111 : f32 to vector<2x32xf32>
    %431 = arith.addf %430, %429 : vector<2x32xf32>
    %432 = arith.divf %430, %431 : vector<2x32xf32>
    %433 = vector.extract_strided_slice %421 {offsets = [0, 32], sizes = [2, 32], strides = [1, 1]} : vector<2x96xf32> to vector<2x32xf32>
    %434 = vector.extract_strided_slice %423 {offsets = [0, 32], sizes = [2, 32], strides = [1, 1]} : vector<2x96xf32> to vector<2x32xf32>
    %435 = arith.addf %433, %434 : vector<2x32xf32>
    %436 = arith.negf %435 : vector<2x32xf32>
    %437 = math.exp %436 : vector<2x32xf32>
    %cst_112 = arith.constant 1.000000e+00 : f32
    %438 = vector.broadcast %cst_112 : f32 to vector<2x32xf32>
    %439 = arith.addf %438, %437 : vector<2x32xf32>
    %440 = arith.divf %438, %439 : vector<2x32xf32>
    %441 = vector.extract_strided_slice %421 {offsets = [0, 64], sizes = [2, 32], strides = [1, 1]} : vector<2x96xf32> to vector<2x32xf32>
    %442 = vector.extract_strided_slice %423 {offsets = [0, 64], sizes = [2, 32], strides = [1, 1]} : vector<2x96xf32> to vector<2x32xf32>
    %443 = arith.addf %442, %31 : vector<2x32xf32>
    %444 = arith.mulf %432, %443 : vector<2x32xf32>
    %445 = arith.addf %441, %444 : vector<2x32xf32>
    %446 = math.tanh %445 : vector<2x32xf32>
    %cst_113 = arith.constant 1.000000e+00 : f32
    %447 = vector.broadcast %cst_113 : f32 to vector<2x32xf32>
    %448 = arith.subf %447, %440 : vector<2x32xf32>
    %449 = arith.mulf %448, %446 : vector<2x32xf32>
    %450 = vector.extract_strided_slice %419 {offsets = [0, 0], sizes = [2, 32], strides = [1, 1]} : vector<2x64xf32> to vector<2x32xf32>
    %451 = arith.mulf %440, %450 : vector<2x32xf32>
    %452 = arith.addf %449, %451 : vector<2x32xf32>
    %453 = vector.extract_strided_slice %422 {offsets = [0, 0], sizes = [2, 32], strides = [1, 1]} : vector<2x96xf32> to vector<2x32xf32>
    %454 = vector.extract_strided_slice %424 {offsets = [0, 0], sizes = [2, 32], strides = [1, 1]} : vector<2x96xf32> to vector<2x32xf32>
    %455 = arith.addf %453, %454 : vector<2x32xf32>
    %456 = arith.negf %455 : vector<2x32xf32>
    %457 = math.exp %456 : vector<2x32xf32>
    %cst_114 = arith.constant 1.000000e+00 : f32
    %458 = vector.broadcast %cst_114 : f32 to vector<2x32xf32>
    %459 = arith.addf %458, %457 : vector<2x32xf32>
    %460 = arith.divf %458, %459 : vector<2x32xf32>
    %461 = vector.extract_strided_slice %422 {offsets = [0, 32], sizes = [2, 32], strides = [1, 1]} : vector<2x96xf32> to vector<2x32xf32>
    %462 = vector.extract_strided_slice %424 {offsets = [0, 32], sizes = [2, 32], strides = [1, 1]} : vector<2x96xf32> to vector<2x32xf32>
    %463 = arith.addf %461, %462 : vector<2x32xf32>
    %464 = arith.negf %463 : vector<2x32xf32>
    %465 = math.exp %464 : vector<2x32xf32>
    %cst_115 = arith.constant 1.000000e+00 : f32
    %466 = vector.broadcast %cst_115 : f32 to vector<2x32xf32>
    %467 = arith.addf %466, %465 : vector<2x32xf32>
    %468 = arith.divf %466, %467 : vector<2x32xf32>
    %469 = vector.extract_strided_slice %422 {offsets = [0, 64], sizes = [2, 32], strides = [1, 1]} : vector<2x96xf32> to vector<2x32xf32>
    %470 = vector.extract_strided_slice %424 {offsets = [0, 64], sizes = [2, 32], strides = [1, 1]} : vector<2x96xf32> to vector<2x32xf32>
    %471 = arith.addf %470, %34 : vector<2x32xf32>
    %472 = arith.mulf %460, %471 : vector<2x32xf32>
    %473 = arith.addf %469, %472 : vector<2x32xf32>
    %474 = math.tanh %473 : vector<2x32xf32>
    %cst_116 = arith.constant 1.000000e+00 : f32
    %475 = vector.broadcast %cst_116 : f32 to vector<2x32xf32>
    %476 = arith.subf %475, %468 : vector<2x32xf32>
    %477 = arith.mulf %476, %474 : vector<2x32xf32>
    %478 = vector.extract_strided_slice %419 {offsets = [0, 32], sizes = [2, 32], strides = [1, 1]} : vector<2x64xf32> to vector<2x32xf32>
    %479 = arith.mulf %468, %478 : vector<2x32xf32>
    %480 = arith.addf %477, %479 : vector<2x32xf32>
    %c12_117 = arith.constant 12 : index
    %c0_118 = arith.constant 0 : index
    %481 = vector.load %arg19[%c12_117, %c0_118] : memref<16x32xf32, #tpu.memory_space<vmem>>, vector<2x32xf32>
    tpu.vector_store %arg19[%c12_117, %c0_118], %452 {strides = array<i32>} : memref<16x32xf32, #tpu.memory_space<vmem>>, vector<2x32xf32>,
    %c2_119 = arith.constant 2 : index
    %c0_120 = arith.constant 0 : index
    %482 = vector.load %arg20[%c2_119, %c0_120] : memref<16x32xf32, #tpu.memory_space<vmem>>, vector<2x32xf32>
    tpu.vector_store %arg20[%c2_119, %c0_120], %480 {strides = array<i32>} : memref<16x32xf32, #tpu.memory_space<vmem>>, vector<2x32xf32>,
    %483 = tpu.concatenate %452, %480 in 1 : vector<2x32xf32>, vector<2x32xf32> -> vector<2x64xf32>
    %cst_121 = arith.constant dense<0.000000e+00> : vector<2x192xf32>
    %484 = tpu.matmul %483, %28, %cst_121 {dimension_numbers = #tpu.dot_dimension_numbers<[1], [0], [0], [1], [0, 0, 1, 1], [], []>} : vector<2x64xf32>, vector<64x192xf32>, vector<2x192xf32> -> vector<2x192xf32>
    %c14_122 = arith.constant 14 : index
    %c0_123 = arith.constant 0 : index
    %485 = vector.load %arg17[%c14_122, %c0_123] : memref<16x96xf32, #tpu.memory_space<vmem>>, vector<2x96xf32>
    %c0_124 = arith.constant 0 : index
    %c0_125 = arith.constant 0 : index
    %486 = vector.load %arg18[%c0_124, %c0_125] : memref<16x96xf32, #tpu.memory_space<vmem>>, vector<2x96xf32>
    %487 = vector.extract_strided_slice %484 {offsets = [0, 0], sizes = [2, 96], strides = [1, 1]} : vector<2x192xf32> to vector<2x96xf32>
    %488 = vector.extract_strided_slice %484 {offsets = [0, 96], sizes = [2, 96], strides = [1, 1]} : vector<2x192xf32> to vector<2x96xf32>
    %489 = vector.extract_strided_slice %485 {offsets = [0, 0], sizes = [2, 32], strides = [1, 1]} : vector<2x96xf32> to vector<2x32xf32>
    %490 = vector.extract_strided_slice %487 {offsets = [0, 0], sizes = [2, 32], strides = [1, 1]} : vector<2x96xf32> to vector<2x32xf32>
    %491 = arith.addf %489, %490 : vector<2x32xf32>
    %492 = arith.negf %491 : vector<2x32xf32>
    %493 = math.exp %492 : vector<2x32xf32>
    %cst_126 = arith.constant 1.000000e+00 : f32
    %494 = vector.broadcast %cst_126 : f32 to vector<2x32xf32>
    %495 = arith.addf %494, %493 : vector<2x32xf32>
    %496 = arith.divf %494, %495 : vector<2x32xf32>
    %497 = vector.extract_strided_slice %485 {offsets = [0, 32], sizes = [2, 32], strides = [1, 1]} : vector<2x96xf32> to vector<2x32xf32>
    %498 = vector.extract_strided_slice %487 {offsets = [0, 32], sizes = [2, 32], strides = [1, 1]} : vector<2x96xf32> to vector<2x32xf32>
    %499 = arith.addf %497, %498 : vector<2x32xf32>
    %500 = arith.negf %499 : vector<2x32xf32>
    %501 = math.exp %500 : vector<2x32xf32>
    %cst_127 = arith.constant 1.000000e+00 : f32
    %502 = vector.broadcast %cst_127 : f32 to vector<2x32xf32>
    %503 = arith.addf %502, %501 : vector<2x32xf32>
    %504 = arith.divf %502, %503 : vector<2x32xf32>
    %505 = vector.extract_strided_slice %485 {offsets = [0, 64], sizes = [2, 32], strides = [1, 1]} : vector<2x96xf32> to vector<2x32xf32>
    %506 = vector.extract_strided_slice %487 {offsets = [0, 64], sizes = [2, 32], strides = [1, 1]} : vector<2x96xf32> to vector<2x32xf32>
    %507 = arith.addf %506, %31 : vector<2x32xf32>
    %508 = arith.mulf %496, %507 : vector<2x32xf32>
    %509 = arith.addf %505, %508 : vector<2x32xf32>
    %510 = math.tanh %509 : vector<2x32xf32>
    %cst_128 = arith.constant 1.000000e+00 : f32
    %511 = vector.broadcast %cst_128 : f32 to vector<2x32xf32>
    %512 = arith.subf %511, %504 : vector<2x32xf32>
    %513 = arith.mulf %512, %510 : vector<2x32xf32>
    %514 = vector.extract_strided_slice %483 {offsets = [0, 0], sizes = [2, 32], strides = [1, 1]} : vector<2x64xf32> to vector<2x32xf32>
    %515 = arith.mulf %504, %514 : vector<2x32xf32>
    %516 = arith.addf %513, %515 : vector<2x32xf32>
    %517 = vector.extract_strided_slice %486 {offsets = [0, 0], sizes = [2, 32], strides = [1, 1]} : vector<2x96xf32> to vector<2x32xf32>
    %518 = vector.extract_strided_slice %488 {offsets = [0, 0], sizes = [2, 32], strides = [1, 1]} : vector<2x96xf32> to vector<2x32xf32>
    %519 = arith.addf %517, %518 : vector<2x32xf32>
    %520 = arith.negf %519 : vector<2x32xf32>
    %521 = math.exp %520 : vector<2x32xf32>
    %cst_129 = arith.constant 1.000000e+00 : f32
    %522 = vector.broadcast %cst_129 : f32 to vector<2x32xf32>
    %523 = arith.addf %522, %521 : vector<2x32xf32>
    %524 = arith.divf %522, %523 : vector<2x32xf32>
    %525 = vector.extract_strided_slice %486 {offsets = [0, 32], sizes = [2, 32], strides = [1, 1]} : vector<2x96xf32> to vector<2x32xf32>
    %526 = vector.extract_strided_slice %488 {offsets = [0, 32], sizes = [2, 32], strides = [1, 1]} : vector<2x96xf32> to vector<2x32xf32>
    %527 = arith.addf %525, %526 : vector<2x32xf32>
    %528 = arith.negf %527 : vector<2x32xf32>
    %529 = math.exp %528 : vector<2x32xf32>
    %cst_130 = arith.constant 1.000000e+00 : f32
    %530 = vector.broadcast %cst_130 : f32 to vector<2x32xf32>
    %531 = arith.addf %530, %529 : vector<2x32xf32>
    %532 = arith.divf %530, %531 : vector<2x32xf32>
    %533 = vector.extract_strided_slice %486 {offsets = [0, 64], sizes = [2, 32], strides = [1, 1]} : vector<2x96xf32> to vector<2x32xf32>
    %534 = vector.extract_strided_slice %488 {offsets = [0, 64], sizes = [2, 32], strides = [1, 1]} : vector<2x96xf32> to vector<2x32xf32>
    %535 = arith.addf %534, %34 : vector<2x32xf32>
    %536 = arith.mulf %524, %535 : vector<2x32xf32>
    %537 = arith.addf %533, %536 : vector<2x32xf32>
    %538 = math.tanh %537 : vector<2x32xf32>
    %cst_131 = arith.constant 1.000000e+00 : f32
    %539 = vector.broadcast %cst_131 : f32 to vector<2x32xf32>
    %540 = arith.subf %539, %532 : vector<2x32xf32>
    %541 = arith.mulf %540, %538 : vector<2x32xf32>
    %542 = vector.extract_strided_slice %483 {offsets = [0, 32], sizes = [2, 32], strides = [1, 1]} : vector<2x64xf32> to vector<2x32xf32>
    %543 = arith.mulf %532, %542 : vector<2x32xf32>
    %544 = arith.addf %541, %543 : vector<2x32xf32>
    %c14_132 = arith.constant 14 : index
    %c0_133 = arith.constant 0 : index
    %545 = vector.load %arg19[%c14_132, %c0_133] : memref<16x32xf32, #tpu.memory_space<vmem>>, vector<2x32xf32>
    tpu.vector_store %arg19[%c14_132, %c0_133], %516 {strides = array<i32>} : memref<16x32xf32, #tpu.memory_space<vmem>>, vector<2x32xf32>,
    %c0_134 = arith.constant 0 : index
    %c0_135 = arith.constant 0 : index
    %546 = vector.load %arg20[%c0_134, %c0_135] : memref<16x32xf32, #tpu.memory_space<vmem>>, vector<2x32xf32>
    tpu.vector_store %arg20[%c0_134, %c0_135], %544 {strides = array<i32>} : memref<16x32xf32, #tpu.memory_space<vmem>>, vector<2x32xf32>,
    %c0_136 = arith.constant 0 : index
    %c0_137 = arith.constant 0 : index
    %547 = vector.load %arg19[%c0_136, %c0_137] : memref<16x32xf32, #tpu.memory_space<vmem>>, vector<16x32xf32>
    %c0_138 = arith.constant 0 : index
    %c0_139 = arith.constant 0 : index
    %548 = vector.load %arg20[%c0_138, %c0_139] : memref<16x32xf32, #tpu.memory_space<vmem>>, vector<16x32xf32>
    %c0_140 = arith.constant 0 : index
    %c0_141 = arith.constant 0 : index
    %549 = vector.load %arg7[%c0_140, %c0_141] : memref<64x96xf32, #tpu.memory_space<vmem>>, vector<32x96xf32>
    %cst_142 = arith.constant dense<0.000000e+00> : vector<16x96xf32>
    %550 = tpu.matmul %547, %549, %cst_142 {dimension_numbers = #tpu.dot_dimension_numbers<[1], [0], [0], [1], [0, 0, 1, 1], [], []>} : vector<16x32xf32>, vector<32x96xf32>, vector<16x96xf32> -> vector<16x96xf32>
    %c32_143 = arith.constant 32 : index
    %c0_144 = arith.constant 0 : index
    %551 = vector.load %arg7[%c32_143, %c0_144] : memref<64x96xf32, #tpu.memory_space<vmem>>, vector<32x96xf32>
    %cst_145 = arith.constant dense<0.000000e+00> : vector<16x96xf32>
    %552 = tpu.matmul %548, %551, %cst_145 {dimension_numbers = #tpu.dot_dimension_numbers<[1], [0], [0], [1], [0, 0, 1, 1], [], []>} : vector<16x32xf32>, vector<32x96xf32>, vector<16x96xf32> -> vector<16x96xf32>
    %553 = arith.addf %550, %552 : vector<16x96xf32>
    %c0_146 = arith.constant 0 : index
    %c0_147 = arith.constant 0 : index
    %554 = vector.load %arg9[%c0_146, %c0_147] : memref<1x96xf32, #tpu.memory_space<vmem>>, vector<1x96xf32>
    %555 = vector.broadcast %554 : vector<1x96xf32> to vector<16x96xf32>
    %556 = arith.addf %553, %555 : vector<16x96xf32>
    %c0_148 = arith.constant 0 : index
    %c0_149 = arith.constant 0 : index
    %557 = vector.load %arg8[%c0_148, %c0_149] : memref<64x96xf32, #tpu.memory_space<vmem>>, vector<32x96xf32>
    %cst_150 = arith.constant dense<0.000000e+00> : vector<16x96xf32>
    %558 = tpu.matmul %547, %557, %cst_150 {dimension_numbers = #tpu.dot_dimension_numbers<[1], [0], [0], [1], [0, 0, 1, 1], [], []>} : vector<16x32xf32>, vector<32x96xf32>, vector<16x96xf32> -> vector<16x96xf32>
    %c32_151 = arith.constant 32 : index
    %c0_152 = arith.constant 0 : index
    %559 = vector.load %arg8[%c32_151, %c0_152] : memref<64x96xf32, #tpu.memory_space<vmem>>, vector<32x96xf32>
    %cst_153 = arith.constant dense<0.000000e+00> : vector<16x96xf32>
    %560 = tpu.matmul %548, %559, %cst_153 {dimension_numbers = #tpu.dot_dimension_numbers<[1], [0], [0], [1], [0, 0, 1, 1], [], []>} : vector<16x32xf32>, vector<32x96xf32>, vector<16x96xf32> -> vector<16x96xf32>
    %561 = arith.addf %558, %560 : vector<16x96xf32>
    %c0_154 = arith.constant 0 : index
    %c0_155 = arith.constant 0 : index
    %562 = vector.load %arg10[%c0_154, %c0_155] : memref<1x96xf32, #tpu.memory_space<vmem>>, vector<1x96xf32>
    %563 = vector.broadcast %562 : vector<1x96xf32> to vector<16x96xf32>
    %564 = arith.addf %561, %563 : vector<16x96xf32>
    %c0_156 = arith.constant 0 : index
    %c0_157 = arith.constant 0 : index
    %565 = vector.load %arg17[%c0_156, %c0_157] : memref<16x96xf32, #tpu.memory_space<vmem>>, vector<16x96xf32>
    tpu.vector_store %arg17[%c0_156, %c0_157], %556 {strides = array<i32>} : memref<16x96xf32, #tpu.memory_space<vmem>>, vector<16x96xf32>,
    %c0_158 = arith.constant 0 : index
    %c0_159 = arith.constant 0 : index
    %566 = vector.load %arg18[%c0_158, %c0_159] : memref<16x96xf32, #tpu.memory_space<vmem>>, vector<16x96xf32>
    tpu.vector_store %arg18[%c0_158, %c0_159], %564 {strides = array<i32>} : memref<16x96xf32, #tpu.memory_space<vmem>>, vector<16x96xf32>,
    %c0_160 = arith.constant 0 : index
    %c0_161 = arith.constant 0 : index
    %567 = vector.load %arg11[%c0_160, %c0_161] : memref<64x192xf32, #tpu.memory_space<vmem>>, vector<64x192xf32>
    %c0_162 = arith.constant 0 : index
    %c0_163 = arith.constant 0 : index
    %568 = vector.load %arg12[%c0_162, %c0_163] : memref<1x64xf32, #tpu.memory_space<vmem>>, vector<1x32xf32>
    %569 = vector.shape_cast %568 : vector<1x32xf32> to vector<1x32xf32>
    %570 = vector.broadcast %569 : vector<1x32xf32> to vector<2x32xf32>
    %c0_164 = arith.constant 0 : index
    %c32_165 = arith.constant 32 : index
    %571 = vector.load %arg12[%c0_164, %c32_165] : memref<1x64xf32, #tpu.memory_space<vmem>>, vector<1x32xf32>
    %572 = vector.shape_cast %571 : vector<1x32xf32> to vector<1x32xf32>
    %573 = vector.broadcast %572 : vector<1x32xf32> to vector<2x32xf32>
    %cst_166 = arith.constant 0.000000e+00 : f32
    %574 = vector.broadcast %cst_166 : f32 to vector<2x64xf32>
    %cst_167 = arith.constant dense<0.000000e+00> : vector<2x192xf32>
    %575 = tpu.matmul %574, %567, %cst_167 {dimension_numbers = #tpu.dot_dimension_numbers<[1], [0], [0], [1], [0, 0, 1, 1], [], []>} : vector<2x64xf32>, vector<64x192xf32>, vector<2x192xf32> -> vector<2x192xf32>
    %c0_168 = arith.constant 0 : index
    %c0_169 = arith.constant 0 : index
    %576 = vector.load %arg17[%c0_168, %c0_169] : memref<16x96xf32, #tpu.memory_space<vmem>>, vector<2x96xf32>
    %c14_170 = arith.constant 14 : index
    %c0_171 = arith.constant 0 : index
    %577 = vector.load %arg18[%c14_170, %c0_171] : memref<16x96xf32, #tpu.memory_space<vmem>>, vector<2x96xf32>
    %578 = vector.extract_strided_slice %575 {offsets = [0, 0], sizes = [2, 96], strides = [1, 1]} : vector<2x192xf32> to vector<2x96xf32>
    %579 = vector.extract_strided_slice %575 {offsets = [0, 96], sizes = [2, 96], strides = [1, 1]} : vector<2x192xf32> to vector<2x96xf32>
    %580 = vector.extract_strided_slice %576 {offsets = [0, 0], sizes = [2, 32], strides = [1, 1]} : vector<2x96xf32> to vector<2x32xf32>
    %581 = vector.extract_strided_slice %578 {offsets = [0, 0], sizes = [2, 32], strides = [1, 1]} : vector<2x96xf32> to vector<2x32xf32>
    %582 = arith.addf %580, %581 : vector<2x32xf32>
    %583 = arith.negf %582 : vector<2x32xf32>
    %584 = math.exp %583 : vector<2x32xf32>
    %cst_172 = arith.constant 1.000000e+00 : f32
    %585 = vector.broadcast %cst_172 : f32 to vector<2x32xf32>
    %586 = arith.addf %585, %584 : vector<2x32xf32>
    %587 = arith.divf %585, %586 : vector<2x32xf32>
    %588 = vector.extract_strided_slice %576 {offsets = [0, 32], sizes = [2, 32], strides = [1, 1]} : vector<2x96xf32> to vector<2x32xf32>
    %589 = vector.extract_strided_slice %578 {offsets = [0, 32], sizes = [2, 32], strides = [1, 1]} : vector<2x96xf32> to vector<2x32xf32>
    %590 = arith.addf %588, %589 : vector<2x32xf32>
    %591 = arith.negf %590 : vector<2x32xf32>
    %592 = math.exp %591 : vector<2x32xf32>
    %cst_173 = arith.constant 1.000000e+00 : f32
    %593 = vector.broadcast %cst_173 : f32 to vector<2x32xf32>
    %594 = arith.addf %593, %592 : vector<2x32xf32>
    %595 = arith.divf %593, %594 : vector<2x32xf32>
    %596 = vector.extract_strided_slice %576 {offsets = [0, 64], sizes = [2, 32], strides = [1, 1]} : vector<2x96xf32> to vector<2x32xf32>
    %597 = vector.extract_strided_slice %578 {offsets = [0, 64], sizes = [2, 32], strides = [1, 1]} : vector<2x96xf32> to vector<2x32xf32>
    %598 = arith.addf %597, %570 : vector<2x32xf32>
    %599 = arith.mulf %587, %598 : vector<2x32xf32>
    %600 = arith.addf %596, %599 : vector<2x32xf32>
    %601 = math.tanh %600 : vector<2x32xf32>
    %cst_174 = arith.constant 1.000000e+00 : f32
    %602 = vector.broadcast %cst_174 : f32 to vector<2x32xf32>
    %603 = arith.subf %602, %595 : vector<2x32xf32>
    %604 = arith.mulf %603, %601 : vector<2x32xf32>
    %605 = vector.extract_strided_slice %574 {offsets = [0, 0], sizes = [2, 32], strides = [1, 1]} : vector<2x64xf32> to vector<2x32xf32>
    %606 = arith.mulf %595, %605 : vector<2x32xf32>
    %607 = arith.addf %604, %606 : vector<2x32xf32>
    %608 = vector.extract_strided_slice %577 {offsets = [0, 0], sizes = [2, 32], strides = [1, 1]} : vector<2x96xf32> to vector<2x32xf32>
    %609 = vector.extract_strided_slice %579 {offsets = [0, 0], sizes = [2, 32], strides = [1, 1]} : vector<2x96xf32> to vector<2x32xf32>
    %610 = arith.addf %608, %609 : vector<2x32xf32>
    %611 = arith.negf %610 : vector<2x32xf32>
    %612 = math.exp %611 : vector<2x32xf32>
    %cst_175 = arith.constant 1.000000e+00 : f32
    %613 = vector.broadcast %cst_175 : f32 to vector<2x32xf32>
    %614 = arith.addf %613, %612 : vector<2x32xf32>
    %615 = arith.divf %613, %614 : vector<2x32xf32>
    %616 = vector.extract_strided_slice %577 {offsets = [0, 32], sizes = [2, 32], strides = [1, 1]} : vector<2x96xf32> to vector<2x32xf32>
    %617 = vector.extract_strided_slice %579 {offsets = [0, 32], sizes = [2, 32], strides = [1, 1]} : vector<2x96xf32> to vector<2x32xf32>
    %618 = arith.addf %616, %617 : vector<2x32xf32>
    %619 = arith.negf %618 : vector<2x32xf32>
    %620 = math.exp %619 : vector<2x32xf32>
    %cst_176 = arith.constant 1.000000e+00 : f32
    %621 = vector.broadcast %cst_176 : f32 to vector<2x32xf32>
    %622 = arith.addf %621, %620 : vector<2x32xf32>
    %623 = arith.divf %621, %622 : vector<2x32xf32>
    %624 = vector.extract_strided_slice %577 {offsets = [0, 64], sizes = [2, 32], strides = [1, 1]} : vector<2x96xf32> to vector<2x32xf32>
    %625 = vector.extract_strided_slice %579 {offsets = [0, 64], sizes = [2, 32], strides = [1, 1]} : vector<2x96xf32> to vector<2x32xf32>
    %626 = arith.addf %625, %573 : vector<2x32xf32>
    %627 = arith.mulf %615, %626 : vector<2x32xf32>
    %628 = arith.addf %624, %627 : vector<2x32xf32>
    %629 = math.tanh %628 : vector<2x32xf32>
    %cst_177 = arith.constant 1.000000e+00 : f32
    %630 = vector.broadcast %cst_177 : f32 to vector<2x32xf32>
    %631 = arith.subf %630, %623 : vector<2x32xf32>
    %632 = arith.mulf %631, %629 : vector<2x32xf32>
    %633 = vector.extract_strided_slice %574 {offsets = [0, 32], sizes = [2, 32], strides = [1, 1]} : vector<2x64xf32> to vector<2x32xf32>
    %634 = arith.mulf %623, %633 : vector<2x32xf32>
    %635 = arith.addf %632, %634 : vector<2x32xf32>
    %c0_178 = arith.constant 0 : index
    %c0_179 = arith.constant 0 : index
    %636 = vector.load %arg19[%c0_178, %c0_179] : memref<16x32xf32, #tpu.memory_space<vmem>>, vector<2x32xf32>
    tpu.vector_store %arg19[%c0_178, %c0_179], %607 {strides = array<i32>} : memref<16x32xf32, #tpu.memory_space<vmem>>, vector<2x32xf32>,
    %c14_180 = arith.constant 14 : index
    %c0_181 = arith.constant 0 : index
    %637 = vector.load %arg20[%c14_180, %c0_181] : memref<16x32xf32, #tpu.memory_space<vmem>>, vector<2x32xf32>
    tpu.vector_store %arg20[%c14_180, %c0_181], %635 {strides = array<i32>} : memref<16x32xf32, #tpu.memory_space<vmem>>, vector<2x32xf32>,
    %638 = tpu.concatenate %607, %635 in 1 : vector<2x32xf32>, vector<2x32xf32> -> vector<2x64xf32>
    %cst_182 = arith.constant dense<0.000000e+00> : vector<2x192xf32>
    %639 = tpu.matmul %638, %567, %cst_182 {dimension_numbers = #tpu.dot_dimension_numbers<[1], [0], [0], [1], [0, 0, 1, 1], [], []>} : vector<2x64xf32>, vector<64x192xf32>, vector<2x192xf32> -> vector<2x192xf32>
    %c2_183 = arith.constant 2 : index
    %c0_184 = arith.constant 0 : index
    %640 = vector.load %arg17[%c2_183, %c0_184] : memref<16x96xf32, #tpu.memory_space<vmem>>, vector<2x96xf32>
    %c12_185 = arith.constant 12 : index
    %c0_186 = arith.constant 0 : index
    %641 = vector.load %arg18[%c12_185, %c0_186] : memref<16x96xf32, #tpu.memory_space<vmem>>, vector<2x96xf32>
    %642 = vector.extract_strided_slice %639 {offsets = [0, 0], sizes = [2, 96], strides = [1, 1]} : vector<2x192xf32> to vector<2x96xf32>
    %643 = vector.extract_strided_slice %639 {offsets = [0, 96], sizes = [2, 96], strides = [1, 1]} : vector<2x192xf32> to vector<2x96xf32>
    %644 = vector.extract_strided_slice %640 {offsets = [0, 0], sizes = [2, 32], strides = [1, 1]} : vector<2x96xf32> to vector<2x32xf32>
    %645 = vector.extract_strided_slice %642 {offsets = [0, 0], sizes = [2, 32], strides = [1, 1]} : vector<2x96xf32> to vector<2x32xf32>
    %646 = arith.addf %644, %645 : vector<2x32xf32>
    %647 = arith.negf %646 : vector<2x32xf32>
    %648 = math.exp %647 : vector<2x32xf32>
    %cst_187 = arith.constant 1.000000e+00 : f32
    %649 = vector.broadcast %cst_187 : f32 to vector<2x32xf32>
    %650 = arith.addf %649, %648 : vector<2x32xf32>
    %651 = arith.divf %649, %650 : vector<2x32xf32>
    %652 = vector.extract_strided_slice %640 {offsets = [0, 32], sizes = [2, 32], strides = [1, 1]} : vector<2x96xf32> to vector<2x32xf32>
    %653 = vector.extract_strided_slice %642 {offsets = [0, 32], sizes = [2, 32], strides = [1, 1]} : vector<2x96xf32> to vector<2x32xf32>
    %654 = arith.addf %652, %653 : vector<2x32xf32>
    %655 = arith.negf %654 : vector<2x32xf32>
    %656 = math.exp %655 : vector<2x32xf32>
    %cst_188 = arith.constant 1.000000e+00 : f32
    %657 = vector.broadcast %cst_188 : f32 to vector<2x32xf32>
    %658 = arith.addf %657, %656 : vector<2x32xf32>
    %659 = arith.divf %657, %658 : vector<2x32xf32>
    %660 = vector.extract_strided_slice %640 {offsets = [0, 64], sizes = [2, 32], strides = [1, 1]} : vector<2x96xf32> to vector<2x32xf32>
    %661 = vector.extract_strided_slice %642 {offsets = [0, 64], sizes = [2, 32], strides = [1, 1]} : vector<2x96xf32> to vector<2x32xf32>
    %662 = arith.addf %661, %570 : vector<2x32xf32>
    %663 = arith.mulf %651, %662 : vector<2x32xf32>
    %664 = arith.addf %660, %663 : vector<2x32xf32>
    %665 = math.tanh %664 : vector<2x32xf32>
    %cst_189 = arith.constant 1.000000e+00 : f32
    %666 = vector.broadcast %cst_189 : f32 to vector<2x32xf32>
    %667 = arith.subf %666, %659 : vector<2x32xf32>
    %668 = arith.mulf %667, %665 : vector<2x32xf32>
    %669 = vector.extract_strided_slice %638 {offsets = [0, 0], sizes = [2, 32], strides = [1, 1]} : vector<2x64xf32> to vector<2x32xf32>
    %670 = arith.mulf %659, %669 : vector<2x32xf32>
    %671 = arith.addf %668, %670 : vector<2x32xf32>
    %672 = vector.extract_strided_slice %641 {offsets = [0, 0], sizes = [2, 32], strides = [1, 1]} : vector<2x96xf32> to vector<2x32xf32>
    %673 = vector.extract_strided_slice %643 {offsets = [0, 0], sizes = [2, 32], strides = [1, 1]} : vector<2x96xf32> to vector<2x32xf32>
    %674 = arith.addf %672, %673 : vector<2x32xf32>
    %675 = arith.negf %674 : vector<2x32xf32>
    %676 = math.exp %675 : vector<2x32xf32>
    %cst_190 = arith.constant 1.000000e+00 : f32
    %677 = vector.broadcast %cst_190 : f32 to vector<2x32xf32>
    %678 = arith.addf %677, %676 : vector<2x32xf32>
    %679 = arith.divf %677, %678 : vector<2x32xf32>
    %680 = vector.extract_strided_slice %641 {offsets = [0, 32], sizes = [2, 32], strides = [1, 1]} : vector<2x96xf32> to vector<2x32xf32>
    %681 = vector.extract_strided_slice %643 {offsets = [0, 32], sizes = [2, 32], strides = [1, 1]} : vector<2x96xf32> to vector<2x32xf32>
    %682 = arith.addf %680, %681 : vector<2x32xf32>
    %683 = arith.negf %682 : vector<2x32xf32>
    %684 = math.exp %683 : vector<2x32xf32>
    %cst_191 = arith.constant 1.000000e+00 : f32
    %685 = vector.broadcast %cst_191 : f32 to vector<2x32xf32>
    %686 = arith.addf %685, %684 : vector<2x32xf32>
    %687 = arith.divf %685, %686 : vector<2x32xf32>
    %688 = vector.extract_strided_slice %641 {offsets = [0, 64], sizes = [2, 32], strides = [1, 1]} : vector<2x96xf32> to vector<2x32xf32>
    %689 = vector.extract_strided_slice %643 {offsets = [0, 64], sizes = [2, 32], strides = [1, 1]} : vector<2x96xf32> to vector<2x32xf32>
    %690 = arith.addf %689, %573 : vector<2x32xf32>
    %691 = arith.mulf %679, %690 : vector<2x32xf32>
    %692 = arith.addf %688, %691 : vector<2x32xf32>
    %693 = math.tanh %692 : vector<2x32xf32>
    %cst_192 = arith.constant 1.000000e+00 : f32
    %694 = vector.broadcast %cst_192 : f32 to vector<2x32xf32>
    %695 = arith.subf %694, %687 : vector<2x32xf32>
    %696 = arith.mulf %695, %693 : vector<2x32xf32>
    %697 = vector.extract_strided_slice %638 {offsets = [0, 32], sizes = [2, 32], strides = [1, 1]} : vector<2x64xf32> to vector<2x32xf32>
    %698 = arith.mulf %687, %697 : vector<2x32xf32>
    %699 = arith.addf %696, %698 : vector<2x32xf32>
    %c2_193 = arith.constant 2 : index
    %c0_194 = arith.constant 0 : index
    %700 = vector.load %arg19[%c2_193, %c0_194] : memref<16x32xf32, #tpu.memory_space<vmem>>, vector<2x32xf32>
    tpu.vector_store %arg19[%c2_193, %c0_194], %671 {strides = array<i32>} : memref<16x32xf32, #tpu.memory_space<vmem>>, vector<2x32xf32>,
    %c12_195 = arith.constant 12 : index
    %c0_196 = arith.constant 0 : index
    %701 = vector.load %arg20[%c12_195, %c0_196] : memref<16x32xf32, #tpu.memory_space<vmem>>, vector<2x32xf32>
    tpu.vector_store %arg20[%c12_195, %c0_196], %699 {strides = array<i32>} : memref<16x32xf32, #tpu.memory_space<vmem>>, vector<2x32xf32>,
    %702 = tpu.concatenate %671, %699 in 1 : vector<2x32xf32>, vector<2x32xf32> -> vector<2x64xf32>
    %cst_197 = arith.constant dense<0.000000e+00> : vector<2x192xf32>
    %703 = tpu.matmul %702, %567, %cst_197 {dimension_numbers = #tpu.dot_dimension_numbers<[1], [0], [0], [1], [0, 0, 1, 1], [], []>} : vector<2x64xf32>, vector<64x192xf32>, vector<2x192xf32> -> vector<2x192xf32>
    %c4_198 = arith.constant 4 : index
    %c0_199 = arith.constant 0 : index
    %704 = vector.load %arg17[%c4_198, %c0_199] : memref<16x96xf32, #tpu.memory_space<vmem>>, vector<2x96xf32>
    %c10_200 = arith.constant 10 : index
    %c0_201 = arith.constant 0 : index
    %705 = vector.load %arg18[%c10_200, %c0_201] : memref<16x96xf32, #tpu.memory_space<vmem>>, vector<2x96xf32>
    %706 = vector.extract_strided_slice %703 {offsets = [0, 0], sizes = [2, 96], strides = [1, 1]} : vector<2x192xf32> to vector<2x96xf32>
    %707 = vector.extract_strided_slice %703 {offsets = [0, 96], sizes = [2, 96], strides = [1, 1]} : vector<2x192xf32> to vector<2x96xf32>
    %708 = vector.extract_strided_slice %704 {offsets = [0, 0], sizes = [2, 32], strides = [1, 1]} : vector<2x96xf32> to vector<2x32xf32>
    %709 = vector.extract_strided_slice %706 {offsets = [0, 0], sizes = [2, 32], strides = [1, 1]} : vector<2x96xf32> to vector<2x32xf32>
    %710 = arith.addf %708, %709 : vector<2x32xf32>
    %711 = arith.negf %710 : vector<2x32xf32>
    %712 = math.exp %711 : vector<2x32xf32>
    %cst_202 = arith.constant 1.000000e+00 : f32
    %713 = vector.broadcast %cst_202 : f32 to vector<2x32xf32>
    %714 = arith.addf %713, %712 : vector<2x32xf32>
    %715 = arith.divf %713, %714 : vector<2x32xf32>
    %716 = vector.extract_strided_slice %704 {offsets = [0, 32], sizes = [2, 32], strides = [1, 1]} : vector<2x96xf32> to vector<2x32xf32>
    %717 = vector.extract_strided_slice %706 {offsets = [0, 32], sizes = [2, 32], strides = [1, 1]} : vector<2x96xf32> to vector<2x32xf32>
    %718 = arith.addf %716, %717 : vector<2x32xf32>
    %719 = arith.negf %718 : vector<2x32xf32>
    %720 = math.exp %719 : vector<2x32xf32>
    %cst_203 = arith.constant 1.000000e+00 : f32
    %721 = vector.broadcast %cst_203 : f32 to vector<2x32xf32>
    %722 = arith.addf %721, %720 : vector<2x32xf32>
    %723 = arith.divf %721, %722 : vector<2x32xf32>
    %724 = vector.extract_strided_slice %704 {offsets = [0, 64], sizes = [2, 32], strides = [1, 1]} : vector<2x96xf32> to vector<2x32xf32>
    %725 = vector.extract_strided_slice %706 {offsets = [0, 64], sizes = [2, 32], strides = [1, 1]} : vector<2x96xf32> to vector<2x32xf32>
    %726 = arith.addf %725, %570 : vector<2x32xf32>
    %727 = arith.mulf %715, %726 : vector<2x32xf32>
    %728 = arith.addf %724, %727 : vector<2x32xf32>
    %729 = math.tanh %728 : vector<2x32xf32>
    %cst_204 = arith.constant 1.000000e+00 : f32
    %730 = vector.broadcast %cst_204 : f32 to vector<2x32xf32>
    %731 = arith.subf %730, %723 : vector<2x32xf32>
    %732 = arith.mulf %731, %729 : vector<2x32xf32>
    %733 = vector.extract_strided_slice %702 {offsets = [0, 0], sizes = [2, 32], strides = [1, 1]} : vector<2x64xf32> to vector<2x32xf32>
    %734 = arith.mulf %723, %733 : vector<2x32xf32>
    %735 = arith.addf %732, %734 : vector<2x32xf32>
    %736 = vector.extract_strided_slice %705 {offsets = [0, 0], sizes = [2, 32], strides = [1, 1]} : vector<2x96xf32> to vector<2x32xf32>
    %737 = vector.extract_strided_slice %707 {offsets = [0, 0], sizes = [2, 32], strides = [1, 1]} : vector<2x96xf32> to vector<2x32xf32>
    %738 = arith.addf %736, %737 : vector<2x32xf32>
    %739 = arith.negf %738 : vector<2x32xf32>
    %740 = math.exp %739 : vector<2x32xf32>
    %cst_205 = arith.constant 1.000000e+00 : f32
    %741 = vector.broadcast %cst_205 : f32 to vector<2x32xf32>
    %742 = arith.addf %741, %740 : vector<2x32xf32>
    %743 = arith.divf %741, %742 : vector<2x32xf32>
    %744 = vector.extract_strided_slice %705 {offsets = [0, 32], sizes = [2, 32], strides = [1, 1]} : vector<2x96xf32> to vector<2x32xf32>
    %745 = vector.extract_strided_slice %707 {offsets = [0, 32], sizes = [2, 32], strides = [1, 1]} : vector<2x96xf32> to vector<2x32xf32>
    %746 = arith.addf %744, %745 : vector<2x32xf32>
    %747 = arith.negf %746 : vector<2x32xf32>
    %748 = math.exp %747 : vector<2x32xf32>
    %cst_206 = arith.constant 1.000000e+00 : f32
    %749 = vector.broadcast %cst_206 : f32 to vector<2x32xf32>
    %750 = arith.addf %749, %748 : vector<2x32xf32>
    %751 = arith.divf %749, %750 : vector<2x32xf32>
    %752 = vector.extract_strided_slice %705 {offsets = [0, 64], sizes = [2, 32], strides = [1, 1]} : vector<2x96xf32> to vector<2x32xf32>
    %753 = vector.extract_strided_slice %707 {offsets = [0, 64], sizes = [2, 32], strides = [1, 1]} : vector<2x96xf32> to vector<2x32xf32>
    %754 = arith.addf %753, %573 : vector<2x32xf32>
    %755 = arith.mulf %743, %754 : vector<2x32xf32>
    %756 = arith.addf %752, %755 : vector<2x32xf32>
    %757 = math.tanh %756 : vector<2x32xf32>
    %cst_207 = arith.constant 1.000000e+00 : f32
    %758 = vector.broadcast %cst_207 : f32 to vector<2x32xf32>
    %759 = arith.subf %758, %751 : vector<2x32xf32>
    %760 = arith.mulf %759, %757 : vector<2x32xf32>
    %761 = vector.extract_strided_slice %702 {offsets = [0, 32], sizes = [2, 32], strides = [1, 1]} : vector<2x64xf32> to vector<2x32xf32>
    %762 = arith.mulf %751, %761 : vector<2x32xf32>
    %763 = arith.addf %760, %762 : vector<2x32xf32>
    %c4_208 = arith.constant 4 : index
    %c0_209 = arith.constant 0 : index
    %764 = vector.load %arg19[%c4_208, %c0_209] : memref<16x32xf32, #tpu.memory_space<vmem>>, vector<2x32xf32>
    tpu.vector_store %arg19[%c4_208, %c0_209], %735 {strides = array<i32>} : memref<16x32xf32, #tpu.memory_space<vmem>>, vector<2x32xf32>,
    %c10_210 = arith.constant 10 : index
    %c0_211 = arith.constant 0 : index
    %765 = vector.load %arg20[%c10_210, %c0_211] : memref<16x32xf32, #tpu.memory_space<vmem>>, vector<2x32xf32>
    tpu.vector_store %arg20[%c10_210, %c0_211], %763 {strides = array<i32>} : memref<16x32xf32, #tpu.memory_space<vmem>>, vector<2x32xf32>,
    %766 = tpu.concatenate %735, %763 in 1 : vector<2x32xf32>, vector<2x32xf32> -> vector<2x64xf32>
    %cst_212 = arith.constant dense<0.000000e+00> : vector<2x192xf32>
    %767 = tpu.matmul %766, %567, %cst_212 {dimension_numbers = #tpu.dot_dimension_numbers<[1], [0], [0], [1], [0, 0, 1, 1], [], []>} : vector<2x64xf32>, vector<64x192xf32>, vector<2x192xf32> -> vector<2x192xf32>
    %c6_213 = arith.constant 6 : index
    %c0_214 = arith.constant 0 : index
    %768 = vector.load %arg17[%c6_213, %c0_214] : memref<16x96xf32, #tpu.memory_space<vmem>>, vector<2x96xf32>
    %c8_215 = arith.constant 8 : index
    %c0_216 = arith.constant 0 : index
    %769 = vector.load %arg18[%c8_215, %c0_216] : memref<16x96xf32, #tpu.memory_space<vmem>>, vector<2x96xf32>
    %770 = vector.extract_strided_slice %767 {offsets = [0, 0], sizes = [2, 96], strides = [1, 1]} : vector<2x192xf32> to vector<2x96xf32>
    %771 = vector.extract_strided_slice %767 {offsets = [0, 96], sizes = [2, 96], strides = [1, 1]} : vector<2x192xf32> to vector<2x96xf32>
    %772 = vector.extract_strided_slice %768 {offsets = [0, 0], sizes = [2, 32], strides = [1, 1]} : vector<2x96xf32> to vector<2x32xf32>
    %773 = vector.extract_strided_slice %770 {offsets = [0, 0], sizes = [2, 32], strides = [1, 1]} : vector<2x96xf32> to vector<2x32xf32>
    %774 = arith.addf %772, %773 : vector<2x32xf32>
    %775 = arith.negf %774 : vector<2x32xf32>
    %776 = math.exp %775 : vector<2x32xf32>
    %cst_217 = arith.constant 1.000000e+00 : f32
    %777 = vector.broadcast %cst_217 : f32 to vector<2x32xf32>
    %778 = arith.addf %777, %776 : vector<2x32xf32>
    %779 = arith.divf %777, %778 : vector<2x32xf32>
    %780 = vector.extract_strided_slice %768 {offsets = [0, 32], sizes = [2, 32], strides = [1, 1]} : vector<2x96xf32> to vector<2x32xf32>
    %781 = vector.extract_strided_slice %770 {offsets = [0, 32], sizes = [2, 32], strides = [1, 1]} : vector<2x96xf32> to vector<2x32xf32>
    %782 = arith.addf %780, %781 : vector<2x32xf32>
    %783 = arith.negf %782 : vector<2x32xf32>
    %784 = math.exp %783 : vector<2x32xf32>
    %cst_218 = arith.constant 1.000000e+00 : f32
    %785 = vector.broadcast %cst_218 : f32 to vector<2x32xf32>
    %786 = arith.addf %785, %784 : vector<2x32xf32>
    %787 = arith.divf %785, %786 : vector<2x32xf32>
    %788 = vector.extract_strided_slice %768 {offsets = [0, 64], sizes = [2, 32], strides = [1, 1]} : vector<2x96xf32> to vector<2x32xf32>
    %789 = vector.extract_strided_slice %770 {offsets = [0, 64], sizes = [2, 32], strides = [1, 1]} : vector<2x96xf32> to vector<2x32xf32>
    %790 = arith.addf %789, %570 : vector<2x32xf32>
    %791 = arith.mulf %779, %790 : vector<2x32xf32>
    %792 = arith.addf %788, %791 : vector<2x32xf32>
    %793 = math.tanh %792 : vector<2x32xf32>
    %cst_219 = arith.constant 1.000000e+00 : f32
    %794 = vector.broadcast %cst_219 : f32 to vector<2x32xf32>
    %795 = arith.subf %794, %787 : vector<2x32xf32>
    %796 = arith.mulf %795, %793 : vector<2x32xf32>
    %797 = vector.extract_strided_slice %766 {offsets = [0, 0], sizes = [2, 32], strides = [1, 1]} : vector<2x64xf32> to vector<2x32xf32>
    %798 = arith.mulf %787, %797 : vector<2x32xf32>
    %799 = arith.addf %796, %798 : vector<2x32xf32>
    %800 = vector.extract_strided_slice %769 {offsets = [0, 0], sizes = [2, 32], strides = [1, 1]} : vector<2x96xf32> to vector<2x32xf32>
    %801 = vector.extract_strided_slice %771 {offsets = [0, 0], sizes = [2, 32], strides = [1, 1]} : vector<2x96xf32> to vector<2x32xf32>
    %802 = arith.addf %800, %801 : vector<2x32xf32>
    %803 = arith.negf %802 : vector<2x32xf32>
    %804 = math.exp %803 : vector<2x32xf32>
    %cst_220 = arith.constant 1.000000e+00 : f32
    %805 = vector.broadcast %cst_220 : f32 to vector<2x32xf32>
    %806 = arith.addf %805, %804 : vector<2x32xf32>
    %807 = arith.divf %805, %806 : vector<2x32xf32>
    %808 = vector.extract_strided_slice %769 {offsets = [0, 32], sizes = [2, 32], strides = [1, 1]} : vector<2x96xf32> to vector<2x32xf32>
    %809 = vector.extract_strided_slice %771 {offsets = [0, 32], sizes = [2, 32], strides = [1, 1]} : vector<2x96xf32> to vector<2x32xf32>
    %810 = arith.addf %808, %809 : vector<2x32xf32>
    %811 = arith.negf %810 : vector<2x32xf32>
    %812 = math.exp %811 : vector<2x32xf32>
    %cst_221 = arith.constant 1.000000e+00 : f32
    %813 = vector.broadcast %cst_221 : f32 to vector<2x32xf32>
    %814 = arith.addf %813, %812 : vector<2x32xf32>
    %815 = arith.divf %813, %814 : vector<2x32xf32>
    %816 = vector.extract_strided_slice %769 {offsets = [0, 64], sizes = [2, 32], strides = [1, 1]} : vector<2x96xf32> to vector<2x32xf32>
    %817 = vector.extract_strided_slice %771 {offsets = [0, 64], sizes = [2, 32], strides = [1, 1]} : vector<2x96xf32> to vector<2x32xf32>
    %818 = arith.addf %817, %573 : vector<2x32xf32>
    %819 = arith.mulf %807, %818 : vector<2x32xf32>
    %820 = arith.addf %816, %819 : vector<2x32xf32>
    %821 = math.tanh %820 : vector<2x32xf32>
    %cst_222 = arith.constant 1.000000e+00 : f32
    %822 = vector.broadcast %cst_222 : f32 to vector<2x32xf32>
    %823 = arith.subf %822, %815 : vector<2x32xf32>
    %824 = arith.mulf %823, %821 : vector<2x32xf32>
    %825 = vector.extract_strided_slice %766 {offsets = [0, 32], sizes = [2, 32], strides = [1, 1]} : vector<2x64xf32> to vector<2x32xf32>
    %826 = arith.mulf %815, %825 : vector<2x32xf32>
    %827 = arith.addf %824, %826 : vector<2x32xf32>
    %c6_223 = arith.constant 6 : index
    %c0_224 = arith.constant 0 : index
    %828 = vector.load %arg19[%c6_223, %c0_224] : memref<16x32xf32, #tpu.memory_space<vmem>>, vector<2x32xf32>
    tpu.vector_store %arg19[%c6_223, %c0_224], %799 {strides = array<i32>} : memref<16x32xf32, #tpu.memory_space<vmem>>, vector<2x32xf32>,
    %c8_225 = arith.constant 8 : index
    %c0_226 = arith.constant 0 : index
    %829 = vector.load %arg20[%c8_225, %c0_226] : memref<16x32xf32, #tpu.memory_space<vmem>>, vector<2x32xf32>
    tpu.vector_store %arg20[%c8_225, %c0_226], %827 {strides = array<i32>} : memref<16x32xf32, #tpu.memory_space<vmem>>, vector<2x32xf32>,
    %830 = tpu.concatenate %799, %827 in 1 : vector<2x32xf32>, vector<2x32xf32> -> vector<2x64xf32>
    %cst_227 = arith.constant dense<0.000000e+00> : vector<2x192xf32>
    %831 = tpu.matmul %830, %567, %cst_227 {dimension_numbers = #tpu.dot_dimension_numbers<[1], [0], [0], [1], [0, 0, 1, 1], [], []>} : vector<2x64xf32>, vector<64x192xf32>, vector<2x192xf32> -> vector<2x192xf32>
    %c8_228 = arith.constant 8 : index
    %c0_229 = arith.constant 0 : index
    %832 = vector.load %arg17[%c8_228, %c0_229] : memref<16x96xf32, #tpu.memory_space<vmem>>, vector<2x96xf32>
    %c6_230 = arith.constant 6 : index
    %c0_231 = arith.constant 0 : index
    %833 = vector.load %arg18[%c6_230, %c0_231] : memref<16x96xf32, #tpu.memory_space<vmem>>, vector<2x96xf32>
    %834 = vector.extract_strided_slice %831 {offsets = [0, 0], sizes = [2, 96], strides = [1, 1]} : vector<2x192xf32> to vector<2x96xf32>
    %835 = vector.extract_strided_slice %831 {offsets = [0, 96], sizes = [2, 96], strides = [1, 1]} : vector<2x192xf32> to vector<2x96xf32>
    %836 = vector.extract_strided_slice %832 {offsets = [0, 0], sizes = [2, 32], strides = [1, 1]} : vector<2x96xf32> to vector<2x32xf32>
    %837 = vector.extract_strided_slice %834 {offsets = [0, 0], sizes = [2, 32], strides = [1, 1]} : vector<2x96xf32> to vector<2x32xf32>
    %838 = arith.addf %836, %837 : vector<2x32xf32>
    %839 = arith.negf %838 : vector<2x32xf32>
    %840 = math.exp %839 : vector<2x32xf32>
    %cst_232 = arith.constant 1.000000e+00 : f32
    %841 = vector.broadcast %cst_232 : f32 to vector<2x32xf32>
    %842 = arith.addf %841, %840 : vector<2x32xf32>
    %843 = arith.divf %841, %842 : vector<2x32xf32>
    %844 = vector.extract_strided_slice %832 {offsets = [0, 32], sizes = [2, 32], strides = [1, 1]} : vector<2x96xf32> to vector<2x32xf32>
    %845 = vector.extract_strided_slice %834 {offsets = [0, 32], sizes = [2, 32], strides = [1, 1]} : vector<2x96xf32> to vector<2x32xf32>
    %846 = arith.addf %844, %845 : vector<2x32xf32>
    %847 = arith.negf %846 : vector<2x32xf32>
    %848 = math.exp %847 : vector<2x32xf32>
    %cst_233 = arith.constant 1.000000e+00 : f32
    %849 = vector.broadcast %cst_233 : f32 to vector<2x32xf32>
    %850 = arith.addf %849, %848 : vector<2x32xf32>
    %851 = arith.divf %849, %850 : vector<2x32xf32>
    %852 = vector.extract_strided_slice %832 {offsets = [0, 64], sizes = [2, 32], strides = [1, 1]} : vector<2x96xf32> to vector<2x32xf32>
    %853 = vector.extract_strided_slice %834 {offsets = [0, 64], sizes = [2, 32], strides = [1, 1]} : vector<2x96xf32> to vector<2x32xf32>
    %854 = arith.addf %853, %570 : vector<2x32xf32>
    %855 = arith.mulf %843, %854 : vector<2x32xf32>
    %856 = arith.addf %852, %855 : vector<2x32xf32>
    %857 = math.tanh %856 : vector<2x32xf32>
    %cst_234 = arith.constant 1.000000e+00 : f32
    %858 = vector.broadcast %cst_234 : f32 to vector<2x32xf32>
    %859 = arith.subf %858, %851 : vector<2x32xf32>
    %860 = arith.mulf %859, %857 : vector<2x32xf32>
    %861 = vector.extract_strided_slice %830 {offsets = [0, 0], sizes = [2, 32], strides = [1, 1]} : vector<2x64xf32> to vector<2x32xf32>
    %862 = arith.mulf %851, %861 : vector<2x32xf32>
    %863 = arith.addf %860, %862 : vector<2x32xf32>
    %864 = vector.extract_strided_slice %833 {offsets = [0, 0], sizes = [2, 32], strides = [1, 1]} : vector<2x96xf32> to vector<2x32xf32>
    %865 = vector.extract_strided_slice %835 {offsets = [0, 0], sizes = [2, 32], strides = [1, 1]} : vector<2x96xf32> to vector<2x32xf32>
    %866 = arith.addf %864, %865 : vector<2x32xf32>
    %867 = arith.negf %866 : vector<2x32xf32>
    %868 = math.exp %867 : vector<2x32xf32>
    %cst_235 = arith.constant 1.000000e+00 : f32
    %869 = vector.broadcast %cst_235 : f32 to vector<2x32xf32>
    %870 = arith.addf %869, %868 : vector<2x32xf32>
    %871 = arith.divf %869, %870 : vector<2x32xf32>
    %872 = vector.extract_strided_slice %833 {offsets = [0, 32], sizes = [2, 32], strides = [1, 1]} : vector<2x96xf32> to vector<2x32xf32>
    %873 = vector.extract_strided_slice %835 {offsets = [0, 32], sizes = [2, 32], strides = [1, 1]} : vector<2x96xf32> to vector<2x32xf32>
    %874 = arith.addf %872, %873 : vector<2x32xf32>
    %875 = arith.negf %874 : vector<2x32xf32>
    %876 = math.exp %875 : vector<2x32xf32>
    %cst_236 = arith.constant 1.000000e+00 : f32
    %877 = vector.broadcast %cst_236 : f32 to vector<2x32xf32>
    %878 = arith.addf %877, %876 : vector<2x32xf32>
    %879 = arith.divf %877, %878 : vector<2x32xf32>
    %880 = vector.extract_strided_slice %833 {offsets = [0, 64], sizes = [2, 32], strides = [1, 1]} : vector<2x96xf32> to vector<2x32xf32>
    %881 = vector.extract_strided_slice %835 {offsets = [0, 64], sizes = [2, 32], strides = [1, 1]} : vector<2x96xf32> to vector<2x32xf32>
    %882 = arith.addf %881, %573 : vector<2x32xf32>
    %883 = arith.mulf %871, %882 : vector<2x32xf32>
    %884 = arith.addf %880, %883 : vector<2x32xf32>
    %885 = math.tanh %884 : vector<2x32xf32>
    %cst_237 = arith.constant 1.000000e+00 : f32
    %886 = vector.broadcast %cst_237 : f32 to vector<2x32xf32>
    %887 = arith.subf %886, %879 : vector<2x32xf32>
    %888 = arith.mulf %887, %885 : vector<2x32xf32>
    %889 = vector.extract_strided_slice %830 {offsets = [0, 32], sizes = [2, 32], strides = [1, 1]} : vector<2x64xf32> to vector<2x32xf32>
    %890 = arith.mulf %879, %889 : vector<2x32xf32>
    %891 = arith.addf %888, %890 : vector<2x32xf32>
    %c8_238 = arith.constant 8 : index
    %c0_239 = arith.constant 0 : index
    %892 = vector.load %arg19[%c8_238, %c0_239] : memref<16x32xf32, #tpu.memory_space<vmem>>, vector<2x32xf32>
    tpu.vector_store %arg19[%c8_238, %c0_239], %863 {strides = array<i32>} : memref<16x32xf32, #tpu.memory_space<vmem>>, vector<2x32xf32>,
    %c6_240 = arith.constant 6 : index
    %c0_241 = arith.constant 0 : index
    %893 = vector.load %arg20[%c6_240, %c0_241] : memref<16x32xf32, #tpu.memory_space<vmem>>, vector<2x32xf32>
    tpu.vector_store %arg20[%c6_240, %c0_241], %891 {strides = array<i32>} : memref<16x32xf32, #tpu.memory_space<vmem>>, vector<2x32xf32>,
    %894 = tpu.concatenate %863, %891 in 1 : vector<2x32xf32>, vector<2x32xf32> -> vector<2x64xf32>
    %cst_242 = arith.constant dense<0.000000e+00> : vector<2x192xf32>
    %895 = tpu.matmul %894, %567, %cst_242 {dimension_numbers = #tpu.dot_dimension_numbers<[1], [0], [0], [1], [0, 0, 1, 1], [], []>} : vector<2x64xf32>, vector<64x192xf32>, vector<2x192xf32> -> vector<2x192xf32>
    %c10_243 = arith.constant 10 : index
    %c0_244 = arith.constant 0 : index
    %896 = vector.load %arg17[%c10_243, %c0_244] : memref<16x96xf32, #tpu.memory_space<vmem>>, vector<2x96xf32>
    %c4_245 = arith.constant 4 : index
    %c0_246 = arith.constant 0 : index
    %897 = vector.load %arg18[%c4_245, %c0_246] : memref<16x96xf32, #tpu.memory_space<vmem>>, vector<2x96xf32>
    %898 = vector.extract_strided_slice %895 {offsets = [0, 0], sizes = [2, 96], strides = [1, 1]} : vector<2x192xf32> to vector<2x96xf32>
    %899 = vector.extract_strided_slice %895 {offsets = [0, 96], sizes = [2, 96], strides = [1, 1]} : vector<2x192xf32> to vector<2x96xf32>
    %900 = vector.extract_strided_slice %896 {offsets = [0, 0], sizes = [2, 32], strides = [1, 1]} : vector<2x96xf32> to vector<2x32xf32>
    %901 = vector.extract_strided_slice %898 {offsets = [0, 0], sizes = [2, 32], strides = [1, 1]} : vector<2x96xf32> to vector<2x32xf32>
    %902 = arith.addf %900, %901 : vector<2x32xf32>
    %903 = arith.negf %902 : vector<2x32xf32>
    %904 = math.exp %903 : vector<2x32xf32>
    %cst_247 = arith.constant 1.000000e+00 : f32
    %905 = vector.broadcast %cst_247 : f32 to vector<2x32xf32>
    %906 = arith.addf %905, %904 : vector<2x32xf32>
    %907 = arith.divf %905, %906 : vector<2x32xf32>
    %908 = vector.extract_strided_slice %896 {offsets = [0, 32], sizes = [2, 32], strides = [1, 1]} : vector<2x96xf32> to vector<2x32xf32>
    %909 = vector.extract_strided_slice %898 {offsets = [0, 32], sizes = [2, 32], strides = [1, 1]} : vector<2x96xf32> to vector<2x32xf32>
    %910 = arith.addf %908, %909 : vector<2x32xf32>
    %911 = arith.negf %910 : vector<2x32xf32>
    %912 = math.exp %911 : vector<2x32xf32>
    %cst_248 = arith.constant 1.000000e+00 : f32
    %913 = vector.broadcast %cst_248 : f32 to vector<2x32xf32>
    %914 = arith.addf %913, %912 : vector<2x32xf32>
    %915 = arith.divf %913, %914 : vector<2x32xf32>
    %916 = vector.extract_strided_slice %896 {offsets = [0, 64], sizes = [2, 32], strides = [1, 1]} : vector<2x96xf32> to vector<2x32xf32>
    %917 = vector.extract_strided_slice %898 {offsets = [0, 64], sizes = [2, 32], strides = [1, 1]} : vector<2x96xf32> to vector<2x32xf32>
    %918 = arith.addf %917, %570 : vector<2x32xf32>
    %919 = arith.mulf %907, %918 : vector<2x32xf32>
    %920 = arith.addf %916, %919 : vector<2x32xf32>
    %921 = math.tanh %920 : vector<2x32xf32>
    %cst_249 = arith.constant 1.000000e+00 : f32
    %922 = vector.broadcast %cst_249 : f32 to vector<2x32xf32>
    %923 = arith.subf %922, %915 : vector<2x32xf32>
    %924 = arith.mulf %923, %921 : vector<2x32xf32>
    %925 = vector.extract_strided_slice %894 {offsets = [0, 0], sizes = [2, 32], strides = [1, 1]} : vector<2x64xf32> to vector<2x32xf32>
    %926 = arith.mulf %915, %925 : vector<2x32xf32>
    %927 = arith.addf %924, %926 : vector<2x32xf32>
    %928 = vector.extract_strided_slice %897 {offsets = [0, 0], sizes = [2, 32], strides = [1, 1]} : vector<2x96xf32> to vector<2x32xf32>
    %929 = vector.extract_strided_slice %899 {offsets = [0, 0], sizes = [2, 32], strides = [1, 1]} : vector<2x96xf32> to vector<2x32xf32>
    %930 = arith.addf %928, %929 : vector<2x32xf32>
    %931 = arith.negf %930 : vector<2x32xf32>
    %932 = math.exp %931 : vector<2x32xf32>
    %cst_250 = arith.constant 1.000000e+00 : f32
    %933 = vector.broadcast %cst_250 : f32 to vector<2x32xf32>
    %934 = arith.addf %933, %932 : vector<2x32xf32>
    %935 = arith.divf %933, %934 : vector<2x32xf32>
    %936 = vector.extract_strided_slice %897 {offsets = [0, 32], sizes = [2, 32], strides = [1, 1]} : vector<2x96xf32> to vector<2x32xf32>
    %937 = vector.extract_strided_slice %899 {offsets = [0, 32], sizes = [2, 32], strides = [1, 1]} : vector<2x96xf32> to vector<2x32xf32>
    %938 = arith.addf %936, %937 : vector<2x32xf32>
    %939 = arith.negf %938 : vector<2x32xf32>
    %940 = math.exp %939 : vector<2x32xf32>
    %cst_251 = arith.constant 1.000000e+00 : f32
    %941 = vector.broadcast %cst_251 : f32 to vector<2x32xf32>
    %942 = arith.addf %941, %940 : vector<2x32xf32>
    %943 = arith.divf %941, %942 : vector<2x32xf32>
    %944 = vector.extract_strided_slice %897 {offsets = [0, 64], sizes = [2, 32], strides = [1, 1]} : vector<2x96xf32> to vector<2x32xf32>
    %945 = vector.extract_strided_slice %899 {offsets = [0, 64], sizes = [2, 32], strides = [1, 1]} : vector<2x96xf32> to vector<2x32xf32>
    %946 = arith.addf %945, %573 : vector<2x32xf32>
    %947 = arith.mulf %935, %946 : vector<2x32xf32>
    %948 = arith.addf %944, %947 : vector<2x32xf32>
    %949 = math.tanh %948 : vector<2x32xf32>
    %cst_252 = arith.constant 1.000000e+00 : f32
    %950 = vector.broadcast %cst_252 : f32 to vector<2x32xf32>
    %951 = arith.subf %950, %943 : vector<2x32xf32>
    %952 = arith.mulf %951, %949 : vector<2x32xf32>
    %953 = vector.extract_strided_slice %894 {offsets = [0, 32], sizes = [2, 32], strides = [1, 1]} : vector<2x64xf32> to vector<2x32xf32>
    %954 = arith.mulf %943, %953 : vector<2x32xf32>
    %955 = arith.addf %952, %954 : vector<2x32xf32>
    %c10_253 = arith.constant 10 : index
    %c0_254 = arith.constant 0 : index
    %956 = vector.load %arg19[%c10_253, %c0_254] : memref<16x32xf32, #tpu.memory_space<vmem>>, vector<2x32xf32>
    tpu.vector_store %arg19[%c10_253, %c0_254], %927 {strides = array<i32>} : memref<16x32xf32, #tpu.memory_space<vmem>>, vector<2x32xf32>,
    %c4_255 = arith.constant 4 : index
    %c0_256 = arith.constant 0 : index
    %957 = vector.load %arg20[%c4_255, %c0_256] : memref<16x32xf32, #tpu.memory_space<vmem>>, vector<2x32xf32>
    tpu.vector_store %arg20[%c4_255, %c0_256], %955 {strides = array<i32>} : memref<16x32xf32, #tpu.memory_space<vmem>>, vector<2x32xf32>,
    %958 = tpu.concatenate %927, %955 in 1 : vector<2x32xf32>, vector<2x32xf32> -> vector<2x64xf32>
    %cst_257 = arith.constant dense<0.000000e+00> : vector<2x192xf32>
    %959 = tpu.matmul %958, %567, %cst_257 {dimension_numbers = #tpu.dot_dimension_numbers<[1], [0], [0], [1], [0, 0, 1, 1], [], []>} : vector<2x64xf32>, vector<64x192xf32>, vector<2x192xf32> -> vector<2x192xf32>
    %c12_258 = arith.constant 12 : index
    %c0_259 = arith.constant 0 : index
    %960 = vector.load %arg17[%c12_258, %c0_259] : memref<16x96xf32, #tpu.memory_space<vmem>>, vector<2x96xf32>
    %c2_260 = arith.constant 2 : index
    %c0_261 = arith.constant 0 : index
    %961 = vector.load %arg18[%c2_260, %c0_261] : memref<16x96xf32, #tpu.memory_space<vmem>>, vector<2x96xf32>
    %962 = vector.extract_strided_slice %959 {offsets = [0, 0], sizes = [2, 96], strides = [1, 1]} : vector<2x192xf32> to vector<2x96xf32>
    %963 = vector.extract_strided_slice %959 {offsets = [0, 96], sizes = [2, 96], strides = [1, 1]} : vector<2x192xf32> to vector<2x96xf32>
    %964 = vector.extract_strided_slice %960 {offsets = [0, 0], sizes = [2, 32], strides = [1, 1]} : vector<2x96xf32> to vector<2x32xf32>
    %965 = vector.extract_strided_slice %962 {offsets = [0, 0], sizes = [2, 32], strides = [1, 1]} : vector<2x96xf32> to vector<2x32xf32>
    %966 = arith.addf %964, %965 : vector<2x32xf32>
    %967 = arith.negf %966 : vector<2x32xf32>
    %968 = math.exp %967 : vector<2x32xf32>
    %cst_262 = arith.constant 1.000000e+00 : f32
    %969 = vector.broadcast %cst_262 : f32 to vector<2x32xf32>
    %970 = arith.addf %969, %968 : vector<2x32xf32>
    %971 = arith.divf %969, %970 : vector<2x32xf32>
    %972 = vector.extract_strided_slice %960 {offsets = [0, 32], sizes = [2, 32], strides = [1, 1]} : vector<2x96xf32> to vector<2x32xf32>
    %973 = vector.extract_strided_slice %962 {offsets = [0, 32], sizes = [2, 32], strides = [1, 1]} : vector<2x96xf32> to vector<2x32xf32>
    %974 = arith.addf %972, %973 : vector<2x32xf32>
    %975 = arith.negf %974 : vector<2x32xf32>
    %976 = math.exp %975 : vector<2x32xf32>
    %cst_263 = arith.constant 1.000000e+00 : f32
    %977 = vector.broadcast %cst_263 : f32 to vector<2x32xf32>
    %978 = arith.addf %977, %976 : vector<2x32xf32>
    %979 = arith.divf %977, %978 : vector<2x32xf32>
    %980 = vector.extract_strided_slice %960 {offsets = [0, 64], sizes = [2, 32], strides = [1, 1]} : vector<2x96xf32> to vector<2x32xf32>
    %981 = vector.extract_strided_slice %962 {offsets = [0, 64], sizes = [2, 32], strides = [1, 1]} : vector<2x96xf32> to vector<2x32xf32>
    %982 = arith.addf %981, %570 : vector<2x32xf32>
    %983 = arith.mulf %971, %982 : vector<2x32xf32>
    %984 = arith.addf %980, %983 : vector<2x32xf32>
    %985 = math.tanh %984 : vector<2x32xf32>
    %cst_264 = arith.constant 1.000000e+00 : f32
    %986 = vector.broadcast %cst_264 : f32 to vector<2x32xf32>
    %987 = arith.subf %986, %979 : vector<2x32xf32>
    %988 = arith.mulf %987, %985 : vector<2x32xf32>
    %989 = vector.extract_strided_slice %958 {offsets = [0, 0], sizes = [2, 32], strides = [1, 1]} : vector<2x64xf32> to vector<2x32xf32>
    %990 = arith.mulf %979, %989 : vector<2x32xf32>
    %991 = arith.addf %988, %990 : vector<2x32xf32>
    %992 = vector.extract_strided_slice %961 {offsets = [0, 0], sizes = [2, 32], strides = [1, 1]} : vector<2x96xf32> to vector<2x32xf32>
    %993 = vector.extract_strided_slice %963 {offsets = [0, 0], sizes = [2, 32], strides = [1, 1]} : vector<2x96xf32> to vector<2x32xf32>
    %994 = arith.addf %992, %993 : vector<2x32xf32>
    %995 = arith.negf %994 : vector<2x32xf32>
    %996 = math.exp %995 : vector<2x32xf32>
    %cst_265 = arith.constant 1.000000e+00 : f32
    %997 = vector.broadcast %cst_265 : f32 to vector<2x32xf32>
    %998 = arith.addf %997, %996 : vector<2x32xf32>
    %999 = arith.divf %997, %998 : vector<2x32xf32>
    %1000 = vector.extract_strided_slice %961 {offsets = [0, 32], sizes = [2, 32], strides = [1, 1]} : vector<2x96xf32> to vector<2x32xf32>
    %1001 = vector.extract_strided_slice %963 {offsets = [0, 32], sizes = [2, 32], strides = [1, 1]} : vector<2x96xf32> to vector<2x32xf32>
    %1002 = arith.addf %1000, %1001 : vector<2x32xf32>
    %1003 = arith.negf %1002 : vector<2x32xf32>
    %1004 = math.exp %1003 : vector<2x32xf32>
    %cst_266 = arith.constant 1.000000e+00 : f32
    %1005 = vector.broadcast %cst_266 : f32 to vector<2x32xf32>
    %1006 = arith.addf %1005, %1004 : vector<2x32xf32>
    %1007 = arith.divf %1005, %1006 : vector<2x32xf32>
    %1008 = vector.extract_strided_slice %961 {offsets = [0, 64], sizes = [2, 32], strides = [1, 1]} : vector<2x96xf32> to vector<2x32xf32>
    %1009 = vector.extract_strided_slice %963 {offsets = [0, 64], sizes = [2, 32], strides = [1, 1]} : vector<2x96xf32> to vector<2x32xf32>
    %1010 = arith.addf %1009, %573 : vector<2x32xf32>
    %1011 = arith.mulf %999, %1010 : vector<2x32xf32>
    %1012 = arith.addf %1008, %1011 : vector<2x32xf32>
    %1013 = math.tanh %1012 : vector<2x32xf32>
    %cst_267 = arith.constant 1.000000e+00 : f32
    %1014 = vector.broadcast %cst_267 : f32 to vector<2x32xf32>
    %1015 = arith.subf %1014, %1007 : vector<2x32xf32>
    %1016 = arith.mulf %1015, %1013 : vector<2x32xf32>
    %1017 = vector.extract_strided_slice %958 {offsets = [0, 32], sizes = [2, 32], strides = [1, 1]} : vector<2x64xf32> to vector<2x32xf32>
    %1018 = arith.mulf %1007, %1017 : vector<2x32xf32>
    %1019 = arith.addf %1016, %1018 : vector<2x32xf32>
    %c12_268 = arith.constant 12 : index
    %c0_269 = arith.constant 0 : index
    %1020 = vector.load %arg19[%c12_268, %c0_269] : memref<16x32xf32, #tpu.memory_space<vmem>>, vector<2x32xf32>
    tpu.vector_store %arg19[%c12_268, %c0_269], %991 {strides = array<i32>} : memref<16x32xf32, #tpu.memory_space<vmem>>, vector<2x32xf32>,
    %c2_270 = arith.constant 2 : index
    %c0_271 = arith.constant 0 : index
    %1021 = vector.load %arg20[%c2_270, %c0_271] : memref<16x32xf32, #tpu.memory_space<vmem>>, vector<2x32xf32>
    tpu.vector_store %arg20[%c2_270, %c0_271], %1019 {strides = array<i32>} : memref<16x32xf32, #tpu.memory_space<vmem>>, vector<2x32xf32>,
    %1022 = tpu.concatenate %991, %1019 in 1 : vector<2x32xf32>, vector<2x32xf32> -> vector<2x64xf32>
    %cst_272 = arith.constant dense<0.000000e+00> : vector<2x192xf32>
    %1023 = tpu.matmul %1022, %567, %cst_272 {dimension_numbers = #tpu.dot_dimension_numbers<[1], [0], [0], [1], [0, 0, 1, 1], [], []>} : vector<2x64xf32>, vector<64x192xf32>, vector<2x192xf32> -> vector<2x192xf32>
    %c14_273 = arith.constant 14 : index
    %c0_274 = arith.constant 0 : index
    %1024 = vector.load %arg17[%c14_273, %c0_274] : memref<16x96xf32, #tpu.memory_space<vmem>>, vector<2x96xf32>
    %c0_275 = arith.constant 0 : index
    %c0_276 = arith.constant 0 : index
    %1025 = vector.load %arg18[%c0_275, %c0_276] : memref<16x96xf32, #tpu.memory_space<vmem>>, vector<2x96xf32>
    %1026 = vector.extract_strided_slice %1023 {offsets = [0, 0], sizes = [2, 96], strides = [1, 1]} : vector<2x192xf32> to vector<2x96xf32>
    %1027 = vector.extract_strided_slice %1023 {offsets = [0, 96], sizes = [2, 96], strides = [1, 1]} : vector<2x192xf32> to vector<2x96xf32>
    %1028 = vector.extract_strided_slice %1024 {offsets = [0, 0], sizes = [2, 32], strides = [1, 1]} : vector<2x96xf32> to vector<2x32xf32>
    %1029 = vector.extract_strided_slice %1026 {offsets = [0, 0], sizes = [2, 32], strides = [1, 1]} : vector<2x96xf32> to vector<2x32xf32>
    %1030 = arith.addf %1028, %1029 : vector<2x32xf32>
    %1031 = arith.negf %1030 : vector<2x32xf32>
    %1032 = math.exp %1031 : vector<2x32xf32>
    %cst_277 = arith.constant 1.000000e+00 : f32
    %1033 = vector.broadcast %cst_277 : f32 to vector<2x32xf32>
    %1034 = arith.addf %1033, %1032 : vector<2x32xf32>
    %1035 = arith.divf %1033, %1034 : vector<2x32xf32>
    %1036 = vector.extract_strided_slice %1024 {offsets = [0, 32], sizes = [2, 32], strides = [1, 1]} : vector<2x96xf32> to vector<2x32xf32>
    %1037 = vector.extract_strided_slice %1026 {offsets = [0, 32], sizes = [2, 32], strides = [1, 1]} : vector<2x96xf32> to vector<2x32xf32>
    %1038 = arith.addf %1036, %1037 : vector<2x32xf32>
    %1039 = arith.negf %1038 : vector<2x32xf32>
    %1040 = math.exp %1039 : vector<2x32xf32>
    %cst_278 = arith.constant 1.000000e+00 : f32
    %1041 = vector.broadcast %cst_278 : f32 to vector<2x32xf32>
    %1042 = arith.addf %1041, %1040 : vector<2x32xf32>
    %1043 = arith.divf %1041, %1042 : vector<2x32xf32>
    %1044 = vector.extract_strided_slice %1024 {offsets = [0, 64], sizes = [2, 32], strides = [1, 1]} : vector<2x96xf32> to vector<2x32xf32>
    %1045 = vector.extract_strided_slice %1026 {offsets = [0, 64], sizes = [2, 32], strides = [1, 1]} : vector<2x96xf32> to vector<2x32xf32>
    %1046 = arith.addf %1045, %570 : vector<2x32xf32>
    %1047 = arith.mulf %1035, %1046 : vector<2x32xf32>
    %1048 = arith.addf %1044, %1047 : vector<2x32xf32>
    %1049 = math.tanh %1048 : vector<2x32xf32>
    %cst_279 = arith.constant 1.000000e+00 : f32
    %1050 = vector.broadcast %cst_279 : f32 to vector<2x32xf32>
    %1051 = arith.subf %1050, %1043 : vector<2x32xf32>
    %1052 = arith.mulf %1051, %1049 : vector<2x32xf32>
    %1053 = vector.extract_strided_slice %1022 {offsets = [0, 0], sizes = [2, 32], strides = [1, 1]} : vector<2x64xf32> to vector<2x32xf32>
    %1054 = arith.mulf %1043, %1053 : vector<2x32xf32>
    %1055 = arith.addf %1052, %1054 : vector<2x32xf32>
    %1056 = vector.extract_strided_slice %1025 {offsets = [0, 0], sizes = [2, 32], strides = [1, 1]} : vector<2x96xf32> to vector<2x32xf32>
    %1057 = vector.extract_strided_slice %1027 {offsets = [0, 0], sizes = [2, 32], strides = [1, 1]} : vector<2x96xf32> to vector<2x32xf32>
    %1058 = arith.addf %1056, %1057 : vector<2x32xf32>
    %1059 = arith.negf %1058 : vector<2x32xf32>
    %1060 = math.exp %1059 : vector<2x32xf32>
    %cst_280 = arith.constant 1.000000e+00 : f32
    %1061 = vector.broadcast %cst_280 : f32 to vector<2x32xf32>
    %1062 = arith.addf %1061, %1060 : vector<2x32xf32>
    %1063 = arith.divf %1061, %1062 : vector<2x32xf32>
    %1064 = vector.extract_strided_slice %1025 {offsets = [0, 32], sizes = [2, 32], strides = [1, 1]} : vector<2x96xf32> to vector<2x32xf32>
    %1065 = vector.extract_strided_slice %1027 {offsets = [0, 32], sizes = [2, 32], strides = [1, 1]} : vector<2x96xf32> to vector<2x32xf32>
    %1066 = arith.addf %1064, %1065 : vector<2x32xf32>
    %1067 = arith.negf %1066 : vector<2x32xf32>
    %1068 = math.exp %1067 : vector<2x32xf32>
    %cst_281 = arith.constant 1.000000e+00 : f32
    %1069 = vector.broadcast %cst_281 : f32 to vector<2x32xf32>
    %1070 = arith.addf %1069, %1068 : vector<2x32xf32>
    %1071 = arith.divf %1069, %1070 : vector<2x32xf32>
    %1072 = vector.extract_strided_slice %1025 {offsets = [0, 64], sizes = [2, 32], strides = [1, 1]} : vector<2x96xf32> to vector<2x32xf32>
    %1073 = vector.extract_strided_slice %1027 {offsets = [0, 64], sizes = [2, 32], strides = [1, 1]} : vector<2x96xf32> to vector<2x32xf32>
    %1074 = arith.addf %1073, %573 : vector<2x32xf32>
    %1075 = arith.mulf %1063, %1074 : vector<2x32xf32>
    %1076 = arith.addf %1072, %1075 : vector<2x32xf32>
    %1077 = math.tanh %1076 : vector<2x32xf32>
    %cst_282 = arith.constant 1.000000e+00 : f32
    %1078 = vector.broadcast %cst_282 : f32 to vector<2x32xf32>
    %1079 = arith.subf %1078, %1071 : vector<2x32xf32>
    %1080 = arith.mulf %1079, %1077 : vector<2x32xf32>
    %1081 = vector.extract_strided_slice %1022 {offsets = [0, 32], sizes = [2, 32], strides = [1, 1]} : vector<2x64xf32> to vector<2x32xf32>
    %1082 = arith.mulf %1071, %1081 : vector<2x32xf32>
    %1083 = arith.addf %1080, %1082 : vector<2x32xf32>
    %c14_283 = arith.constant 14 : index
    %c0_284 = arith.constant 0 : index
    %1084 = vector.load %arg19[%c14_283, %c0_284] : memref<16x32xf32, #tpu.memory_space<vmem>>, vector<2x32xf32>
    tpu.vector_store %arg19[%c14_283, %c0_284], %1055 {strides = array<i32>} : memref<16x32xf32, #tpu.memory_space<vmem>>, vector<2x32xf32>,
    %c0_285 = arith.constant 0 : index
    %c0_286 = arith.constant 0 : index
    %1085 = vector.load %arg20[%c0_285, %c0_286] : memref<16x32xf32, #tpu.memory_space<vmem>>, vector<2x32xf32>
    tpu.vector_store %arg20[%c0_285, %c0_286], %1083 {strides = array<i32>} : memref<16x32xf32, #tpu.memory_space<vmem>>, vector<2x32xf32>,
    %c0_287 = arith.constant 0 : index
    %c0_288 = arith.constant 0 : index
    %1086 = vector.load %arg19[%c0_287, %c0_288] : memref<16x32xf32, #tpu.memory_space<vmem>>, vector<16x32xf32>
    %c0_289 = arith.constant 0 : index
    %c0_290 = arith.constant 0 : index
    %1087 = vector.load %arg20[%c0_289, %c0_290] : memref<16x32xf32, #tpu.memory_space<vmem>>, vector<16x32xf32>
    %c0_291 = arith.constant 0 : index
    %c0_292 = arith.constant 0 : index
    %1088 = vector.load %arg13[%c0_291, %c0_292] : memref<2x32xf32, #tpu.memory_space<vmem>>, vector<1x32xf32>
    %1089 = vector.broadcast %1088 : vector<1x32xf32> to vector<16x32xf32>
    %1090 = arith.mulf %1086, %1089 : vector<16x32xf32>
    %cst_293 = arith.constant dense<0.000000e+00> : vector<16xf32>
    %1091 = vector.multi_reduction <add>, %1090, %cst_293 [1] : vector<16x32xf32> to vector<16xf32>
    %1092 = vector.shape_cast %1091 : vector<16xf32> to vector<16x1xf32>
    %c0_294 = arith.constant 0 : index
    %c0_295 = arith.constant 0 : index
    %1093 = vector.load %arg14[%c0_294, %c0_295] : memref<2x32xf32, #tpu.memory_space<vmem>>, vector<1x32xf32>
    %1094 = vector.broadcast %1093 : vector<1x32xf32> to vector<16x32xf32>
    %1095 = arith.mulf %1087, %1094 : vector<16x32xf32>
    %cst_296 = arith.constant dense<0.000000e+00> : vector<16xf32>
    %1096 = vector.multi_reduction <add>, %1095, %cst_296 [1] : vector<16x32xf32> to vector<16xf32>
    %1097 = vector.shape_cast %1096 : vector<16xf32> to vector<16x1xf32>
    %1098 = arith.addf %1092, %1097 : vector<16x1xf32>
    %c1_297 = arith.constant 1 : index
    %c0_298 = arith.constant 0 : index
    %1099 = vector.load %arg13[%c1_297, %c0_298] : memref<2x32xf32, #tpu.memory_space<vmem>>, vector<1x32xf32>
    %1100 = vector.broadcast %1099 : vector<1x32xf32> to vector<16x32xf32>
    %1101 = arith.mulf %1086, %1100 : vector<16x32xf32>
    %cst_299 = arith.constant dense<0.000000e+00> : vector<16xf32>
    %1102 = vector.multi_reduction <add>, %1101, %cst_299 [1] : vector<16x32xf32> to vector<16xf32>
    %1103 = vector.shape_cast %1102 : vector<16xf32> to vector<16x1xf32>
    %c1_300 = arith.constant 1 : index
    %c0_301 = arith.constant 0 : index
    %1104 = vector.load %arg14[%c1_300, %c0_301] : memref<2x32xf32, #tpu.memory_space<vmem>>, vector<1x32xf32>
    %1105 = vector.broadcast %1104 : vector<1x32xf32> to vector<16x32xf32>
    %1106 = arith.mulf %1087, %1105 : vector<16x32xf32>
    %cst_302 = arith.constant dense<0.000000e+00> : vector<16xf32>
    %1107 = vector.multi_reduction <add>, %1106, %cst_302 [1] : vector<16x32xf32> to vector<16xf32>
    %1108 = vector.shape_cast %1107 : vector<16xf32> to vector<16x1xf32>
    %1109 = arith.addf %1103, %1108 : vector<16x1xf32>
    %1110 = tpu.concatenate %1098, %1109 in 1 : vector<16x1xf32>, vector<16x1xf32> -> vector<16x2xf32>
    %c0_303 = arith.constant 0 : index
    %c0_304 = arith.constant 0 : index
    %1111 = vector.load %arg15[%c0_303, %c0_304] : memref<1x2xf32, #tpu.memory_space<vmem>>, vector<1x2xf32>
    %1112 = vector.broadcast %1111 : vector<1x2xf32> to vector<16x2xf32>
    %1113 = arith.addf %1110, %1112 : vector<16x2xf32>
    %cst_305 = arith.constant 0.000000e+00 : f32
    %1114 = vector.broadcast %cst_305 : f32 to vector<16x2xf32>
    %1115 = arith.cmpf ogt, %1113, %1114 : vector<16x2xf32>
    %cst_306 = arith.constant 0.000000e+00 : f32
    %1116 = vector.broadcast %cst_306 : f32 to vector<16x2xf32>
    %1117 = arith.minimumf %1113, %1116 : vector<16x2xf32>
    %1118 = math.exp %1117 : vector<16x2xf32>
    %cst_307 = arith.constant 1.000000e+00 : f32
    %1119 = vector.broadcast %cst_307 : f32 to vector<16x2xf32>
    %1120 = arith.subf %1118, %1119 : vector<16x2xf32>
    %1121 = arith.select %1115, %1113, %1120 : vector<16x2xi1>, vector<16x2xf32>
    %c0_308 = arith.constant 0 : index
    %c0_309 = arith.constant 0 : index
    %1122 = vector.load %arg16[%c0_308, %c0_309] : memref<16x2xf32, #tpu.memory_space<vmem>>, vector<16x2xf32>
    tpu.vector_store %arg16[%c0_308, %c0_309], %1121 {strides = array<i32>} : memref<16x2xf32, #tpu.memory_space<vmem>>, vector<16x2xf32>,
    return
  }
}

</mosaic_0001>

<bundles_post_ra>
// kernel: enc_turbofy_rate2.1
= control target key start
LH: loop header
LB: loop body
LE: loop exit
PB: predicated region body
PF: predicated region fallthrough
CT: control target
= control target key end

     0   :  { %s5056_s0 = inlined_call_operand.vmem [shape: f32[16,2], index: 0, kind: input, shape index: {}]   ;;  %s5057_s1 = inlined_call_operand.vmem [shape: f32[2,96], index: 1, kind: input, shape index: {}]   ;;  %s5058_s2 = inlined_call_operand.hbm [shape: f32[2,96], index: 2, kind: input, shape index: {}]   ;;  %s5059_s3 = inlined_call_operand.hbm [shape: f32[1,96], index: 3, kind: input, shape index: {}]   ;;  %s5060_s4 = inlined_call_operand.hbm [shape: f32[1,96], index: 4, kind: input, shape index: {}]   ;;  %s5061_s5 = inlined_call_operand.vmem [shape: f32[64,192], index: 5, kind: input, shape index: {}]   ;;  %s5062_s6 = inlined_call_operand.hbm [shape: f32[1,64], index: 6, kind: input, shape index: {}]   ;;  %s5063_s7 = inlined_call_operand.hbm [shape: f32[64,96], index: 7, kind: input, shape index: {}]   ;;  %s5064_s8 = inlined_call_operand.vmem [shape: f32[64,96], index: 8, kind: input, shape index: {}]   ;;  %s5065_s9 = inlined_call_operand.hbm [shape: f32[1,96], index: 9, kind: input, shape index: {}]   ;;  %s5066_s10 = inlined_call_operand.vmem [shape: f32[1,96], index: 10, kind: input, shape index: {}]   ;;  %s5067_s11 = inlined_call_operand.hbm [shape: f32[64,192], index: 11, kind: input, shape index: {}]   ;;  %s5068_s12 = inlined_call_operand.vmem [shape: f32[1,64], index: 12, kind: input, shape index: {}]   ;;  %s5069_s13 = inlined_call_operand.vmem [shape: f32[2,32], index: 13, kind: input, shape index: {}]   ;;  %s5070_s14 = inlined_call_operand.vmem [shape: f32[2,32], index: 14, kind: input, shape index: {}]   ;;  %s5071_s15 = inlined_call_operand.vmem [shape: f32[1,2], index: 15, kind: input, shape index: {}]   ;;  %s5072_s16 = inlined_call_operand.vmem [shape: f32[16,2], index: 16, kind: output, shape index: {}]  }
   0x1   :  { %5074 = sst [smem:[#allocation21_spill]] %s5056_s0 }
   0x2   :  { %21 = vsyncpa [#allocation7], 0 }
   0x3   :  { %22 = vsyncpa [#allocation9], 0 }
   0x4   :  { %23 = vsyncpa [#allocation12], 0 }
   0x5   :  { %24 = vsyncpa [#allocation15], 0  ;;  %s4142_s21 = smov [#allocation8]   ;;  %s4143_s23 = smov [#allocation11]  }
   0x6   :  { %s45_s22 = sshll.u32 %s4142_s21, 4  ;;  %s67_s24 = sshll.u32 %s4143_s23, 4  ;;  %s46_s22 = int_to_ptr.vmem [resolvable:$true] %s45_s22  ;;  %s68_s24 = int_to_ptr.vmem [resolvable:$true] %s67_s24 }
   0x7   :  { %s3980_s27 = scalar_lea.hbm %s5059_s3, 16 }
   0x8   :  { %p3981_p0 = scmp.ne.s32.totalorder %s5059_s3, %s3980_s27  ;;  %p3984_p1 = scmp.lt.u32.totalorder %s3980_s27, %s5059_s3 }
   0xa   :  { %p3986_p2 = pnand %p3984_p1, %p3981_p0 }
   0xc   :  { %3989 = shalt.err (!%p3986_p2)
}
   0xd   :  { %s3990_s17 = scalar_lea.vmem %s46_s22, 16  ;;  %s3994_s18 = scalar_lea.vmem %s46_s22, 32 }
   0xe   :  { %p3991_p3 = scmp.ne.s32.totalorder %s46_s22, %s3990_s17  ;;  %p3995_p4 = scmp.lt.s32.totalorder %s46_s22, %s46_s22 }
   0xf   :  { %p3996_p5 = scmp.lt.s32.totalorder %s3994_s18, %s3990_s17 }
  0x11   :  { %p3997_p6 = por %p3996_p5, %p3995_p4 }
  0x13   :  { %p3998_p7 = pnand %p3997_p6, %p3991_p3 }
  0x15   :  { %4001 = shalt.err (!%p3998_p7)
}
  0x16   :  { %48 = dma.hbm_to_vmem [thread:$0]  %s5059_s3, 16, %s46_s22, [#allocation9]  }
  0x17   :  { %s4002_s25 = scalar_lea.hbm %s5062_s6, 16 }
  0x18   :  { %p4003_p8 = scmp.ne.s32.totalorder %s5062_s6, %s4002_s25  ;;  %p4006_p9 = scmp.lt.u32.totalorder %s4002_s25, %s5062_s6 }
  0x1a   :  { %p4008_p10 = pnand %p4006_p9, %p4003_p8 }
  0x1c   :  { %4011 = shalt.err (!%p4008_p10)
}
  0x1d   :  { %s4012_s30 = scalar_lea.vmem %s68_s24, 16  ;;  %s4016_s0 = scalar_lea.vmem %s68_s24, 32 }
  0x1e   :  { %p4013_p11 = scmp.ne.s32.totalorder %s68_s24, %s4012_s30  ;;  %p4017_p12 = scmp.lt.s32.totalorder %s68_s24, %s68_s24 }
  0x1f   :  { %p4018_p13 = scmp.lt.s32.totalorder %s4016_s0, %s4012_s30 }
  0x21   :  { %p4019_p0 = por %p4018_p13, %p4017_p12 }
  0x23   :  { %p4020_p1 = pnand %p4019_p0, %p4013_p11 }
  0x25   :  { %4023 = shalt.err (!%p4020_p1)
}
  0x26   :  { %70 = dma.hbm_to_vmem [thread:$0]  %s5062_s6, 16, %s68_s24, [#allocation12]  }
  0x27   :  { %s4144_s17 = smov [#allocation14]   ;;  %s4145_s19 = smov [#allocation6]  }
  0x28   :  { %s91_s18 = sshll.u32 %s4144_s17, 4  ;;  %s35_s20 = sshll.u32 %s4145_s19, 4  ;;  %s92_s18 = int_to_ptr.vmem [resolvable:$true] %s91_s18  ;;  %s36_s20 = int_to_ptr.vmem [resolvable:$true] %s35_s20 }
  0x29   :  { %s4024_s25 = scalar_lea.hbm %s5065_s9, 16 }
  0x2a   :  { %p4025_p2 = scmp.ne.s32.totalorder %s5065_s9, %s4024_s25  ;;  %p4028_p3 = scmp.lt.u32.totalorder %s4024_s25, %s5065_s9 }
  0x2c   :  { %p4030_p4 = pnand %p4028_p3, %p4025_p2 }
  0x2e   :  { %4033 = shalt.err (!%p4030_p4)
}
  0x2f   :  { %s4034_s6 = scalar_lea.vmem %s92_s18, 16  ;;  %s4038_s24 = scalar_lea.vmem %s92_s18, 32 }
  0x30   :  { %p4035_p5 = scmp.ne.s32.totalorder %s92_s18, %s4034_s6  ;;  %p4039_p6 = scmp.lt.s32.totalorder %s92_s18, %s92_s18 }
  0x31   :  { %p4040_p7 = scmp.lt.s32.totalorder %s4038_s24, %s4034_s6 }
  0x33   :  { %p4041_p8 = por %p4040_p7, %p4039_p6 }
  0x35   :  { %p4042_p9 = pnand %p4041_p8, %p4035_p5 }
  0x37   :  { %4045 = shalt.err (!%p4042_p9)
}
  0x38   :  { %94 = dma.hbm_to_vmem [thread:$0]  %s5065_s9, 16, %s92_s18, [#allocation15]  }
  0x39   :  { %s4046_s17 = scalar_lea.hbm %s5058_s2, 32 }
  0x3a   :  { %p4047_p10 = scmp.ne.s32.totalorder %s5058_s2, %s4046_s17  ;;  %p4050_p11 = scmp.lt.u32.totalorder %s4046_s17, %s5058_s2 }
  0x3c   :  { %p4052_p12 = pnand %p4050_p11, %p4047_p10 }
  0x3e   :  { %4055 = shalt.err (!%p4052_p12)
}
  0x3f   :  { %s4056_s26 = scalar_lea.vmem %s36_s20, 32  ;;  %p4061_p0 = scmp.lt.s32.totalorder %s36_s20, %s36_s20 }
  0x40   :  { %p4057_p13 = scmp.ne.s32.totalorder %s36_s20, %s4056_s26  ;;  %p4062_p1 = scmp.lt.s32.totalorder %s4056_s26, %s4056_s26 }
  0x42   :  { %p4063_p2 = por %p4062_p1, %p4061_p0 }
  0x44   :  { %p4064_p3 = pnand %p4063_p2, %p4057_p13 }
  0x46   :  { %4067 = shalt.err (!%p4064_p3)
}
  0x47   :  { %38 = dma.hbm_to_vmem [thread:$0]  %s5058_s2, 32, %s36_s20, [#allocation7]  }
  0x48   :  { %s4146_s27 = smov [#allocation10]   ;;  %s4147_s29 = smov [#allocation13]  }
  0x49   :  { %s55_s28 = sshll.u32 %s4146_s27, 4  ;;  %s76_s6 = sshll.u32 %s4147_s29, 4  ;;  %s56_s28 = int_to_ptr.vmem [resolvable:$true] %s55_s28  ;;  %s4292_s6 = int_to_ptr.vmem [resolvable:$true] %s76_s6 }
  0x4a   :  { %s4068_s0 = scalar_lea.hbm %s5060_s4, 16 }
  0x4b   :  { %p4069_p4 = scmp.ne.s32.totalorder %s5060_s4, %s4068_s0  ;;  %p4072_p5 = scmp.lt.u32.totalorder %s4068_s0, %s5060_s4 }
  0x4d   :  { %p4074_p6 = pnand %p4072_p5, %p4069_p4 }
  0x4f   :  { %4077 = shalt.err (!%p4074_p6)
}
  0x50   :  { %s4078_s2 = scalar_lea.vmem %s56_s28, 16  ;;  %s4082_s20 = scalar_lea.vmem %s56_s28, 32 }
  0x51   :  { %p4079_p7 = scmp.ne.s32.totalorder %s56_s28, %s4078_s2  ;;  %p4083_p8 = scmp.lt.s32.totalorder %s56_s28, %s56_s28 }
  0x52   :  { %p4084_p9 = scmp.lt.s32.totalorder %s4082_s20, %s4078_s2 }
  0x54   :  { %p4085_p10 = por %p4084_p9, %p4083_p8 }
  0x56   :  { %p4086_p11 = pnand %p4085_p10, %p4079_p7 }
  0x58   :  { %4089 = shalt.err (!%p4086_p11)
}
  0x59   :  { %58 = dma.hbm_to_vmem [thread:$0]  %s5060_s4, 16, %s56_s28, [#allocation9]  }
  0x5a   :  { %s4090_s9 = scalar_lea.hbm %s5063_s7, 1024 }
  0x5b   :  { %p4091_p12 = scmp.ne.s32.totalorder %s5063_s7, %s4090_s9  ;;  %p4094_p13 = scmp.lt.u32.totalorder %s4090_s9, %s5063_s7 }
  0x5d   :  { %p4096_p0 = pnand %p4094_p13, %p4091_p12 }
  0x5f   :  { %4099 = shalt.err (!%p4096_p0)
}
  0x60   :  { %s4100_s30 = scalar_lea.vmem %s4292_s6, 1024  ;;  %p4105_p2 = scmp.lt.s32.totalorder %s4292_s6, %s4292_s6 }
  0x61   :  { %p4101_p1 = scmp.ne.s32.totalorder %s4292_s6, %s4100_s30  ;;  %p4106_p3 = scmp.lt.s32.totalorder %s4100_s30, %s4100_s30 }
  0x63   :  { %p4107_p4 = por %p4106_p3, %p4105_p2 }
  0x65   :  { %p4108_p5 = pnand %p4107_p4, %p4101_p1 }
  0x67   :  { %4111 = shalt.err (!%p4108_p5)
}
  0x68   :  { %s4148_s4 = smov 128   ;;  %s4149_s28 = smov 8  }
  0x69   :  { %82 = dma.hbm_to_vmem [thread:$0]  %s5063_s7, 1024, %s4292_s6, [#allocation12], %s4148_s4, %s4148_s4, %s4149_s28  }
  0x6a   :  { %s4150_s22 = smov [#allocation16]   ;;  %s4112_s20 = scalar_lea.hbm %s5067_s11, 2048 }
  0x6b   :  { %s102_s17 = sshll.u32 %s4150_s22, 4  ;;  %p4113_p6 = scmp.ne.s32.totalorder %s5067_s11, %s4112_s20  ;;  %s103_s17 = int_to_ptr.vmem [resolvable:$true] %s102_s17 }
  0x6c   :  { %p4116_p7 = scmp.lt.u32.totalorder %s4112_s20, %s5067_s11 }
  0x6e   :  { %p4118_p8 = pnand %p4116_p7, %p4113_p6 }
  0x70   :  { %4121 = shalt.err (!%p4118_p8)
}
  0x71   :  { %s4122_s9 = scalar_lea.vmem %s103_s17, 2048  ;;  %p4127_p10 = scmp.lt.s32.totalorder %s103_s17, %s103_s17 }
  0x72   :  { %p4123_p9 = scmp.ne.s32.totalorder %s103_s17, %s4122_s9  ;;  %p4128_p11 = scmp.lt.s32.totalorder %s4122_s9, %s4122_s9 }
  0x74   :  { %p4129_p12 = por %p4128_p11, %p4127_p10 }
  0x76   :  { %p4130_p13 = pnand %p4129_p12, %p4123_p9 }
  0x78   :  { %4133 = shalt.err (!%p4130_p13)
}
  0x79   :  { %s4151_s7 = smov 256   ;;  %s4152_s6 = smov 16  }
  0x7a   :  { %108 = dma.hbm_to_vmem [thread:$0]  %s5067_s11, 2048, %s103_s17, [#allocation15], %s4151_s7, %s4151_s7, %s4152_s6  }
  0x7b   :  { %4134 = dma.done.wait [#allocation7], 32  }
  0x7c   :  { %4135 = vsyncadd [#allocation7], 4294967264 }
  0x7d   :  { %4136 = dma.done.wait [#allocation9], 32  }
  0x7e   :  { %4137 = vsyncadd [#allocation9], 4294967264 }
  0x7f   :  { %4138 = dma.done.wait [#allocation12], 1040  }
  0x80   :  { %4139 = vsyncadd [#allocation12], 4294966256 }
  0x81   :  { %4140 = dma.done.wait [#allocation15], 2064  }
  0x82   :  { %4141 = vsyncadd [#allocation15], 4294965232  ;;  %v4153_v0 = vmov 0.0   ;;  %v4154_v1 = vmov 1   ;;  %v4155_v2 = vmov 0   ;;  %v214_v3 = vld [vmem:[%s5061_s5 + $0x8] sm:$0xff] }
  0x83   :  { %304 = vmatprep.mubr.f32.mxu0 %v4153_v0  ;;  %3715 = vset.pattern.permute.xlu1 %v4154_v1  ;;  %v216_v4 = vld [vmem:[%s5061_s5 + $0x18] sm:$0xff]  ;;  %v213_v5 = vld [vmem:[%s5061_s5] sm:$0xff]  ;;  %v215_v7 = vld [vmem:[%s5061_s5 + $0x10] sm:$0xff]  ;;  %s5075_s4 = sld [smem:[#allocation21_spill]]  ;;  %s4156_s17 = smov 64   ;;  %vm183_vm0 = vcmask 785408  }
  0x84   :  { %3714 = vset.pattern.permute.xlu0 %v4155_v2  ;;  %465 = vmatprep.mubr.f32.mxu1 %v4153_v0  ;;  %v4346_v6 = vpack.c.bf16 %v216_v4, %v214_v3  ;;  %v218_v8 = vld [vmem:[%s5061_s5 + $0x28] sm:$0xff]  ;;  %v220_v9 = vld [vmem:[%s5061_s5 + $0x38] sm:$0xff]  ;;  %v4357_v10 = vpack.c.bf16 %v215_v7, %v213_v5  ;;  %v217_v12 = vld [vmem:[%s5061_s5 + $0x20] sm:$0xff]  ;;  %s4158_s6 = smov 96   ;;  %vm389_vm1 = vcmask 254976   ;;  %vm396_vm2 = vcmask 261120  }
  0x85   :  { %v4359_v11 = vpack.c.bf16 %v220_v9, %v218_v8  ;;  %v219_v13 = vld [vmem:[%s5061_s5 + $0x30] sm:$0xff]  ;;  %v222_v14 = vld [vmem:[%s5061_s5 + $0x48] sm:$0xff]  ;;  %v224_v15 = vld [vmem:[%s5061_s5 + $0x58] sm:$0xff]  ;;  %vm236_vm3 = vcmask 523264   ;;  %vm3215_vm4 = vcmask 7168   ;;  %vm3239_vm5 = vcmask 15360  }
  0x86   :  { %3406 = vmatprep.subr.bf16.mxu0 %v4346_v6  ;;  %3422 = vmatprep.subr.bf16.mxu1 %v4346_v6  ;;  %v4376_v16 = vpack.c.bf16 %v219_v13, %v217_v12  ;;  %v221_v17 = vld [vmem:[%s5061_s5 + $0x40] sm:$0xff]  ;;  %v4383_v18 = vpack.c.bf16 %v224_v15, %v222_v14  ;;  %v223_v19 = vld [vmem:[%s5061_s5 + $0x50] sm:$0xff]  ;;  %v226_v22 = vld [vmem:[%s5061_s5 + $0x68] sm:$0xff] }
  0x87   :  { %3408 = vmatpush1.bf16.msra.mxu0 %v4357_v10  ;;  %3424 = vmatpush1.bf16.msra.mxu1 %v4357_v10  ;;  %v4388_v20 = vld [vmem:[#allocation11] ss:$0 sm:$0xff]  ;;  %v228_v23 = vld [vmem:[%s5061_s5 + $0x78] sm:$0xff]  ;;  %v4403_v24 = vpack.c.bf16 %v223_v19, %v221_v17  ;;  %v227_v27 = vld [vmem:[%s5061_s5 + $0x70] sm:$0xff] }
  0x88   :  { %3410 = vmatprep.subr.bf16.mxu0 %v4359_v11  ;;  %3426 = vmatprep.subr.bf16.mxu1 %v4359_v11  ;;  %v4407_v25 = vpack.c.bf16 %v228_v23, %v226_v22  ;;  %v225_v26 = vld [vmem:[%s5061_s5 + $0x60] sm:$0xff] }
  0x89   :  { %v138_v21 = vld [vmem:[%s5075_s4] sm:$0xff]  ;;  %320 = vrot.lane.b32.xlu0 %v4388_v20, %s4156_s17  ;;  %v4417_v28 = vpack.c.bf16 %v227_v27, %v225_v26  ;;  %v139_v29 = vld [vmem:[%s5075_s4 + $0x8] sm:$0xff] }
  0x8a   :  { %159 = vperm.xlu1 %3715, %v138_v21   ;;  %v3251_v31 = vld [vmem:[%s5057_s1 + $0x1] ss:$0 sm:$0xff]  ;;  %v3250_v34 = vld [vmem:[%s5057_s1] ss:$0 sm:$0xff]  ;;  %v3252_v41 = vld [vmem:[#allocation8] ss:$0 sm:$0xff] }
  0x8b   :  { %3412 = vmatpush1.bf16.msra.mxu0 %v4376_v16  ;;  %3428 = vmatpush1.bf16.msra.mxu1 %v4376_v16  ;;  %v3254_v32 = vld [vmem:[#allocation6 + $0x1] ss:$0 sm:$0xff]  ;;  %v3253_v35 = vld [vmem:[#allocation6] ss:$0 sm:$0xff]  ;;  %v3255_v42 = vld [vmem:[#allocation10] ss:$0 sm:$0xff] }
  0x8c   :  { %3414 = vmatprep.subr.bf16.mxu0 %v4383_v18  ;;  %3430 = vmatprep.subr.bf16.mxu1 %v4383_v18  ;;  %s4157_s1 = smov 32  }
  0x8d   :  { %143 = vperm.xlu0 %3714, %v138_v21  }
  0x8e   :  { %3716 = vset.pattern.permute.xlu1 %v4155_v2 }
  0x8f   :  { %3416 = vmatpush1.bf16.msra.mxu0 %v4403_v24  ;;  %3432 = vmatpush1.bf16.msra.mxu1 %v4403_v24 }
  0x90   :  { %3418 = vmatprep.subr.bf16.mxu0 %v4407_v25  ;;  %3434 = vmatprep.subr.bf16.mxu1 %v4407_v25 }
  0x91   :  { %3717 = vset.pattern.permute.xlu0 %v4154_v1 }
  0x92   :  { %163 = vperm.xlu0 %3717, %v139_v29  }
  0x93   :  { %3420 = vmatpush1.bf16.msra.mxu0 %v4417_v28  ;;  %3436 = vmatpush1.bf16.msra.mxu1 %v4417_v28 }
  0x94   :  { %3438 = vmatprep.subr.bf16.mxu0 %v4346_v6  ;;  %3454 = vmatprep.subr.bf16.mxu1 %v4346_v6 }
  0x96   :  { %305 = vmatmul.mubr.f32.vlgmr.msra.gmra.mrb[0].mxu0 %v4153_v0 }
  0x97   :  { %3440 = vmatpush1.bf16.msra.mxu0 %v4357_v10  ;;  %624 = vmatprep.mubr.f32.mxu0 %v4153_v0 }
  0x98   :  { %3442 = vmatprep.subr.bf16.mxu0 %v4359_v11 }
  0x9b   :  { %3444 = vmatpush1.bf16.msra.mxu0 %v4376_v16 }
  0x9c   :  { %3446 = vmatprep.subr.bf16.mxu0 %v4383_v18 }
  0x9f   :  { %3448 = vmatpush1.bf16.msra.mxu0 %v4403_v24 }
  0xa0   :  { %3450 = vmatprep.subr.bf16.mxu0 %v4407_v25 }
  0xa3   :  { %3452 = vmatpush1.bf16.msra.mxu0 %v4417_v28 }
  0xa4   :  { %3470 = vmatprep.subr.bf16.mxu0 %v4346_v6 }
  0xfb   :  { %v4439_v30 = vpop.permute.xlu0 %320 }
 0x109   :  { %v160_v33 = vpop.permute.xlu1 %159 }
 0x10a   :  { %v170_v36 = vmul.f32 %v3251_v31, %v160_v33  ;;  %v198_v37 = vmul.f32 %v3254_v32, %v160_v33 }
 0x10c   :  { %v144_v38 = vpop.permute.xlu0 %143 }
 0x10d   :  { %v155_v39 = vmul.f32 %v3250_v34, %v144_v38  ;;  %v191_v40 = vmul.f32 %v3253_v35, %v144_v38 }
 0x10f   :  { %v172_v43 = vadd.f32 %v170_v36, %v155_v39  ;;  %v200_v44 = vadd.f32 %v198_v37, %v191_v40 }
 0x111   :  { %v181_v45 = vadd.f32 %v3252_v41, %v172_v43  ;;  %v209_v46 = vadd.f32 %v3255_v42, %v200_v44  ;;  %v164_v59 = vpop.permute.xlu0 %163 }
 0x112   :  { %v171_v60 = vmul.f32 %v3251_v31, %v164_v59  ;;  %v199_v61 = vmul.f32 %v3254_v32, %v164_v59 }
 0x113   :  { %184 = vst.msk [vmem:[#allocation2] sm:$0xff] %vm183_vm0, %v181_v45  ;;  %211 = vst.msk [vmem:[#allocation3] sm:$0xff] %vm183_vm0, %v209_v46 }
 0x11a   :  { %v311_v51 = vld [vmem:[#allocation2] sm:$0x3] }
 0x169   :  { %v306_v47 = vpop.f32.mrb[0].mxu0 }
 0x16a   :  { %v323_v48 = vadd.f32 %v4439_v30, %v306_v47  ;;  %v308_v49 = vpop.f32.mrb[1].mxu0  ;;  %v313_v52 = vadd.f32 %v311_v51, %v306_v47 }
 0x16b   :  { %v365_v50 = vadd.f32 %v4388_v20, %v308_v49 }
 0x16c   :  { %325 = vrot.lane.b32.xlu1 %v323_v48, %s4156_s17  ;;  %v3257_v53 = vmul.f32 -1.442695, %v313_v52 }
 0x16e   :  { %3718 = vpow2.f32 %v3257_v53  ;;  %v472_v53 = vld [vmem:[#allocation2 + $0x2] sm:$0x3] }
 0x170   :  { %148 = vperm.xlu1 %3716, %v139_v29  }
 0x174   :  { %344 = vrot.lane.b32.xlu1 %v306_v47, %s4157_s1 }
 0x178   :  { %367 = vrot.lane.b32.xlu1 %v365_v50, %s4158_s6  ;;  %v3719_v54 = vpop.eup %3718 }
 0x179   :  { %v317_v55 = vadd.f32 1.0, %v3719_v54 }
 0x17b   :  { %3720 = vrcp.f32 %v317_v55 }
 0x185   :  { %v3721_v56 = vpop.eup %3720 }
 0x186   :  { %v335_v31 = vsub.f32 1.0, %v3721_v56  ;;  %v341_v33 = vmul.f32 0.0, %v3721_v56 }
 0x1de   :  { %v326_v57 = vpop.permute.xlu1 %325 }
 0x1df   :  { %v328_v58 = vmul.f32 %v3721_v56, %v326_v57 }
 0x1e1   :  { %330 = vrot.lane.b32.xlu0 %v328_v58, %s4156_s17 }
 0x1ef   :  { %v149_v62 = vpop.permute.xlu1 %148 }
 0x1f0   :  { %v156_v63 = vmul.f32 %v3250_v34, %v149_v62  ;;  %v192_v1 = vmul.f32 %v3253_v35, %v149_v62 }
 0x1f2   :  { %v173_v2 = vadd.f32 %v171_v60, %v156_v63  ;;  %v201_v3 = vadd.f32 %v199_v61, %v192_v1 }
 0x1f3   :  { %v345_v7 = vpop.permute.xlu1 %344 }
 0x1f4   :  { %v182_v4 = vadd.f32 %v3252_v41, %v173_v2  ;;  %v210_v5 = vadd.f32 %v3255_v42, %v201_v3 }
 0x1f6   :  { %185 = vst.msk [vmem:[#allocation2 + $0x8] sm:$0xff] %vm183_vm0, %v182_v4  ;;  %212 = vst.msk [vmem:[#allocation3 + $0x8] sm:$0xff] %vm183_vm0, %v210_v5 }
 0x1f7   :  { %v368_v17 = vpop.permute.xlu1 %367 }
 0x1fd   :  { %v312_v8 = vld [vmem:[#allocation3 + $0xe] sm:$0x3]  ;;  %v473_v58 = vld [vmem:[#allocation3 + $0xc] sm:$0x3] }
 0x1fe   :  { %v347_v9 = vadd.f32 %v345_v7, %v312_v8 }
 0x200   :  { %v3258_v12 = vmul.f32 -1.442695, %v347_v9 }
 0x202   :  { %3722 = vpow2.f32 %v3258_v12 }
 0x20c   :  { %v3723_v13 = vpop.eup %3722 }
 0x20d   :  { %v351_v14 = vadd.f32 1.0, %v3723_v13 }
 0x20f   :  { %3724 = vrcp.f32 %v351_v14 }
 0x219   :  { %v3725_v15 = vpop.eup %3724 }
 0x21a   :  { %v370_v19 = vmul.f32 %v3725_v15, %v368_v17 }
 0x21c   :  { %372 = vrot.lane.b32.xlu1 %v370_v19, %s4156_s17 }
 0x220   :  { %355 = vrot.lane.b32.xlu1 %v308_v49, %s4157_s1 }
 0x253   :  { %v331_v21 = vpop.permute.xlu0 %330 }
 0x254   :  { %v333_v22 = vadd.f32 %v331_v21, %v311_v51 }
 0x256   :  { %3726 = vtanh.f32 %v333_v22 }
 0x260   :  { %v3727_v23 = vpop.eup %3726 }
 0x261   :  { %337 = vrot.lane.b32.xlu0 %v3727_v23, %s4158_s6 }
 0x28e   :  { %v373_v26 = vpop.permute.xlu1 %372 }
 0x28f   :  { %v375_v27 = vadd.f32 %v373_v26, %v312_v8 }
 0x291   :  { %3728 = vtanh.f32 %v375_v27 }
 0x292   :  { %v356_v36 = vpop.permute.xlu1 %355 }
 0x293   :  { %v358_v37 = vadd.f32 %v356_v36, %v312_v8 }
 0x295   :  { %v3259_v38 = vmul.f32 -1.442695, %v358_v37 }
 0x297   :  { %3730 = vpow2.f32 %v3259_v38 }
 0x29b   :  { %v3729_v29 = vpop.eup %3728 }
 0x29c   :  { %379 = vrot.lane.b32.xlu0 %v3729_v29, %s4158_s6 }
 0x2a1   :  { %v3731_v39 = vpop.eup %3730 }
 0x2a2   :  { %v362_v40 = vadd.f32 1.0, %v3731_v39 }
 0x2a4   :  { %3732 = vrcp.f32 %v362_v40 }
 0x2ae   :  { %v3733_v41 = vpop.eup %3732 }
 0x2af   :  { %v377_v43 = vsub.f32 1.0, %v3733_v41  ;;  %v383_v45 = vmul.f32 0.0, %v3733_v41 }
 0x2d3   :  { %v338_v32 = vpop.permute.xlu0 %337 }
 0x2d4   :  { %v340_v34 = vmul.f32 %v338_v32, %v335_v31 }
 0x2d6   :  { %v342_v35 = vadd.f32 %v341_v33, %v340_v34 }
 0x2d8   :  { %386 = vrot.lane.b32.xlu1 %v342_v35, %s4158_s6 }
 0x30e   :  { %v380_v42 = vpop.permute.xlu0 %379 }
 0x30f   :  { %v382_v44 = vmul.f32 %v380_v42, %v377_v43 }
 0x311   :  { %v4462_v46 = vadd.f32 %v383_v45, %v382_v44 }
 0x34a   :  { %v387_v47 = vpop.permute.xlu1 %386 }
 0x34b   :  { %390 = vst.msk [vmem:[#allocation4] sm:$0x3] %vm389_vm1, %v387_v47  ;;  %v4467_v48 = vsel %vm396_vm2, %v387_v47, %v4462_v46  ;;  %v631_v47 = vld [vmem:[#allocation2 + $0x4] sm:$0x3] }
 0x34c   :  { %3260 = vmatmul.mubr.msk.f32.vlgmr.msra.gmra.mrb[0].mxu1 %vm236_vm3, %v4467_v48 }
 0x34d   :  { %3456 = vmatpush1.bf16.msra.mxu1 %v4357_v10  ;;  %783 = vmatprep.mubr.f32.mxu1 %v4153_v0 }
 0x34e   :  { %3458 = vmatprep.subr.bf16.mxu1 %v4359_v11 }
 0x351   :  { %3460 = vmatpush1.bf16.msra.mxu1 %v4376_v16 }
 0x352   :  { %3462 = vmatprep.subr.bf16.mxu1 %v4383_v18 }
 0x355   :  { %3464 = vmatpush1.bf16.msra.mxu1 %v4403_v24 }
 0x356   :  { %3466 = vmatprep.subr.bf16.mxu1 %v4407_v25 }
 0x359   :  { %3468 = vmatpush1.bf16.msra.mxu1 %v4417_v28 }
 0x35a   :  { %3486 = vmatprep.subr.bf16.mxu1 %v4346_v6 }
 0x41f   :  { %v467_v49 = vpop.f32.mrb[0].mxu1 }
 0x420   :  { %v481_v50 = vadd.f32 %v467_v49, %v4439_v30  ;;  %505 = vrot.lane.b32.xlu1 %v467_v49, %s4157_s1  ;;  %v469_v51 = vpop.f32.mrb[1].mxu1  ;;  %v474_v54 = vadd.f32 %v472_v53, %v467_v49 }
 0x421   :  { %v526_v52 = vadd.f32 %v4388_v20, %v469_v51 }
 0x422   :  { %483 = vrot.lane.b32.xlu0 %v481_v50, %s4156_s17  ;;  %v3261_v55 = vmul.f32 -1.442695, %v474_v54 }
 0x424   :  { %3734 = vpow2.f32 %v3261_v55 }
 0x426   :  { %528 = vrot.lane.b32.xlu0 %v526_v52, %s4158_s6  ;;  %v632_v52 = vld [vmem:[#allocation3 + $0xa] sm:$0x3] }
 0x42e   :  { %v3735_v56 = vpop.eup %3734 }
 0x42f   :  { %v478_v57 = vadd.f32 1.0, %v3735_v56 }
 0x431   :  { %3736 = vrcp.f32 %v478_v57 }
 0x43b   :  { %v3737_v61 = vpop.eup %3736 }
 0x43c   :  { %v493_v19 = vsub.f32 1.0, %v3737_v61 }
 0x492   :  { %v506_v59 = vpop.permute.xlu1 %505 }
 0x493   :  { %v508_v60 = vadd.f32 %v506_v59, %v473_v58 }
 0x494   :  { %v484_v62 = vpop.permute.xlu0 %483 }
 0x495   :  { %v3262_v63 = vmul.f32 -1.442695, %v508_v60  ;;  %v486_v1 = vmul.f32 %v3737_v61, %v484_v62 }
 0x497   :  { %3738 = vpow2.f32 %v3262_v63  ;;  %488 = vrot.lane.b32.xlu1 %v486_v1, %s4156_s17 }
 0x498   :  { %v529_v5 = vpop.permute.xlu0 %528 }
 0x4a1   :  { %v3739_v2 = vpop.eup %3738 }
 0x4a2   :  { %v512_v3 = vadd.f32 1.0, %v3739_v2 }
 0x4a4   :  { %3740 = vrcp.f32 %v512_v3 }
 0x4ae   :  { %v3741_v4 = vpop.eup %3740 }
 0x4af   :  { %v531_v7 = vmul.f32 %v3741_v4, %v529_v5 }
 0x4b1   :  { %533 = vrot.lane.b32.xlu0 %v531_v7, %s4156_s17 }
 0x4b5   :  { %499 = vrot.lane.b32.xlu0 %v4467_v48, %s4157_s1 }
 0x509   :  { %v489_v8 = vpop.permute.xlu1 %488 }
 0x50a   :  { %v491_v9 = vadd.f32 %v489_v8, %v472_v53 }
 0x50c   :  { %3742 = vtanh.f32 %v491_v9 }
 0x516   :  { %v3743_v12 = vpop.eup %3742 }
 0x517   :  { %495 = vrot.lane.b32.xlu1 %v3743_v12, %s4158_s6 }
 0x51b   :  { %516 = vrot.lane.b32.xlu1 %v469_v51, %s4157_s1 }
 0x523   :  { %v534_v13 = vpop.permute.xlu0 %533 }
 0x524   :  { %v536_v14 = vadd.f32 %v534_v13, %v473_v58 }
 0x526   :  { %3744 = vtanh.f32 %v536_v14 }
 0x527   :  { %v500_v17 = vpop.permute.xlu0 %499 }
 0x528   :  { %v502_v22 = vmul.f32 %v3737_v61, %v500_v17 }
 0x530   :  { %v3745_v15 = vpop.eup %3744 }
 0x531   :  { %540 = vrot.lane.b32.xlu0 %v3745_v15, %s4158_s6 }
 0x589   :  { %v496_v21 = vpop.permute.xlu1 %495 }
 0x58a   :  { %v498_v23 = vmul.f32 %v496_v21, %v493_v19 }
 0x58c   :  { %v503_v26 = vadd.f32 %v502_v22, %v498_v23 }
 0x58d   :  { %v517_v27 = vpop.permute.xlu1 %516 }
 0x58e   :  { %547 = vrot.lane.b32.xlu1 %v503_v26, %s4158_s6  ;;  %v519_v29 = vadd.f32 %v517_v27, %v473_v58 }
 0x590   :  { %v3263_v31 = vmul.f32 -1.442695, %v519_v29 }
 0x592   :  { %3746 = vpow2.f32 %v3263_v31 }
 0x59c   :  { %v3747_v32 = vpop.eup %3746 }
 0x59d   :  { %v523_v33 = vadd.f32 1.0, %v3747_v32 }
 0x59f   :  { %3748 = vrcp.f32 %v523_v33 }
 0x5a3   :  { %v541_v36 = vpop.permute.xlu0 %540 }
 0x5a9   :  { %v3749_v34 = vpop.eup %3748 }
 0x5aa   :  { %v538_v35 = vsub.f32 1.0, %v3749_v34  ;;  %v544_v38 = vmul.f32 %v3749_v34, %v4467_v48 }
 0x5ac   :  { %v543_v37 = vmul.f32 %v541_v36, %v538_v35 }
 0x5ae   :  { %v4494_v39 = vadd.f32 %v544_v38, %v543_v37 }
 0x600   :  { %v548_v40 = vpop.permute.xlu1 %547 }
 0x601   :  { %550 = vst.msk [vmem:[#allocation4 + $0x2] sm:$0x3] %vm389_vm1, %v548_v40  ;;  %v4499_v41 = vsel %vm396_vm2, %v548_v40, %v4494_v39 }
 0x602   :  { %3264 = vmatmul.mubr.msk.f32.vlgmr.msra.gmra.mrb[2].mxu0 %vm236_vm3, %v4499_v41 }
 0x603   :  { %3472 = vmatpush1.bf16.msra.mxu0 %v4357_v10  ;;  %942 = vmatprep.mubr.f32.mxu0 %v4153_v0 }
 0x604   :  { %3474 = vmatprep.subr.bf16.mxu0 %v4359_v11 }
 0x607   :  { %3476 = vmatpush1.bf16.msra.mxu0 %v4376_v16 }
 0x608   :  { %3478 = vmatprep.subr.bf16.mxu0 %v4383_v18 }
 0x60b   :  { %3480 = vmatpush1.bf16.msra.mxu0 %v4403_v24 }
 0x60c   :  { %3482 = vmatprep.subr.bf16.mxu0 %v4407_v25 }
 0x60f   :  { %3484 = vmatpush1.bf16.msra.mxu0 %v4417_v28 }
 0x610   :  { %3502 = vmatprep.subr.bf16.mxu0 %v4346_v6 }
 0x6d5   :  { %v626_v42 = vpop.f32.mrb[2].mxu0 }
 0x6d6   :  { %v640_v43 = vadd.f32 %v626_v42, %v4439_v30  ;;  %664 = vrot.lane.b32.xlu1 %v626_v42, %s4157_s1  ;;  %v628_v44 = vpop.f32.mrb[3].mxu0  ;;  %v633_v48 = vadd.f32 %v631_v47, %v626_v42 }
 0x6d7   :  { %v685_v45 = vadd.f32 %v4388_v20, %v628_v44 }
 0x6d8   :  { %642 = vrot.lane.b32.xlu0 %v640_v43, %s4156_s17  ;;  %v3265_v49 = vmul.f32 -1.442695, %v633_v48 }
 0x6da   :  { %3750 = vpow2.f32 %v3265_v49 }
 0x6dc   :  { %687 = vrot.lane.b32.xlu0 %v685_v45, %s4158_s6 }
 0x6e4   :  { %v3751_v50 = vpop.eup %3750 }
 0x6e5   :  { %v637_v51 = vadd.f32 1.0, %v3751_v50 }
 0x6e7   :  { %3752 = vrcp.f32 %v637_v51 }
 0x6f1   :  { %v3753_v55 = vpop.eup %3752 }
 0x6f2   :  { %v652_v9 = vsub.f32 1.0, %v3753_v55 }
 0x748   :  { %v665_v53 = vpop.permute.xlu1 %664 }
 0x749   :  { %v667_v54 = vadd.f32 %v665_v53, %v632_v52 }
 0x74a   :  { %v643_v56 = vpop.permute.xlu0 %642 }
 0x74b   :  { %v3266_v57 = vmul.f32 -1.442695, %v667_v54  ;;  %v645_v58 = vmul.f32 %v3753_v55, %v643_v56 }
 0x74d   :  { %3754 = vpow2.f32 %v3266_v57  ;;  %647 = vrot.lane.b32.xlu1 %v645_v58, %s4156_s17 }
 0x74e   :  { %v688_v62 = vpop.permute.xlu0 %687 }
 0x757   :  { %v3755_v59 = vpop.eup %3754 }
 0x758   :  { %v671_v60 = vadd.f32 1.0, %v3755_v59 }
 0x75a   :  { %3756 = vrcp.f32 %v671_v60 }
 0x764   :  { %v3757_v61 = vpop.eup %3756 }
 0x765   :  { %v690_v63 = vmul.f32 %v3757_v61, %v688_v62 }
 0x767   :  { %692 = vrot.lane.b32.xlu0 %v690_v63, %s4156_s17 }
 0x76b   :  { %658 = vrot.lane.b32.xlu0 %v4499_v41, %s4157_s1 }
 0x7bf   :  { %v648_v1 = vpop.permute.xlu1 %647 }
 0x7c0   :  { %v650_v2 = vadd.f32 %v648_v1, %v631_v47 }
 0x7c2   :  { %3758 = vtanh.f32 %v650_v2 }
 0x7cc   :  { %v3759_v3 = vpop.eup %3758 }
 0x7cd   :  { %654 = vrot.lane.b32.xlu1 %v3759_v3, %s4158_s6 }
 0x7d1   :  { %675 = vrot.lane.b32.xlu1 %v628_v44, %s4157_s1 }
 0x7d9   :  { %v693_v4 = vpop.permute.xlu0 %692 }
 0x7da   :  { %v695_v5 = vadd.f32 %v693_v4, %v632_v52 }
 0x7dc   :  { %3760 = vtanh.f32 %v695_v5 }
 0x7dd   :  { %v659_v8 = vpop.permute.xlu0 %658 }
 0x7de   :  { %v661_v13 = vmul.f32 %v3753_v55, %v659_v8 }
 0x7e6   :  { %v3761_v7 = vpop.eup %3760 }
 0x7e7   :  { %699 = vrot.lane.b32.xlu0 %v3761_v7, %s4158_s6 }
 0x83f   :  { %v655_v12 = vpop.permute.xlu1 %654 }
 0x840   :  { %v657_v14 = vmul.f32 %v655_v12, %v652_v9 }
 0x842   :  { %v662_v15 = vadd.f32 %v661_v13, %v657_v14 }
 0x843   :  { %v676_v17 = vpop.permute.xlu1 %675 }
 0x844   :  { %706 = vrot.lane.b32.xlu1 %v662_v15, %s4158_s6  ;;  %v678_v19 = vadd.f32 %v676_v17, %v632_v52 }
 0x846   :  { %v3267_v21 = vmul.f32 -1.442695, %v678_v19 }
 0x848   :  { %3762 = vpow2.f32 %v3267_v21 }
 0x852   :  { %v3763_v22 = vpop.eup %3762 }
 0x853   :  { %v682_v23 = vadd.f32 1.0, %v3763_v22 }
 0x855   :  { %3764 = vrcp.f32 %v682_v23 }
 0x859   :  { %v700_v29 = vpop.permute.xlu0 %699 }
 0x85f   :  { %v3765_v26 = vpop.eup %3764 }
 0x860   :  { %v697_v27 = vsub.f32 1.0, %v3765_v26  ;;  %v703_v32 = vmul.f32 %v3765_v26, %v4499_v41  ;;  %v790_v41 = vld [vmem:[#allocation2 + $0x6] sm:$0x3] }
 0x862   :  { %v702_v31 = vmul.f32 %v700_v29, %v697_v27 }
 0x864   :  { %v4526_v33 = vadd.f32 %v703_v32, %v702_v31 }
 0x8b6   :  { %v707_v34 = vpop.permute.xlu1 %706 }
 0x8b7   :  { %709 = vst.msk [vmem:[#allocation4 + $0x4] sm:$0x3] %vm389_vm1, %v707_v34  ;;  %v4531_v35 = vsel %vm396_vm2, %v707_v34, %v4526_v33 }
 0x8b8   :  { %3268 = vmatmul.mubr.msk.f32.vlgmr.msra.gmra.mrb[2].mxu1 %vm236_vm3, %v4531_v35 }
 0x8b9   :  { %3488 = vmatpush1.bf16.msra.mxu1 %v4357_v10  ;;  %1101 = vmatprep.mubr.f32.mxu1 %v4153_v0 }
 0x8ba   :  { %3490 = vmatprep.subr.bf16.mxu1 %v4359_v11 }
 0x8bd   :  { %3492 = vmatpush1.bf16.msra.mxu1 %v4376_v16 }
 0x8be   :  { %3494 = vmatprep.subr.bf16.mxu1 %v4383_v18 }
 0x8c1   :  { %3496 = vmatpush1.bf16.msra.mxu1 %v4403_v24 }
 0x8c2   :  { %3498 = vmatprep.subr.bf16.mxu1 %v4407_v25 }
 0x8c5   :  { %3500 = vmatpush1.bf16.msra.mxu1 %v4417_v28 }
 0x8c6   :  { %3518 = vmatprep.subr.bf16.mxu1 %v4346_v6  ;;  %v791_v6 = vld [vmem:[#allocation3 + $0x8] sm:$0x3] }
 0x98b   :  { %v785_v36 = vpop.f32.mrb[2].mxu1 }
 0x98c   :  { %v799_v37 = vadd.f32 %v785_v36, %v4439_v30  ;;  %823 = vrot.lane.b32.xlu1 %v785_v36, %s4157_s1  ;;  %v787_v38 = vpop.f32.mrb[3].mxu1  ;;  %v792_v42 = vadd.f32 %v790_v41, %v785_v36 }
 0x98d   :  { %v844_v40 = vadd.f32 %v4388_v20, %v787_v38 }
 0x98e   :  { %801 = vrot.lane.b32.xlu0 %v799_v37, %s4156_s17  ;;  %v3269_v43 = vmul.f32 -1.442695, %v792_v42 }
 0x990   :  { %3766 = vpow2.f32 %v3269_v43 }
 0x992   :  { %846 = vrot.lane.b32.xlu0 %v844_v40, %s4158_s6 }
 0x99a   :  { %v3767_v44 = vpop.eup %3766 }
 0x99b   :  { %v796_v45 = vadd.f32 1.0, %v3767_v44 }
 0x99d   :  { %3768 = vrcp.f32 %v796_v45 }
 0x9a7   :  { %v3769_v49 = vpop.eup %3768 }
 0x9a8   :  { %v811_v2 = vsub.f32 1.0, %v3769_v49 }
 0x9fe   :  { %v824_v47 = vpop.permute.xlu1 %823 }
 0x9ff   :  { %v826_v48 = vadd.f32 %v824_v47, %v791_v6 }
 0xa00   :  { %v802_v50 = vpop.permute.xlu0 %801 }
 0xa01   :  { %v3270_v51 = vmul.f32 -1.442695, %v826_v48  ;;  %v804_v52 = vmul.f32 %v3769_v49, %v802_v50 }
 0xa03   :  { %3770 = vpow2.f32 %v3270_v51  ;;  %806 = vrot.lane.b32.xlu1 %v804_v52, %s4156_s17 }
 0xa04   :  { %v847_v56 = vpop.permute.xlu0 %846 }
 0xa0d   :  { %v3771_v53 = vpop.eup %3770 }
 0xa0e   :  { %v830_v54 = vadd.f32 1.0, %v3771_v53 }
 0xa10   :  { %3772 = vrcp.f32 %v830_v54 }
 0xa1a   :  { %v3773_v55 = vpop.eup %3772 }
 0xa1b   :  { %v849_v57 = vmul.f32 %v3773_v55, %v847_v56 }
 0xa1d   :  { %851 = vrot.lane.b32.xlu0 %v849_v57, %s4156_s17 }
 0xa21   :  { %817 = vrot.lane.b32.xlu0 %v4531_v35, %s4157_s1 }
 0xa75   :  { %v807_v58 = vpop.permute.xlu1 %806 }
 0xa76   :  { %v809_v59 = vadd.f32 %v807_v58, %v790_v41  ;;  %v950_v41 = vld [vmem:[#allocation3 + $0x6] sm:$0x3] }
 0xa78   :  { %3774 = vtanh.f32 %v809_v59 }
 0xa82   :  { %v3775_v60 = vpop.eup %3774 }
 0xa83   :  { %813 = vrot.lane.b32.xlu1 %v3775_v60, %s4158_s6 }
 0xa87   :  { %834 = vrot.lane.b32.xlu1 %v787_v38, %s4157_s1 }
 0xa8f   :  { %v852_v61 = vpop.permute.xlu0 %851 }
 0xa90   :  { %v854_v62 = vadd.f32 %v852_v61, %v791_v6 }
 0xa92   :  { %3776 = vtanh.f32 %v854_v62 }
 0xa93   :  { %v818_v1 = vpop.permute.xlu0 %817 }
 0xa94   :  { %v820_v4 = vmul.f32 %v3769_v49, %v818_v1 }
 0xa9c   :  { %v3777_v63 = vpop.eup %3776 }
 0xa9d   :  { %858 = vrot.lane.b32.xlu0 %v3777_v63, %s4158_s6 }
 0xaf5   :  { %v814_v3 = vpop.permute.xlu1 %813 }
 0xaf6   :  { %v816_v5 = vmul.f32 %v814_v3, %v811_v2 }
 0xaf8   :  { %v821_v7 = vadd.f32 %v820_v4, %v816_v5 }
 0xaf9   :  { %v835_v8 = vpop.permute.xlu1 %834 }
 0xafa   :  { %865 = vrot.lane.b32.xlu1 %v821_v7, %s4158_s6  ;;  %v837_v9 = vadd.f32 %v835_v8, %v791_v6 }
 0xafc   :  { %v3271_v12 = vmul.f32 -1.442695, %v837_v9 }
 0xafe   :  { %3778 = vpow2.f32 %v3271_v12 }
 0xb08   :  { %v3779_v13 = vpop.eup %3778 }
 0xb09   :  { %v841_v14 = vadd.f32 1.0, %v3779_v13 }
 0xb0b   :  { %3780 = vrcp.f32 %v841_v14 }
 0xb0f   :  { %v859_v19 = vpop.permute.xlu0 %858 }
 0xb15   :  { %v3781_v15 = vpop.eup %3780 }
 0xb16   :  { %v856_v17 = vsub.f32 1.0, %v3781_v15  ;;  %v862_v22 = vmul.f32 %v3781_v15, %v4531_v35  ;;  %v949_v35 = vld [vmem:[#allocation2 + $0x8] sm:$0x3] }
 0xb18   :  { %v861_v21 = vmul.f32 %v859_v19, %v856_v17 }
 0xb1a   :  { %v4558_v23 = vadd.f32 %v862_v22, %v861_v21 }
 0xb6c   :  { %v866_v26 = vpop.permute.xlu1 %865 }
 0xb6d   :  { %868 = vst.msk [vmem:[#allocation4 + $0x6] sm:$0x3] %vm389_vm1, %v866_v26  ;;  %v4563_v27 = vsel %vm396_vm2, %v866_v26, %v4558_v23 }
 0xb6e   :  { %3272 = vmatmul.mubr.msk.f32.vlgmr.msra.gmra.mrb[4].mxu0 %vm236_vm3, %v4563_v27 }
 0xb6f   :  { %3504 = vmatpush1.bf16.msra.mxu0 %v4357_v10  ;;  %1260 = vmatprep.mubr.f32.mxu0 %v4153_v0 }
 0xb70   :  { %3506 = vmatprep.subr.bf16.mxu0 %v4359_v11 }
 0xb73   :  { %3508 = vmatpush1.bf16.msra.mxu0 %v4376_v16 }
 0xb74   :  { %3510 = vmatprep.subr.bf16.mxu0 %v4383_v18 }
 0xb77   :  { %3512 = vmatpush1.bf16.msra.mxu0 %v4403_v24 }
 0xb78   :  { %3514 = vmatprep.subr.bf16.mxu0 %v4407_v25 }
 0xb7b   :  { %3516 = vmatpush1.bf16.msra.mxu0 %v4417_v28 }
 0xc41   :  { %v944_v29 = vpop.f32.mrb[4].mxu0 }
 0xc42   :  { %v958_v31 = vadd.f32 %v944_v29, %v4439_v30  ;;  %982 = vrot.lane.b32.xlu1 %v944_v29, %s4157_s1  ;;  %v946_v32 = vpop.f32.mrb[5].mxu0  ;;  %v951_v36 = vadd.f32 %v949_v35, %v944_v29 }
 0xc43   :  { %v1003_v34 = vadd.f32 %v4388_v20, %v946_v32 }
 0xc44   :  { %960 = vrot.lane.b32.xlu0 %v958_v31, %s4156_s17  ;;  %v3273_v37 = vmul.f32 -1.442695, %v951_v36 }
 0xc46   :  { %3782 = vpow2.f32 %v3273_v37 }
 0xc48   :  { %1005 = vrot.lane.b32.xlu0 %v1003_v34, %s4158_s6 }
 0xc50   :  { %v3783_v38 = vpop.eup %3782 }
 0xc51   :  { %v955_v40 = vadd.f32 1.0, %v3783_v38 }
 0xc53   :  { %3784 = vrcp.f32 %v955_v40 }
 0xc5d   :  { %v3785_v44 = vpop.eup %3784 }
 0xc5e   :  { %v970_v60 = vsub.f32 1.0, %v3785_v44 }
 0xcb4   :  { %v983_v42 = vpop.permute.xlu1 %982 }
 0xcb5   :  { %v985_v43 = vadd.f32 %v983_v42, %v950_v41 }
 0xcb6   :  { %v961_v45 = vpop.permute.xlu0 %960 }
 0xcb7   :  { %v3274_v6 = vmul.f32 -1.442695, %v985_v43  ;;  %v963_v47 = vmul.f32 %v3785_v44, %v961_v45 }
 0xcb9   :  { %3786 = vpow2.f32 %v3274_v6  ;;  %965 = vrot.lane.b32.xlu1 %v963_v47, %s4156_s17 }
 0xcba   :  { %v1006_v51 = vpop.permute.xlu0 %1005 }
 0xcc3   :  { %v3787_v48 = vpop.eup %3786 }
 0xcc4   :  { %v989_v49 = vadd.f32 1.0, %v3787_v48 }
 0xcc6   :  { %3788 = vrcp.f32 %v989_v49 }
 0xcd0   :  { %v3789_v50 = vpop.eup %3788 }
 0xcd1   :  { %v1008_v52 = vmul.f32 %v3789_v50, %v1006_v51 }
 0xcd3   :  { %1010 = vrot.lane.b32.xlu0 %v1008_v52, %s4156_s17 }
 0xcd7   :  { %976 = vrot.lane.b32.xlu0 %v4563_v27, %s4157_s1 }
 0xd2b   :  { %v966_v53 = vpop.permute.xlu1 %965 }
 0xd2c   :  { %v968_v54 = vadd.f32 %v966_v53, %v949_v35 }
 0xd2e   :  { %3790 = vtanh.f32 %v968_v54 }
 0xd38   :  { %v3791_v55 = vpop.eup %3790 }
 0xd39   :  { %972 = vrot.lane.b32.xlu1 %v3791_v55, %s4158_s6 }
 0xd3d   :  { %993 = vrot.lane.b32.xlu1 %v946_v32, %s4157_s1 }
 0xd45   :  { %v1011_v56 = vpop.permute.xlu0 %1010 }
 0xd46   :  { %v1013_v57 = vadd.f32 %v1011_v56, %v950_v41 }
 0xd48   :  { %3792 = vtanh.f32 %v1013_v57 }
 0xd49   :  { %v977_v59 = vpop.permute.xlu0 %976 }
 0xd4a   :  { %v979_v62 = vmul.f32 %v3785_v44, %v977_v59 }
 0xd52   :  { %v3793_v58 = vpop.eup %3792 }
 0xd53   :  { %1017 = vrot.lane.b32.xlu0 %v3793_v58, %s4158_s6 }
 0xdab   :  { %v973_v61 = vpop.permute.xlu1 %972 }
 0xdac   :  { %v975_v63 = vmul.f32 %v973_v61, %v970_v60 }
 0xdae   :  { %v980_v1 = vadd.f32 %v979_v62, %v975_v63 }
 0xdaf   :  { %v994_v2 = vpop.permute.xlu1 %993 }
 0xdb0   :  { %1024 = vrot.lane.b32.xlu1 %v980_v1, %s4158_s6  ;;  %v996_v3 = vadd.f32 %v994_v2, %v950_v41 }
 0xdb2   :  { %v3275_v4 = vmul.f32 -1.442695, %v996_v3 }
 0xdb4   :  { %3794 = vpow2.f32 %v3275_v4 }
 0xdbe   :  { %v3795_v5 = vpop.eup %3794 }
 0xdbf   :  { %v1000_v7 = vadd.f32 1.0, %v3795_v5 }
 0xdc1   :  { %3796 = vrcp.f32 %v1000_v7  ;;  %v4632_v7 = vld [vmem:[#allocation11] ss:$0 sm:$0xff] }
 0xdc5   :  { %v1018_v12 = vpop.permute.xlu0 %1017 }
 0xdcb   :  { %v3797_v8 = vpop.eup %3796 }
 0xdcc   :  { %v1015_v9 = vsub.f32 1.0, %v3797_v8  ;;  %v1021_v14 = vmul.f32 %v3797_v8, %v4563_v27 }
 0xdce   :  { %v1020_v13 = vmul.f32 %v1018_v12, %v1015_v9  ;;  %v1267_v9 = vld [vmem:[#allocation2 + $0xc] sm:$0x3] }
 0xdd0   :  { %v4589_v15 = vadd.f32 %v1021_v14, %v1020_v13 }
 0xe22   :  { %v1025_v17 = vpop.permute.xlu1 %1024 }
 0xe23   :  { %1027 = vst.msk [vmem:[#allocation4 + $0x8] sm:$0x3] %vm389_vm1, %v1025_v17  ;;  %v4594_v19 = vsel %vm396_vm2, %v1025_v17, %v4589_v15 }
 0xe24   :  { %3276 = vmatmul.mubr.msk.f32.vlgmr.msra.gmra.mrb[4].mxu1 %vm236_vm3, %v4594_v19 }
 0xe25   :  { %3520 = vmatpush1.bf16.msra.mxu1 %v4357_v10  ;;  %1419 = vmatprep.mubr.f32.mxu1 %v4153_v0 }
 0xe26   :  { %3522 = vmatprep.subr.bf16.mxu1 %v4359_v11 }
 0xe29   :  { %3524 = vmatpush1.bf16.msra.mxu1 %v4376_v16  ;;  %v1108_v16 = vld [vmem:[#allocation2 + $0xa] sm:$0x3] }
 0xe2a   :  { %3526 = vmatprep.subr.bf16.mxu1 %v4383_v18 }
 0xe2d   :  { %3528 = vmatpush1.bf16.msra.mxu1 %v4403_v24 }
 0xe2e   :  { %3530 = vmatprep.subr.bf16.mxu1 %v4407_v25 }
 0xe31   :  { %3532 = vmatpush1.bf16.msra.mxu1 %v4417_v28  ;;  %v1109_v28 = vld [vmem:[#allocation3 + $0x4] sm:$0x3] }
 0xef7   :  { %v1103_v21 = vpop.f32.mrb[4].mxu1 }
 0xef8   :  { %v1117_v22 = vadd.f32 %v1103_v21, %v4439_v30  ;;  %1141 = vrot.lane.b32.xlu1 %v1103_v21, %s4157_s1  ;;  %v1105_v10 = vpop.f32.mrb[5].mxu1  ;;  %v1110_v18 = vadd.f32 %v1108_v16, %v1103_v21 }
 0xef9   :  { %v1162_v11 = vadd.f32 %v4388_v20, %v1105_v10 }
 0xefa   :  { %1119 = vrot.lane.b32.xlu0 %v1117_v22, %s4156_s17  ;;  %v3277_v26 = vmul.f32 -1.442695, %v1110_v18 }
 0xefc   :  { %3798 = vpow2.f32 %v3277_v26 }
 0xefe   :  { %1164 = vrot.lane.b32.xlu0 %v1162_v11, %s4158_s6 }
 0xf06   :  { %v3799_v24 = vpop.eup %3798 }
 0xf07   :  { %v1114_v25 = vadd.f32 1.0, %v3799_v24 }
 0xf09   :  { %3800 = vrcp.f32 %v1114_v25 }
 0xf13   :  { %v3801_v31 = vpop.eup %3800 }
 0xf14   :  { %v1129_v48 = vsub.f32 1.0, %v3801_v31 }
 0xf6a   :  { %v1142_v27 = vpop.permute.xlu1 %1141 }
 0xf6b   :  { %v1144_v29 = vadd.f32 %v1142_v27, %v1109_v28 }
 0xf6c   :  { %v1120_v32 = vpop.permute.xlu0 %1119 }
 0xf6d   :  { %v3278_v34 = vmul.f32 -1.442695, %v1144_v29  ;;  %v1122_v35 = vmul.f32 %v3801_v31, %v1120_v32 }
 0xf6f   :  { %3802 = vpow2.f32 %v3278_v34  ;;  %1124 = vrot.lane.b32.xlu1 %v1122_v35, %s4156_s17 }
 0xf70   :  { %v1165_v38 = vpop.permute.xlu0 %1164 }
 0xf79   :  { %v3803_v20 = vpop.eup %3802 }
 0xf7a   :  { %v1148_v36 = vadd.f32 1.0, %v3803_v20 }
 0xf7c   :  { %3804 = vrcp.f32 %v1148_v36 }
 0xf86   :  { %v3805_v37 = vpop.eup %3804 }
 0xf87   :  { %v1167_v40 = vmul.f32 %v3805_v37, %v1165_v38 }
 0xf89   :  { %1169 = vrot.lane.b32.xlu0 %v1167_v40, %s4156_s17 }
 0xf8d   :  { %1135 = vrot.lane.b32.xlu0 %v4594_v19, %s4157_s1 }
 0xfe1   :  { %v1125_v41 = vpop.permute.xlu1 %1124 }
 0xfe2   :  { %v1127_v42 = vadd.f32 %v1125_v41, %v1108_v16 }
 0xfe4   :  { %3806 = vtanh.f32 %v1127_v42 }
 0xfee   :  { %v3807_v43 = vpop.eup %3806 }
 0xfef   :  { %1131 = vrot.lane.b32.xlu1 %v3807_v43, %s4158_s6 }
 0xff3   :  { %1152 = vrot.lane.b32.xlu1 %v1105_v10, %s4157_s1 }
 0xffb   :  { %v1170_v44 = vpop.permute.xlu0 %1169 }
 0xffc   :  { %v1172_v45 = vadd.f32 %v1170_v44, %v1109_v28 }
 0xffe   :  { %3808 = vtanh.f32 %v1172_v45 }
 0xfff   :  { %v1136_v47 = vpop.permute.xlu0 %1135 }
0x1000   :  { %v1138_v50 = vmul.f32 %v3801_v31, %v1136_v47 }
0x1008   :  { %v3809_v6 = vpop.eup %3808 }
0x1009   :  { %1176 = vrot.lane.b32.xlu0 %v3809_v6, %s4158_s6 }
0x1061   :  { %v1132_v49 = vpop.permute.xlu1 %1131 }
0x1062   :  { %v1134_v51 = vmul.f32 %v1132_v49, %v1129_v48 }
0x1064   :  { %v1139_v52 = vadd.f32 %v1138_v50, %v1134_v51 }
0x1065   :  { %v1153_v53 = vpop.permute.xlu1 %1152 }
0x1066   :  { %1183 = vrot.lane.b32.xlu1 %v1139_v52, %s4158_s6  ;;  %v1155_v54 = vadd.f32 %v1153_v53, %v1109_v28 }
0x1068   :  { %v3279_v55 = vmul.f32 -1.442695, %v1155_v54 }
0x106a   :  { %3810 = vpow2.f32 %v3279_v55 }
0x1074   :  { %v3811_v56 = vpop.eup %3810 }
0x1075   :  { %v1159_v57 = vadd.f32 1.0, %v3811_v56 }
0x1077   :  { %3812 = vrcp.f32 %v1159_v57 }
0x107b   :  { %v1177_v60 = vpop.permute.xlu0 %1176 }
0x1081   :  { %v3813_v58 = vpop.eup %3812 }
0x1082   :  { %v1174_v59 = vsub.f32 1.0, %v3813_v58  ;;  %v1180_v62 = vmul.f32 %v3813_v58, %v4594_v19  ;;  %v1268_v19 = vld [vmem:[#allocation3 + $0x2] sm:$0x3] }
0x1084   :  { %v1179_v61 = vmul.f32 %v1177_v60, %v1174_v59  ;;  %v1426_v60 = vld [vmem:[#allocation2 + $0xe] sm:$0x3] }
0x1086   :  { %v4620_v63 = vadd.f32 %v1180_v62, %v1179_v61 }
0x10d8   :  { %v1184_v1 = vpop.permute.xlu1 %1183 }
0x10d9   :  { %1186 = vst.msk [vmem:[#allocation4 + $0xa] sm:$0x3] %vm389_vm1, %v1184_v1  ;;  %v4625_v2 = vsel %vm396_vm2, %v1184_v1, %v4620_v63 }
0x10da   :  { %3280 = vmatmul.mubr.msk.f32.vlgmr.msra.gmra.mrb[6].mxu0 %vm236_vm3, %v4625_v2 }
0x11ad   :  { %v1262_v3 = vpop.f32.mrb[6].mxu0 }
0x11ae   :  { %v1276_v4 = vadd.f32 %v1262_v3, %v4439_v30  ;;  %1300 = vrot.lane.b32.xlu1 %v1262_v3, %s4157_s1  ;;  %v1264_v5 = vpop.f32.mrb[7].mxu0  ;;  %v1269_v12 = vadd.f32 %v1267_v9, %v1262_v3  ;;  %v1427_v3 = vld [vmem:[#allocation3] sm:$0x3] }
0x11af   :  { %v1321_v8 = vadd.f32 %v4632_v7, %v1264_v5 }
0x11b0   :  { %1278 = vrot.lane.b32.xlu0 %v1276_v4, %s4156_s17  ;;  %v3281_v13 = vmul.f32 -1.442695, %v1269_v12 }
0x11b2   :  { %3814 = vpow2.f32 %v3281_v13 }
0x11b4   :  { %1323 = vrot.lane.b32.xlu0 %v1321_v8, %s4158_s6 }
0x11bc   :  { %v3815_v14 = vpop.eup %3814 }
0x11bd   :  { %v1273_v17 = vadd.f32 1.0, %v3815_v14 }
0x11bf   :  { %3816 = vrcp.f32 %v1273_v17 }
0x11c9   :  { %v3817_v10 = vpop.eup %3816 }
0x11ca   :  { %v1288_v37 = vsub.f32 1.0, %v3817_v10 }
0x1220   :  { %v1301_v21 = vpop.permute.xlu1 %1300 }
0x1221   :  { %v1303_v22 = vadd.f32 %v1301_v21, %v1268_v19 }
0x1222   :  { %v1279_v11 = vpop.permute.xlu0 %1278 }
0x1223   :  { %v3282_v16 = vmul.f32 -1.442695, %v1303_v22  ;;  %v1281_v18 = vmul.f32 %v3817_v10, %v1279_v11 }
0x1225   :  { %3818 = vpow2.f32 %v3282_v16  ;;  %1283 = vrot.lane.b32.xlu1 %v1281_v18, %s4156_s17 }
0x1226   :  { %v1324_v28 = vpop.permute.xlu0 %1323 }
0x122f   :  { %v3819_v26 = vpop.eup %3818 }
0x1230   :  { %v1307_v24 = vadd.f32 1.0, %v3819_v26 }
0x1232   :  { %3820 = vrcp.f32 %v1307_v24 }
0x123c   :  { %v3821_v25 = vpop.eup %3820 }
0x123d   :  { %v1326_v27 = vmul.f32 %v3821_v25, %v1324_v28 }
0x123f   :  { %1328 = vrot.lane.b32.xlu0 %v1326_v27, %s4156_s17 }
0x1243   :  { %1294 = vrot.lane.b32.xlu0 %v4625_v2, %s4157_s1 }
0x1297   :  { %v1284_v29 = vpop.permute.xlu1 %1283 }
0x1298   :  { %v1286_v31 = vadd.f32 %v1284_v29, %v1267_v9 }
0x129a   :  { %3822 = vtanh.f32 %v1286_v31  ;;  %v1518_v31 = vld [vmem:[#allocation13 + $0x20] sm:$0xff] }
0x12a4   :  { %v3823_v32 = vpop.eup %3822 }
0x12a5   :  { %1290 = vrot.lane.b32.xlu1 %v3823_v32, %s4158_s6 }
0x12a9   :  { %1311 = vrot.lane.b32.xlu1 %v1264_v5, %s4157_s1 }
0x12b1   :  { %v1329_v34 = vpop.permute.xlu0 %1328 }
0x12b2   :  { %v1331_v35 = vadd.f32 %v1329_v34, %v1268_v19  ;;  %v1697_v34 = vld [vmem:[%s5064_s8 + $0x20] sm:$0xff] }
0x12b4   :  { %3824 = vtanh.f32 %v1331_v35  ;;  %v1698_v35 = vld [vmem:[%s5064_s8 + $0x28] sm:$0xff] }
0x12b5   :  { %v1295_v36 = vpop.permute.xlu0 %1294 }
0x12b6   :  { %v1297_v40 = vmul.f32 %v3817_v10, %v1295_v36 }
0x12be   :  { %v3825_v20 = vpop.eup %3824 }
0x12bf   :  { %1335 = vrot.lane.b32.xlu0 %v3825_v20, %s4158_s6  ;;  %v3549_v20 = vpack.c.bf16 %v1698_v35, %v1697_v34  ;;  %v1876_v34 = vld [vmem:[#allocation16 + $0x60] sm:$0xff]  ;;  %v1878_v35 = vld [vmem:[#allocation16 + $0x70] sm:$0xff] }
0x12c1   :  { %3550 = vmatprep.subr.bf16.mxu1 %v3549_v20 }
0x1317   :  { %v1291_v38 = vpop.permute.xlu1 %1290 }
0x1318   :  { %v1293_v41 = vmul.f32 %v1291_v38, %v1288_v37  ;;  %v1520_v37 = vld [vmem:[#allocation13 + $0x30] sm:$0xff]  ;;  %v1521_v38 = vld [vmem:[#allocation13 + $0x38] sm:$0xff] }
0x131a   :  { %v1298_v42 = vadd.f32 %v1297_v40, %v1293_v41  ;;  %v3537_v40 = vpack.c.bf16 %v1521_v38, %v1520_v37  ;;  %v1699_v41 = vld [vmem:[%s5064_s8 + $0x30] sm:$0xff]  ;;  %v3297_v37 = vld [vmem:[%s5066_s10] ss:$0 sm:$0xff] }
0x131b   :  { %v1312_v43 = vpop.permute.xlu1 %1311 }
0x131c   :  { %1342 = vrot.lane.b32.xlu1 %v1298_v42, %s4158_s6  ;;  %v1314_v44 = vadd.f32 %v1312_v43, %v1268_v19  ;;  %v1700_v42 = vld [vmem:[%s5064_s8 + $0x38] sm:$0xff] }
0x131d   :  { %v3553_v43 = vpack.c.bf16 %v1700_v42, %v1699_v41 }
0x131e   :  { %v3283_v45 = vmul.f32 -1.442695, %v1314_v44 }
0x1320   :  { %3826 = vpow2.f32 %v3283_v45 }
0x132a   :  { %v3827_v6 = vpop.eup %3826 }
0x132b   :  { %v1318_v47 = vadd.f32 1.0, %v3827_v6  ;;  %v1514_v6 = vld [vmem:[#allocation13] sm:$0xff] }
0x132d   :  { %3828 = vrcp.f32 %v1318_v47  ;;  %v1515_v47 = vld [vmem:[#allocation13 + $0x8] sm:$0xff] }
0x1331   :  { %v1336_v50 = vpop.permute.xlu0 %1335 }
0x1337   :  { %v3829_v48 = vpop.eup %3828 }
0x1338   :  { %v1333_v49 = vsub.f32 1.0, %v3829_v48  ;;  %v1339_v52 = vmul.f32 %v3829_v48, %v4625_v2 }
0x133a   :  { %v1338_v51 = vmul.f32 %v1336_v50, %v1333_v49  ;;  %v3541_v50 = vpack.c.bf16 %v1515_v47, %v1514_v6 }
0x133c   :  { %v1340_v53 = vadd.f32 %v1339_v52, %v1338_v51  ;;  %v1693_v51 = vld [vmem:[%s5064_s8] sm:$0xff]  ;;  %v1694_v52 = vld [vmem:[%s5064_s8 + $0x8] sm:$0xff] }
0x138e   :  { %v1343_v54 = vpop.permute.xlu1 %1342 }
0x138f   :  { %1345 = vst.msk [vmem:[#allocation4 + $0xc] sm:$0x3] %vm389_vm1, %v1343_v54  ;;  %v4647_v55 = vsel %vm396_vm2, %v1343_v54, %v1340_v53 }
0x1390   :  { %3284 = vmatmul.mubr.msk.f32.vlgmr.msra.gmra.mrb[6].mxu1 %vm236_vm3, %v4647_v55 }
0x1391   :  { %3552 = vmatpush3.bf16.msra.mxu1 %v3549_v20  ;;  %v4759_v20 = vpack.c.bf16 %v1878_v35, %v1876_v34 }
0x1392   :  { %3554 = vmatprep.subr.bf16.mxu1 %v3553_v43 }
0x1395   :  { %3556 = vmatpush3.bf16.msra.mxu1 %v3553_v43 }
0x1463   :  { %v1421_v56 = vpop.f32.mrb[6].mxu1 }
0x1464   :  { %1459 = vrot.lane.b32.xlu0 %v1421_v56, %s4157_s1  ;;  %v1423_v57 = vpop.f32.mrb[7].mxu1  ;;  %v1435_v59 = vadd.f32 %v1421_v56, %v4439_v30  ;;  %v1428_v61 = vadd.f32 %v1426_v60, %v1421_v56  ;;  %v3557_v56 = vpack.c.bf16 %v1694_v52, %v1693_v51 }
0x1465   :  { %v1480_v58 = vadd.f32 %v4632_v7, %v1423_v57 }
0x1466   :  { %v3285_v62 = vmul.f32 -1.442695, %v1428_v61  ;;  %3558 = vmatprep.subr.bf16.mxu1 %v3557_v56 }
0x1467   :  { %1482 = vrot.lane.b32.xlu1 %v1480_v58, %s4158_s6 }
0x1468   :  { %1437 = vrot.lane.b32.xlu0 %v1435_v59, %s4156_s17  ;;  %3830 = vpow2.f32 %v3285_v62  ;;  %v4711_v62 = vld [vmem:[%s5068_s12] ss:$0 sm:$0xff] }
0x1472   :  { %v3831_v1 = vpop.eup %3830 }
0x1473   :  { %v1432_v2 = vadd.f32 1.0, %v3831_v1 }
0x1475   :  { %3832 = vrcp.f32 %v1432_v2 }
0x147f   :  { %v4656_v9 = vpop.eup %3832 }
0x14d6   :  { %v1460_v4 = vpop.permute.xlu0 %1459 }
0x14d7   :  { %v1462_v5 = vadd.f32 %v1460_v4, %v1427_v3  ;;  %v1516_v4 = vld [vmem:[#allocation13 + $0x10] sm:$0xff] }
0x14d9   :  { %v3286_v8 = vmul.f32 -1.442695, %v1462_v5  ;;  %v1483_v17 = vpop.permute.xlu1 %1482  ;;  %v1517_v5 = vld [vmem:[#allocation13 + $0x18] sm:$0xff] }
0x14da   :  { %v1438_v7 = vpop.permute.xlu0 %1437 }
0x14db   :  { %3834 = vpow2.f32 %v3286_v8  ;;  %v1440_v30 = vmul.f32 %v4656_v9, %v1438_v7  ;;  %v1695_v8 = vld [vmem:[%s5064_s8 + $0x10] sm:$0xff] }
0x14dd   :  { %1442 = vrot.lane.b32.xlu0 %v1440_v30, %s4156_s17  ;;  %v3545_v30 = vpack.c.bf16 %v1517_v5, %v1516_v4 }
0x14e5   :  { %v3835_v12 = vpop.eup %3834 }
0x14e6   :  { %v1466_v13 = vadd.f32 1.0, %v3835_v12 }
0x14e8   :  { %3836 = vrcp.f32 %v1466_v13  ;;  %v1865_v13 = vld [vmem:[#allocation16 + $0x8] sm:$0xff] }
0x14f2   :  { %v3837_v14 = vpop.eup %3836 }
0x14f3   :  { %v1485_v19 = vmul.f32 %v3837_v14, %v1483_v17  ;;  %v1867_v14 = vld [vmem:[#allocation16 + $0x18] sm:$0xff] }
0x14f4   :  { %v1510_v17 = vld [vmem:[#allocation4] sm:$0xff] }
0x14f5   :  { %1487 = vrot.lane.b32.xlu1 %v1485_v19, %s4156_s17  ;;  %v4730_v19 = vpack.c.bf16 %v1867_v14, %v1865_v13 }
0x14f9   :  { %1470 = vrot.lane.b32.xlu1 %v1423_v57, %s4157_s1 }
0x154f   :  { %v1443_v21 = vpop.permute.xlu0 %1442 }
0x1550   :  { %v1445_v22 = vadd.f32 %v1443_v21, %v1426_v60  ;;  %v1864_v21 = vld [vmem:[#allocation16] sm:$0xff] }
0x1552   :  { %3838 = vtanh.f32 %v1445_v22  ;;  %v1866_v22 = vld [vmem:[#allocation16 + $0x10] sm:$0xff] }
0x155c   :  { %v3839_v10 = vpop.eup %3838 }
0x155d   :  { %1449 = vrot.lane.b32.xlu1 %v3839_v10, %s4158_s6  ;;  %v1869_v10 = vld [vmem:[#allocation16 + $0x28] sm:$0xff] }
0x1561   :  { %1029 = vrot.lane.b32.xlu1 %v4589_v15, %s4158_s6 }
0x1565   :  { %1347 = vrot.lane.b32.xlu1 %v1340_v53, %s4158_s6  ;;  %v1447_v53 = vsub.f32 1.0, %v4656_v9 }
0x1567   :  { %v1488_v11 = vpop.permute.xlu1 %1487 }
0x1568   :  { %v1490_v16 = vadd.f32 %v1488_v11, %v1427_v3  ;;  %v1871_v11 = vld [vmem:[#allocation16 + $0x38] sm:$0xff] }
0x1569   :  { %392 = vrot.lane.b32.xlu1 %v4462_v46, %s4158_s6 }
0x156a   :  { %3840 = vtanh.f32 %v1490_v16  ;;  %v4732_v16 = vpack.c.bf16 %v1866_v22, %v1864_v21 }
0x156b   :  { %v1471_v15 = vpop.permute.xlu1 %1470 }
0x156c   :  { %v1473_v26 = vadd.f32 %v1471_v15, %v1427_v3  ;;  %v1868_v15 = vld [vmem:[#allocation16 + $0x20] sm:$0xff] }
0x156d   :  { %711 = vrot.lane.b32.xlu1 %v4526_v33, %s4158_s6 }
0x156e   :  { %v3287_v24 = vmul.f32 -1.442695, %v1473_v26  ;;  %v1870_v26 = vld [vmem:[#allocation16 + $0x30] sm:$0xff] }
0x1570   :  { %3842 = vpow2.f32 %v3287_v24 }
0x1574   :  { %v3841_v18 = vpop.eup %3840 }
0x1575   :  { %1494 = vrot.lane.b32.xlu0 %v3841_v18, %s4158_s6  ;;  %v4735_v18 = vpack.c.bf16 %v1871_v11, %v1869_v10 }
0x1579   :  { %1453 = vrot.lane.b32.xlu0 %v4647_v55, %s4157_s1 }
0x157a   :  { %v3843_v25 = vpop.eup %3842 }
0x157b   :  { %v1477_v33 = vadd.f32 1.0, %v3843_v25  ;;  %v1875_v25 = vld [vmem:[#allocation16 + $0x58] sm:$0xff] }
0x157d   :  { %1188 = vrot.lane.b32.xlu0 %v4620_v63, %s4158_s6  ;;  %3844 = vrcp.f32 %v1477_v33 }
0x1581   :  { %552 = vrot.lane.b32.xlu0 %v4494_v39, %s4158_s6  ;;  %v1519_v39 = vld [vmem:[#allocation13 + $0x28] sm:$0xff] }
0x1582   :  { %v3533_v32 = vpack.c.bf16 %v1519_v39, %v1518_v31  ;;  %v1879_v31 = vld [vmem:[#allocation16 + $0x78] sm:$0xff] }
0x1584   :  { %3534 = vmatprep.subr.bf16.mxu0 %v3533_v32 }
0x1585   :  { %3536 = vmatpush3.bf16.msra.mxu0 %v3533_v32 }
0x1586   :  { %3538 = vmatprep.subr.bf16.mxu0 %v3537_v40 }
0x1587   :  { %v3845_v36 = vpop.eup %3844 }
0x1588   :  { %v1492_v44 = vsub.f32 1.0, %v3845_v36  ;;  %v1498_v49 = vmul.f32 %v3845_v36, %v4647_v55  ;;  %v3292_v36 = vld [vmem:[#allocation14] ss:$0 sm:$0xff] }
0x1589   :  { %3540 = vmatpush3.bf16.msra.mxu0 %v3537_v40 }
0x158a   :  { %3542 = vmatprep.subr.bf16.mxu0 %v3541_v50 }
0x15cf   :  { %v1450_v46 = vpop.permute.xlu1 %1449 }
0x15d0   :  { %v1452_v58 = vmul.f32 %v1450_v46, %v1447_v53  ;;  %v1873_v46 = vld [vmem:[#allocation16 + $0x48] sm:$0xff] }
0x15d1   :  { %v4744_v33 = vpack.c.bf16 %v1875_v25, %v1873_v46 }
0x15d3   :  { %v1030_v28 = vpop.permute.xlu1 %1029 }
0x15d4   :  { %1032 = vst.msk [vmem:[#allocation5 + $0x6] sm:$0x3] %vm389_vm1, %v1030_v28  ;;  %v4741_v28 = vpack.c.bf16 %v1870_v26, %v1868_v15 }
0x15d7   :  { %v1348_v27 = vpop.permute.xlu1 %1347 }
0x15d8   :  { %1350 = vst.msk [vmem:[#allocation5 + $0x2] sm:$0x3] %vm389_vm1, %v1348_v27  ;;  %v1872_v27 = vld [vmem:[#allocation16 + $0x40] sm:$0xff] }
0x15db   :  { %v393_v29 = vpop.permute.xlu1 %392 }
0x15dc   :  { %395 = vst.msk [vmem:[#allocation5 + $0xe] sm:$0x3] %vm389_vm1, %v393_v29  ;;  %v1874_v29 = vld [vmem:[#allocation16 + $0x50] sm:$0xff] }
0x15dd   :  { %v4751_v39 = vpack.c.bf16 %v1874_v29, %v1872_v27 }
0x15df   :  { %v712_v63 = vpop.permute.xlu1 %711 }
0x15e0   :  { %714 = vst.msk [vmem:[#allocation5 + $0xa] sm:$0x3] %vm389_vm1, %v712_v63  ;;  %v1877_v63 = vld [vmem:[#allocation16 + $0x68] sm:$0xff] }
0x15e1   :  { %v4754_v32 = vpack.c.bf16 %v1879_v31, %v1877_v63 }
0x15e7   :  { %v1495_v45 = vpop.permute.xlu0 %1494 }
0x15e8   :  { %v1497_v48 = vmul.f32 %v1495_v45, %v1492_v44 }
0x15ea   :  { %v1499_v54 = vadd.f32 %v1498_v49, %v1497_v48 }
0x15eb   :  { %v1454_v57 = vpop.permute.xlu0 %1453 }
0x15ec   :  { %v1456_v59 = vmul.f32 %v4656_v9, %v1454_v57  ;;  %1506 = vrot.lane.b32.xlu0 %v1499_v54, %s4158_s6  ;;  %v1696_v9 = vld [vmem:[%s5064_s8 + $0x18] sm:$0xff] }
0x15ed   :  { %v3561_v12 = vpack.c.bf16 %v1696_v9, %v1695_v8 }
0x15ee   :  { %v1457_v55 = vadd.f32 %v1456_v59, %v1452_v58 }
0x15ef   :  { %v1189_v60 = vpop.permute.xlu0 %1188 }
0x15f0   :  { %1191 = vst.msk [vmem:[#allocation5 + $0x4] sm:$0x3] %vm389_vm1, %v1189_v60  ;;  %870 = vrot.lane.b32.xlu0 %v4558_v23, %s4158_s6  ;;  %1501 = vrot.lane.b32.xlu1 %v1457_v55, %s4158_s6 }
0x15f3   :  { %v553_v61 = vpop.permute.xlu0 %552 }
0x15f4   :  { %555 = vst.msk [vmem:[#allocation5 + $0xc] sm:$0x3] %vm389_vm1, %v553_v61  ;;  %1967 = vrot.lane.b32.xlu0 %v4711_v62, %s4156_s17 }
0x165e   :  { %v1507_v1 = vpop.permute.xlu0 %1506 }
0x165f   :  { %1509 = vst.msk [vmem:[#allocation5] sm:$0x3] %vm389_vm1, %v1507_v1 }
0x1662   :  { %v871_v2 = vpop.permute.xlu0 %870  ;;  %v1502_v3 = vpop.permute.xlu1 %1501 }
0x1663   :  { %873 = vst.msk [vmem:[#allocation5 + $0x8] sm:$0x3] %vm389_vm1, %v871_v2  ;;  %1504 = vst.msk [vmem:[#allocation4 + $0xe] sm:$0x3] %vm389_vm1, %v1502_v3 }
0x1666   :  { %v1512_v23 = vld [vmem:[#allocation5] sm:$0xff]  ;;  %v4785_v47 = vpop.permute.xlu0 %1967 }
0x1667   :  { %3369 = vmatprep.mubr.msk.f32.mxu0 %vm396_vm2, %v1512_v23  ;;  %3391 = vmatprep.mubr.msk.f32.mxu1 %vm396_vm2, %v1512_v23 }
0x166a   :  { %v1513_v7 = vld [vmem:[#allocation5 + $0x8] sm:$0xff]  ;;  %v1511_v24 = vld [vmem:[#allocation4 + $0x8] sm:$0xff] }
0x166b   :  { %3370 = vmatmul.mubr.msk.f32.vlgmr.msra.gmra.mrb[8].mxu0 %vm396_vm2, %v1513_v7  ;;  %3392 = vmatmul.mubr.msk.f32.vlgmr.msra.gmra.mrb[8].mxu1 %vm396_vm2, %v1513_v7 }
0x166c   :  { %3544 = vmatpush3.bf16.msra.mxu0 %v3541_v50  ;;  %3380 = vmatprep.mubr.msk.f32.mxu0 %vm396_vm2, %v1510_v17 }
0x166d   :  { %3560 = vmatpush3.bf16.msra.mxu1 %v3557_v56  ;;  %3402 = vmatprep.mubr.msk.f32.mxu1 %vm396_vm2, %v1510_v17 }
0x166e   :  { %3546 = vmatprep.subr.bf16.mxu0 %v3545_v30  ;;  %3562 = vmatprep.subr.bf16.mxu1 %v3561_v12 }
0x1670   :  { %3548 = vmatpush3.bf16.msra.mxu0 %v3545_v30 }
0x1671   :  { %3564 = vmatpush3.bf16.msra.mxu1 %v3561_v12  ;;  %3566 = vmatprep.subr.bf16.mxu0 %v4730_v19 }
0x1672   :  { %3582 = vmatprep.subr.bf16.mxu1 %v4730_v19 }
0x1673   :  { %3381 = vmatmul.mubr.msk.f32.vlgmr.msra.gmra.mrb[8].mxu0 %vm396_vm2, %v1511_v24 }
0x1674   :  { %3403 = vmatmul.mubr.msk.f32.vlgmr.msra.gmra.mrb[8].mxu1 %vm396_vm2, %v1511_v24  ;;  %3568 = vmatpush1.bf16.msra.mxu0 %v4732_v16 }
0x1675   :  { %3570 = vmatprep.subr.bf16.mxu0 %v4735_v18  ;;  %1951 = vmatprep.mubr.f32.mxu0 %v4153_v0 }
0x1676   :  { %3584 = vmatpush1.bf16.msra.mxu1 %v4732_v16  ;;  %2110 = vmatprep.mubr.f32.mxu1 %v4153_v0 }
0x1677   :  { %3586 = vmatprep.subr.bf16.mxu1 %v4735_v18 }
0x1678   :  { %3572 = vmatpush1.bf16.msra.mxu0 %v4741_v28 }
0x1679   :  { %3574 = vmatprep.subr.bf16.mxu0 %v4744_v33 }
0x167a   :  { %3588 = vmatpush1.bf16.msra.mxu1 %v4741_v28 }
0x167b   :  { %3590 = vmatprep.subr.bf16.mxu1 %v4744_v33 }
0x167c   :  { %3576 = vmatpush1.bf16.msra.mxu0 %v4751_v39 }
0x167d   :  { %3578 = vmatprep.subr.bf16.mxu0 %v4754_v32 }
0x167e   :  { %3592 = vmatpush1.bf16.msra.mxu1 %v4751_v39 }
0x167f   :  { %3594 = vmatprep.subr.bf16.mxu1 %v4754_v32 }
0x1680   :  { %3580 = vmatpush1.bf16.msra.mxu0 %v4759_v20 }
0x1681   :  { %3598 = vmatprep.subr.bf16.mxu0 %v4730_v19 }
0x1682   :  { %3596 = vmatpush1.bf16.msra.mxu1 %v4759_v20 }
0x1683   :  { %1952 = vmatmul.mubr.f32.vlgmr.msra.gmra.mrb[10].mxu0 %v4153_v0  ;;  %3614 = vmatprep.subr.bf16.mxu1 %v4730_v19 }
0x1684   :  { %3600 = vmatpush1.bf16.msra.mxu0 %v4732_v16  ;;  %2269 = vmatprep.mubr.f32.mxu0 %v4153_v0 }
0x1685   :  { %3602 = vmatprep.subr.bf16.mxu0 %v4735_v18 }
0x1688   :  { %3604 = vmatpush1.bf16.msra.mxu0 %v4741_v28 }
0x1689   :  { %3606 = vmatprep.subr.bf16.mxu0 %v4744_v33 }
0x168c   :  { %3608 = vmatpush1.bf16.msra.mxu0 %v4751_v39 }
0x168d   :  { %3610 = vmatprep.subr.bf16.mxu0 %v4754_v32 }
0x1690   :  { %3612 = vmatpush1.bf16.msra.mxu0 %v4759_v20 }
0x1691   :  { %3630 = vmatprep.subr.bf16.mxu0 %v4730_v19 }
0x1746   :  { %v3382_v38 = vpop.f32.mrb[8].mxu0 }
0x1747   :  { %v1692_v40 = vadd.f32 %v3382_v38, %v3292_v36  ;;  %v3404_v41 = vpop.f32.mrb[8].mxu1  ;;  %v1675_v42 = vpop.f32.mrb[9].mxu0 }
0x1748   :  { %v1859_v43 = vadd.f32 %v3404_v41, %v3297_v37  ;;  %v1691_v44 = vadd.f32 %v3292_v36, %v1675_v42  ;;  %v1842_v45 = vpop.f32.mrb[9].mxu1 }
0x1749   :  { %1861 = vst.msk [vmem:[#allocation2 + $0x8] sm:$0xff] %vm183_vm0, %v1692_v40  ;;  %v1858_v6 = vadd.f32 %v3297_v37, %v1842_v45 }
0x174a   :  { %1863 = vst.msk [vmem:[#allocation3 + $0x8] sm:$0xff] %vm183_vm0, %v1859_v43  ;;  %1860 = vst.msk [vmem:[#allocation2] sm:$0xff] %vm183_vm0, %v1691_v44 }
0x174b   :  { %1862 = vst.msk [vmem:[#allocation3] sm:$0xff] %vm183_vm0, %v1858_v6 }
0x1751   :  { %v1958_v52 = vld [vmem:[#allocation2] sm:$0x3]  ;;  %v1959_v58 = vld [vmem:[#allocation3 + $0xe] sm:$0x3]  ;;  %v2117_v43 = vld [vmem:[#allocation2 + $0x2] sm:$0x3] }
0x1756   :  { %v1953_v48 = vpop.f32.mrb[10].mxu0 }
0x1757   :  { %v1970_v49 = vadd.f32 %v4785_v47, %v1953_v48  ;;  %1991 = vrot.lane.b32.xlu0 %v1953_v48, %s4157_s1  ;;  %v1955_v50 = vpop.f32.mrb[11].mxu0  ;;  %v1960_v53 = vadd.f32 %v1958_v52, %v1953_v48 }
0x1758   :  { %v2012_v51 = vadd.f32 %v4711_v62, %v1955_v50 }
0x1759   :  { %1972 = vrot.lane.b32.xlu1 %v1970_v49, %s4156_s17  ;;  %v3299_v54 = vmul.f32 -1.442695, %v1960_v53  ;;  %v2118_v49 = vld [vmem:[#allocation3 + $0xc] sm:$0x3] }
0x175b   :  { %3846 = vpow2.f32 %v3299_v54 }
0x175d   :  { %2014 = vrot.lane.b32.xlu1 %v2012_v51, %s4158_s6 }
0x1765   :  { %v3847_v56 = vpop.eup %3846 }
0x1766   :  { %v1964_v57 = vadd.f32 1.0, %v3847_v56 }
0x1768   :  { %3848 = vrcp.f32 %v1964_v57 }
0x1772   :  { %v3849_v60 = vpop.eup %3848 }
0x1773   :  { %v1982_v17 = vsub.f32 1.0, %v3849_v60  ;;  %v1988_v22 = vmul.f32 0.0, %v3849_v60 }
0x17c9   :  { %v1992_v59 = vpop.permute.xlu0 %1991 }
0x17ca   :  { %v1994_v55 = vadd.f32 %v1992_v59, %v1959_v58 }
0x17cb   :  { %v1973_v61 = vpop.permute.xlu1 %1972 }
0x17cc   :  { %v3300_v1 = vmul.f32 -1.442695, %v1994_v55  ;;  %v1975_v2 = vmul.f32 %v3849_v60, %v1973_v61 }
0x17ce   :  { %3850 = vpow2.f32 %v3300_v1  ;;  %1977 = vrot.lane.b32.xlu0 %v1975_v2, %s4156_s17 }
0x17cf   :  { %v2015_v5 = vpop.permute.xlu1 %2014 }
0x17d8   :  { %v3851_v3 = vpop.eup %3850 }
0x17d9   :  { %v1998_v23 = vadd.f32 1.0, %v3851_v3 }
0x17db   :  { %3852 = vrcp.f32 %v1998_v23 }
0x17e5   :  { %v3853_v4 = vpop.eup %3852 }
0x17e6   :  { %v2017_v8 = vmul.f32 %v3853_v4, %v2015_v5 }
0x17e8   :  { %2019 = vrot.lane.b32.xlu1 %v2017_v8, %s4156_s17 }
0x17ec   :  { %2002 = vrot.lane.b32.xlu1 %v1955_v50, %s4157_s1 }
0x1840   :  { %v1978_v9 = vpop.permute.xlu0 %1977 }
0x1841   :  { %v1980_v7 = vadd.f32 %v1978_v9, %v1958_v52 }
0x1843   :  { %3854 = vtanh.f32 %v1980_v7 }
0x184d   :  { %v3855_v30 = vpop.eup %3854 }
0x184e   :  { %1984 = vrot.lane.b32.xlu0 %v3855_v30, %s4158_s6 }
0x185a   :  { %v2020_v12 = vpop.permute.xlu1 %2019 }
0x185b   :  { %v2022_v13 = vadd.f32 %v2020_v12, %v1959_v58 }
0x185d   :  { %3856 = vtanh.f32 %v2022_v13 }
0x185e   :  { %v2003_v15 = vpop.permute.xlu1 %2002 }
0x185f   :  { %v2005_v26 = vadd.f32 %v2003_v15, %v1959_v58 }
0x1861   :  { %v3301_v24 = vmul.f32 -1.442695, %v2005_v26 }
0x1863   :  { %3858 = vpow2.f32 %v3301_v24 }
0x1867   :  { %v3857_v14 = vpop.eup %3856 }
0x1868   :  { %2026 = vrot.lane.b32.xlu0 %v3857_v14, %s4158_s6 }
0x186d   :  { %v3859_v46 = vpop.eup %3858 }
0x186e   :  { %v2009_v25 = vadd.f32 1.0, %v3859_v46 }
0x1870   :  { %3860 = vrcp.f32 %v2009_v25 }
0x187a   :  { %v3861_v27 = vpop.eup %3860 }
0x187b   :  { %v2024_v63 = vsub.f32 1.0, %v3861_v27  ;;  %v2030_v34 = vmul.f32 0.0, %v3861_v27 }
0x18c0   :  { %v1985_v21 = vpop.permute.xlu0 %1984 }
0x18c1   :  { %v1987_v10 = vmul.f32 %v1985_v21, %v1982_v17 }
0x18c3   :  { %v1989_v11 = vadd.f32 %v1988_v22, %v1987_v10 }
0x18c5   :  { %2033 = vrot.lane.b32.xlu1 %v1989_v11, %s4158_s6 }
0x18da   :  { %v2027_v29 = vpop.permute.xlu0 %2026 }
0x18db   :  { %v2029_v31 = vmul.f32 %v2027_v29, %v2024_v63 }
0x18dd   :  { %v4798_v35 = vadd.f32 %v2030_v34, %v2029_v31 }
0x1937   :  { %v2034_v36 = vpop.permute.xlu1 %2033 }
0x1938   :  { %2036 = vst.msk [vmem:[#allocation4] sm:$0x3] %vm389_vm1, %v2034_v36  ;;  %v4803_v37 = vsel %vm396_vm2, %v2034_v36, %v4798_v35  ;;  %v2276_v36 = vld [vmem:[#allocation2 + $0x4] sm:$0x3] }
0x1939   :  { %3302 = vmatmul.mubr.msk.f32.vlgmr.msra.gmra.mrb[10].mxu1 %vm236_vm3, %v4803_v37 }
0x193a   :  { %3616 = vmatpush1.bf16.msra.mxu1 %v4732_v16  ;;  %2428 = vmatprep.mubr.f32.mxu1 %v4153_v0 }
0x193b   :  { %3618 = vmatprep.subr.bf16.mxu1 %v4735_v18 }
0x193e   :  { %3620 = vmatpush1.bf16.msra.mxu1 %v4741_v28 }
0x193f   :  { %3622 = vmatprep.subr.bf16.mxu1 %v4744_v33 }
0x1942   :  { %3624 = vmatpush1.bf16.msra.mxu1 %v4751_v39 }
0x1943   :  { %3626 = vmatprep.subr.bf16.mxu1 %v4754_v32 }
0x1946   :  { %3628 = vmatpush1.bf16.msra.mxu1 %v4759_v20 }
0x1947   :  { %3646 = vmatprep.subr.bf16.mxu1 %v4730_v19 }
0x1a0c   :  { %v2112_v38 = vpop.f32.mrb[10].mxu1 }
0x1a0d   :  { %v2126_v40 = vadd.f32 %v2112_v38, %v4785_v47  ;;  %2150 = vrot.lane.b32.xlu1 %v2112_v38, %s4157_s1  ;;  %v2114_v41 = vpop.f32.mrb[11].mxu1  ;;  %v2119_v44 = vadd.f32 %v2117_v43, %v2112_v38 }
0x1a0e   :  { %v2171_v42 = vadd.f32 %v4711_v62, %v2114_v41 }
0x1a0f   :  { %2128 = vrot.lane.b32.xlu0 %v2126_v40, %s4156_s17  ;;  %v3303_v45 = vmul.f32 -1.442695, %v2119_v44 }
0x1a11   :  { %3862 = vpow2.f32 %v3303_v45 }
0x1a13   :  { %2173 = vrot.lane.b32.xlu0 %v2171_v42, %s4158_s6  ;;  %v2277_v42 = vld [vmem:[#allocation3 + $0xa] sm:$0x3] }
0x1a1b   :  { %v3863_v6 = vpop.eup %3862 }
0x1a1c   :  { %v2123_v48 = vadd.f32 1.0, %v3863_v6 }
0x1a1e   :  { %3864 = vrcp.f32 %v2123_v48 }
0x1a28   :  { %v3865_v52 = vpop.eup %3864 }
0x1a29   :  { %v2138_v8 = vsub.f32 1.0, %v3865_v52 }
0x1a7f   :  { %v2151_v50 = vpop.permute.xlu1 %2150 }
0x1a80   :  { %v2153_v51 = vadd.f32 %v2151_v50, %v2118_v49 }
0x1a81   :  { %v2129_v53 = vpop.permute.xlu0 %2128 }
0x1a82   :  { %v3304_v54 = vmul.f32 -1.442695, %v2153_v51  ;;  %v2131_v56 = vmul.f32 %v3865_v52, %v2129_v53 }
0x1a84   :  { %3866 = vpow2.f32 %v3304_v54  ;;  %2133 = vrot.lane.b32.xlu1 %v2131_v56, %s4156_s17 }
0x1a85   :  { %v2174_v55 = vpop.permute.xlu0 %2173 }
0x1a8e   :  { %v3867_v57 = vpop.eup %3866 }
0x1a8f   :  { %v2157_v58 = vadd.f32 1.0, %v3867_v57 }
0x1a91   :  { %3868 = vrcp.f32 %v2157_v58 }
0x1a9b   :  { %v3869_v59 = vpop.eup %3868 }
0x1a9c   :  { %v2176_v60 = vmul.f32 %v3869_v59, %v2174_v55 }
0x1a9e   :  { %2178 = vrot.lane.b32.xlu0 %v2176_v60, %s4156_s17 }
0x1aa2   :  { %2144 = vrot.lane.b32.xlu0 %v4803_v37, %s4157_s1 }
0x1af6   :  { %v2134_v61 = vpop.permute.xlu1 %2133 }
0x1af7   :  { %v2136_v1 = vadd.f32 %v2134_v61, %v2117_v43 }
0x1af9   :  { %3870 = vtanh.f32 %v2136_v1 }
0x1b03   :  { %v3871_v2 = vpop.eup %3870 }
0x1b04   :  { %2140 = vrot.lane.b32.xlu1 %v3871_v2, %s4158_s6 }
0x1b08   :  { %2161 = vrot.lane.b32.xlu1 %v2114_v41, %s4157_s1 }
0x1b10   :  { %v2179_v3 = vpop.permute.xlu0 %2178 }
0x1b11   :  { %v2181_v23 = vadd.f32 %v2179_v3, %v2118_v49 }
0x1b13   :  { %3872 = vtanh.f32 %v2181_v23 }
0x1b14   :  { %v2145_v5 = vpop.permute.xlu0 %2144 }
0x1b15   :  { %v2147_v7 = vmul.f32 %v3865_v52, %v2145_v5 }
0x1b1d   :  { %v3873_v4 = vpop.eup %3872 }
0x1b1e   :  { %2185 = vrot.lane.b32.xlu0 %v3873_v4, %s4158_s6 }
0x1b76   :  { %v2141_v9 = vpop.permute.xlu1 %2140 }
0x1b77   :  { %v2143_v30 = vmul.f32 %v2141_v9, %v2138_v8 }
0x1b79   :  { %v2148_v12 = vadd.f32 %v2147_v7, %v2143_v30 }
0x1b7a   :  { %v2162_v13 = vpop.permute.xlu1 %2161 }
0x1b7b   :  { %2192 = vrot.lane.b32.xlu1 %v2148_v12, %s4158_s6  ;;  %v2164_v14 = vadd.f32 %v2162_v13, %v2118_v49 }
0x1b7d   :  { %v3305_v17 = vmul.f32 -1.442695, %v2164_v14 }
0x1b7f   :  { %3874 = vpow2.f32 %v3305_v17 }
0x1b89   :  { %v3875_v21 = vpop.eup %3874 }
0x1b8a   :  { %v2168_v22 = vadd.f32 1.0, %v3875_v21 }
0x1b8c   :  { %3876 = vrcp.f32 %v2168_v22 }
0x1b90   :  { %v2186_v15 = vpop.permute.xlu0 %2185 }
0x1b96   :  { %v3877_v10 = vpop.eup %3876 }
0x1b97   :  { %v2183_v11 = vsub.f32 1.0, %v3877_v10  ;;  %v2189_v24 = vmul.f32 %v3877_v10, %v4803_v37 }
0x1b99   :  { %v2188_v26 = vmul.f32 %v2186_v15, %v2183_v11 }
0x1b9b   :  { %v4830_v46 = vadd.f32 %v2189_v24, %v2188_v26 }
0x1bed   :  { %v2193_v25 = vpop.permute.xlu1 %2192 }
0x1bee   :  { %2195 = vst.msk [vmem:[#allocation4 + $0x2] sm:$0x3] %vm389_vm1, %v2193_v25  ;;  %v4835_v27 = vsel %vm396_vm2, %v2193_v25, %v4830_v46 }
0x1bef   :  { %3306 = vmatmul.mubr.msk.f32.vlgmr.msra.gmra.mrb[12].mxu0 %vm236_vm3, %v4835_v27 }
0x1bf0   :  { %3632 = vmatpush1.bf16.msra.mxu0 %v4732_v16  ;;  %2587 = vmatprep.mubr.f32.mxu0 %v4153_v0 }
0x1bf1   :  { %3634 = vmatprep.subr.bf16.mxu0 %v4735_v18 }
0x1bf4   :  { %3636 = vmatpush1.bf16.msra.mxu0 %v4741_v28 }
0x1bf5   :  { %3638 = vmatprep.subr.bf16.mxu0 %v4744_v33 }
0x1bf8   :  { %3640 = vmatpush1.bf16.msra.mxu0 %v4751_v39 }
0x1bf9   :  { %3642 = vmatprep.subr.bf16.mxu0 %v4754_v32 }
0x1bfc   :  { %3644 = vmatpush1.bf16.msra.mxu0 %v4759_v20 }
0x1bfd   :  { %3662 = vmatprep.subr.bf16.mxu0 %v4730_v19 }
0x1cc2   :  { %v2271_v29 = vpop.f32.mrb[12].mxu0 }
0x1cc3   :  { %v2285_v63 = vadd.f32 %v2271_v29, %v4785_v47  ;;  %2309 = vrot.lane.b32.xlu1 %v2271_v29, %s4157_s1  ;;  %v2273_v31 = vpop.f32.mrb[13].mxu0  ;;  %v2278_v37 = vadd.f32 %v2276_v36, %v2271_v29 }
0x1cc4   :  { %v2330_v34 = vadd.f32 %v4711_v62, %v2273_v31 }
0x1cc5   :  { %2287 = vrot.lane.b32.xlu0 %v2285_v63, %s4156_s17  ;;  %v3307_v38 = vmul.f32 -1.442695, %v2278_v37 }
0x1cc7   :  { %3878 = vpow2.f32 %v3307_v38 }
0x1cc9   :  { %2332 = vrot.lane.b32.xlu0 %v2330_v34, %s4158_s6 }
0x1cd1   :  { %v3879_v40 = vpop.eup %3878 }
0x1cd2   :  { %v2282_v41 = vadd.f32 1.0, %v3879_v40 }
0x1cd4   :  { %3880 = vrcp.f32 %v2282_v41 }
0x1cde   :  { %v3881_v45 = vpop.eup %3880 }
0x1cdf   :  { %v2297_v1 = vsub.f32 1.0, %v3881_v45 }
0x1d35   :  { %v2310_v43 = vpop.permute.xlu1 %2309 }
0x1d36   :  { %v2312_v44 = vadd.f32 %v2310_v43, %v2277_v42 }
0x1d37   :  { %v2288_v6 = vpop.permute.xlu0 %2287 }
0x1d38   :  { %v3308_v48 = vmul.f32 -1.442695, %v2312_v44  ;;  %v2290_v49 = vmul.f32 %v3881_v45, %v2288_v6 }
0x1d3a   :  { %3882 = vpow2.f32 %v3308_v48  ;;  %2292 = vrot.lane.b32.xlu1 %v2290_v49, %s4156_s17 }
0x1d3b   :  { %v2333_v53 = vpop.permute.xlu0 %2332 }
0x1d44   :  { %v3883_v50 = vpop.eup %3882 }
0x1d45   :  { %v2316_v51 = vadd.f32 1.0, %v3883_v50 }
0x1d47   :  { %3884 = vrcp.f32 %v2316_v51 }
0x1d51   :  { %v3885_v52 = vpop.eup %3884 }
0x1d52   :  { %v2335_v54 = vmul.f32 %v3885_v52, %v2333_v53 }
0x1d54   :  { %2337 = vrot.lane.b32.xlu0 %v2335_v54, %s4156_s17 }
0x1d58   :  { %2303 = vrot.lane.b32.xlu0 %v4835_v27, %s4157_s1 }
0x1dac   :  { %v2293_v56 = vpop.permute.xlu1 %2292 }
0x1dad   :  { %v2295_v57 = vadd.f32 %v2293_v56, %v2276_v36 }
0x1daf   :  { %3886 = vtanh.f32 %v2295_v57 }
0x1db9   :  { %v3887_v58 = vpop.eup %3886 }
0x1dba   :  { %2299 = vrot.lane.b32.xlu1 %v3887_v58, %s4158_s6 }
0x1dbe   :  { %2320 = vrot.lane.b32.xlu1 %v2273_v31, %s4157_s1 }
0x1dc6   :  { %v2338_v59 = vpop.permute.xlu0 %2337 }
0x1dc7   :  { %v2340_v55 = vadd.f32 %v2338_v59, %v2277_v42 }
0x1dc9   :  { %3888 = vtanh.f32 %v2340_v55 }
0x1dca   :  { %v2304_v61 = vpop.permute.xlu0 %2303 }
0x1dcb   :  { %v2306_v3 = vmul.f32 %v3881_v45, %v2304_v61 }
0x1dd3   :  { %v3889_v60 = vpop.eup %3888 }
0x1dd4   :  { %2344 = vrot.lane.b32.xlu0 %v3889_v60, %s4158_s6 }
0x1e2c   :  { %v2300_v2 = vpop.permute.xlu1 %2299 }
0x1e2d   :  { %v2302_v23 = vmul.f32 %v2300_v2, %v2297_v1 }
0x1e2f   :  { %v2307_v4 = vadd.f32 %v2306_v3, %v2302_v23 }
0x1e30   :  { %v2321_v5 = vpop.permute.xlu1 %2320 }
0x1e31   :  { %2351 = vrot.lane.b32.xlu1 %v2307_v4, %s4158_s6  ;;  %v2323_v8 = vadd.f32 %v2321_v5, %v2277_v42 }
0x1e33   :  { %v3309_v9 = vmul.f32 -1.442695, %v2323_v8 }
0x1e35   :  { %3890 = vpow2.f32 %v3309_v9 }
0x1e3f   :  { %v3891_v7 = vpop.eup %3890 }
0x1e40   :  { %v2327_v30 = vadd.f32 1.0, %v3891_v7 }
0x1e42   :  { %3892 = vrcp.f32 %v2327_v30 }
0x1e46   :  { %v2345_v14 = vpop.permute.xlu0 %2344 }
0x1e4c   :  { %v3893_v12 = vpop.eup %3892 }
0x1e4d   :  { %v2342_v13 = vsub.f32 1.0, %v3893_v12  ;;  %v2348_v21 = vmul.f32 %v3893_v12, %v4835_v27  ;;  %v2435_v27 = vld [vmem:[#allocation2 + $0x6] sm:$0x3] }
0x1e4f   :  { %v2347_v17 = vmul.f32 %v2345_v14, %v2342_v13 }
0x1e51   :  { %v4862_v22 = vadd.f32 %v2348_v21, %v2347_v17 }
0x1ea3   :  { %v2352_v10 = vpop.permute.xlu1 %2351 }
0x1ea4   :  { %2354 = vst.msk [vmem:[#allocation4 + $0x4] sm:$0x3] %vm389_vm1, %v2352_v10  ;;  %v4867_v11 = vsel %vm396_vm2, %v2352_v10, %v4862_v22 }
0x1ea5   :  { %3310 = vmatmul.mubr.msk.f32.vlgmr.msra.gmra.mrb[12].mxu1 %vm236_vm3, %v4867_v11 }
0x1ea6   :  { %3648 = vmatpush1.bf16.msra.mxu1 %v4732_v16  ;;  %2746 = vmatprep.mubr.f32.mxu1 %v4153_v0 }
0x1ea7   :  { %3650 = vmatprep.subr.bf16.mxu1 %v4735_v18 }
0x1eaa   :  { %3652 = vmatpush1.bf16.msra.mxu1 %v4741_v28 }
0x1eab   :  { %3654 = vmatprep.subr.bf16.mxu1 %v4744_v33 }
0x1eae   :  { %3656 = vmatpush1.bf16.msra.mxu1 %v4751_v39 }
0x1eaf   :  { %3658 = vmatprep.subr.bf16.mxu1 %v4754_v32 }
0x1eb2   :  { %3660 = vmatpush1.bf16.msra.mxu1 %v4759_v20 }
0x1eb3   :  { %3678 = vmatprep.subr.bf16.mxu1 %v4730_v19  ;;  %v2436_v19 = vld [vmem:[#allocation3 + $0x8] sm:$0x3] }
0x1f78   :  { %v2430_v15 = vpop.f32.mrb[12].mxu1 }
0x1f79   :  { %v2444_v26 = vadd.f32 %v2430_v15, %v4785_v47  ;;  %2468 = vrot.lane.b32.xlu1 %v2430_v15, %s4157_s1  ;;  %v2432_v24 = vpop.f32.mrb[13].mxu1  ;;  %v2437_v29 = vadd.f32 %v2435_v27, %v2430_v15 }
0x1f7a   :  { %v2489_v25 = vadd.f32 %v4711_v62, %v2432_v24 }
0x1f7b   :  { %2446 = vrot.lane.b32.xlu0 %v2444_v26, %s4156_s17  ;;  %v3311_v63 = vmul.f32 -1.442695, %v2437_v29 }
0x1f7d   :  { %3894 = vpow2.f32 %v3311_v63 }
0x1f7f   :  { %2491 = vrot.lane.b32.xlu0 %v2489_v25, %s4158_s6 }
0x1f87   :  { %v3895_v31 = vpop.eup %3894 }
0x1f88   :  { %v2441_v34 = vadd.f32 1.0, %v3895_v31 }
0x1f8a   :  { %3896 = vrcp.f32 %v2441_v34 }
0x1f94   :  { %v3897_v38 = vpop.eup %3896 }
0x1f95   :  { %v2456_v57 = vsub.f32 1.0, %v3897_v38 }
0x1feb   :  { %v2469_v36 = vpop.permute.xlu1 %2468 }
0x1fec   :  { %v2471_v37 = vadd.f32 %v2469_v36, %v2436_v19 }
0x1fed   :  { %v2447_v40 = vpop.permute.xlu0 %2446 }
0x1fee   :  { %v3312_v41 = vmul.f32 -1.442695, %v2471_v37  ;;  %v2449_v42 = vmul.f32 %v3897_v38, %v2447_v40 }
0x1ff0   :  { %3898 = vpow2.f32 %v3312_v41  ;;  %2451 = vrot.lane.b32.xlu1 %v2449_v42, %s4156_s17 }
0x1ff1   :  { %v2492_v6 = vpop.permute.xlu0 %2491 }
0x1ffa   :  { %v3899_v43 = vpop.eup %3898 }
0x1ffb   :  { %v2475_v44 = vadd.f32 1.0, %v3899_v43 }
0x1ffd   :  { %3900 = vrcp.f32 %v2475_v44 }
0x2007   :  { %v3901_v45 = vpop.eup %3900 }
0x2008   :  { %v2494_v48 = vmul.f32 %v3901_v45, %v2492_v6 }
0x200a   :  { %2496 = vrot.lane.b32.xlu0 %v2494_v48, %s4156_s17 }
0x200e   :  { %2462 = vrot.lane.b32.xlu0 %v4867_v11, %s4157_s1 }
0x2062   :  { %v2452_v49 = vpop.permute.xlu1 %2451 }
0x2063   :  { %v2454_v50 = vadd.f32 %v2452_v49, %v2435_v27  ;;  %v2595_v27 = vld [vmem:[#allocation3 + $0x6] sm:$0x3] }
0x2065   :  { %3902 = vtanh.f32 %v2454_v50 }
0x206f   :  { %v3903_v51 = vpop.eup %3902 }
0x2070   :  { %2458 = vrot.lane.b32.xlu1 %v3903_v51, %s4158_s6 }
0x2074   :  { %2479 = vrot.lane.b32.xlu1 %v2432_v24, %s4157_s1 }
0x207c   :  { %v2497_v52 = vpop.permute.xlu0 %2496 }
0x207d   :  { %v2499_v53 = vadd.f32 %v2497_v52, %v2436_v19 }
0x207f   :  { %3904 = vtanh.f32 %v2499_v53 }
0x2080   :  { %v2463_v56 = vpop.permute.xlu0 %2462 }
0x2081   :  { %v2465_v59 = vmul.f32 %v3897_v38, %v2463_v56 }
0x2089   :  { %v3905_v54 = vpop.eup %3904 }
0x208a   :  { %2503 = vrot.lane.b32.xlu0 %v3905_v54, %s4158_s6 }
0x20e2   :  { %v2459_v58 = vpop.permute.xlu1 %2458 }
0x20e3   :  { %v2461_v55 = vmul.f32 %v2459_v58, %v2456_v57 }
0x20e5   :  { %v2466_v60 = vadd.f32 %v2465_v59, %v2461_v55 }
0x20e6   :  { %v2480_v61 = vpop.permute.xlu1 %2479 }
0x20e7   :  { %2510 = vrot.lane.b32.xlu1 %v2466_v60, %s4158_s6  ;;  %v2482_v1 = vadd.f32 %v2480_v61, %v2436_v19 }
0x20e9   :  { %v3313_v2 = vmul.f32 -1.442695, %v2482_v1 }
0x20eb   :  { %3906 = vpow2.f32 %v3313_v2 }
0x20f5   :  { %v3907_v3 = vpop.eup %3906 }
0x20f6   :  { %v2486_v23 = vadd.f32 1.0, %v3907_v3 }
0x20f8   :  { %3908 = vrcp.f32 %v2486_v23 }
0x20fc   :  { %v2504_v8 = vpop.permute.xlu0 %2503 }
0x2102   :  { %v3909_v4 = vpop.eup %3908 }
0x2103   :  { %v2501_v5 = vsub.f32 1.0, %v3909_v4  ;;  %v2507_v7 = vmul.f32 %v3909_v4, %v4867_v11  ;;  %v2594_v11 = vld [vmem:[#allocation2 + $0x8] sm:$0x3] }
0x2105   :  { %v2506_v9 = vmul.f32 %v2504_v8, %v2501_v5 }
0x2107   :  { %v4894_v30 = vadd.f32 %v2507_v7, %v2506_v9 }
0x2159   :  { %v2511_v12 = vpop.permute.xlu1 %2510 }
0x215a   :  { %2513 = vst.msk [vmem:[#allocation4 + $0x6] sm:$0x3] %vm389_vm1, %v2511_v12  ;;  %v4899_v13 = vsel %vm396_vm2, %v2511_v12, %v4894_v30 }
0x215b   :  { %3314 = vmatmul.mubr.msk.f32.vlgmr.msra.gmra.mrb[14].mxu0 %vm236_vm3, %v4899_v13 }
0x215c   :  { %3664 = vmatpush1.bf16.msra.mxu0 %v4732_v16  ;;  %2905 = vmatprep.mubr.f32.mxu0 %v4153_v0 }
0x215d   :  { %3666 = vmatprep.subr.bf16.mxu0 %v4735_v18 }
0x2160   :  { %3668 = vmatpush1.bf16.msra.mxu0 %v4741_v28 }
0x2161   :  { %3670 = vmatprep.subr.bf16.mxu0 %v4744_v33 }
0x2164   :  { %3672 = vmatpush1.bf16.msra.mxu0 %v4751_v39 }
0x2165   :  { %3674 = vmatprep.subr.bf16.mxu0 %v4754_v32 }
0x2168   :  { %3676 = vmatpush1.bf16.msra.mxu0 %v4759_v20 }
0x222e   :  { %v2589_v14 = vpop.f32.mrb[14].mxu0 }
0x222f   :  { %v2603_v17 = vadd.f32 %v2589_v14, %v4785_v47  ;;  %2627 = vrot.lane.b32.xlu1 %v2589_v14, %s4157_s1  ;;  %v2591_v21 = vpop.f32.mrb[15].mxu0  ;;  %v2596_v15 = vadd.f32 %v2594_v11, %v2589_v14 }
0x2230   :  { %v2648_v10 = vadd.f32 %v4711_v62, %v2591_v21 }
0x2231   :  { %2605 = vrot.lane.b32.xlu0 %v2603_v17, %s4156_s17  ;;  %v3315_v26 = vmul.f32 -1.442695, %v2596_v15 }
0x2233   :  { %3910 = vpow2.f32 %v3315_v26 }
0x2235   :  { %2650 = vrot.lane.b32.xlu0 %v2648_v10, %s4158_s6 }
0x223d   :  { %v3911_v24 = vpop.eup %3910 }
0x223e   :  { %v2600_v25 = vadd.f32 1.0, %v3911_v24 }
0x2240   :  { %3912 = vrcp.f32 %v2600_v25 }
0x224a   :  { %v3913_v31 = vpop.eup %3912 }
0x224b   :  { %v2615_v51 = vsub.f32 1.0, %v3913_v31 }
0x22a1   :  { %v2628_v29 = vpop.permute.xlu1 %2627 }
0x22a2   :  { %v2630_v63 = vadd.f32 %v2628_v29, %v2595_v27 }
0x22a3   :  { %v2606_v34 = vpop.permute.xlu0 %2605 }
0x22a4   :  { %v3316_v19 = vmul.f32 -1.442695, %v2630_v63  ;;  %v2608_v36 = vmul.f32 %v3913_v31, %v2606_v34 }
0x22a6   :  { %3914 = vpow2.f32 %v3316_v19  ;;  %2610 = vrot.lane.b32.xlu1 %v2608_v36, %s4156_s17 }
0x22a7   :  { %v2651_v41 = vpop.permute.xlu0 %2650 }
0x22b0   :  { %v3915_v37 = vpop.eup %3914 }
0x22b1   :  { %v2634_v38 = vadd.f32 1.0, %v3915_v37 }
0x22b3   :  { %3916 = vrcp.f32 %v2634_v38 }
0x22bd   :  { %v3917_v40 = vpop.eup %3916 }
0x22be   :  { %v2653_v42 = vmul.f32 %v3917_v40, %v2651_v41 }
0x22c0   :  { %2655 = vrot.lane.b32.xlu0 %v2653_v42, %s4156_s17 }
0x22c4   :  { %2621 = vrot.lane.b32.xlu0 %v4899_v13, %s4157_s1 }
0x2318   :  { %v2611_v43 = vpop.permute.xlu1 %2610 }
0x2319   :  { %v2613_v44 = vadd.f32 %v2611_v43, %v2594_v11 }
0x231b   :  { %3918 = vtanh.f32 %v2613_v44 }
0x2325   :  { %v3919_v45 = vpop.eup %3918 }
0x2326   :  { %2617 = vrot.lane.b32.xlu1 %v3919_v45, %s4158_s6 }
0x232a   :  { %2638 = vrot.lane.b32.xlu1 %v2591_v21, %s4157_s1 }
0x2332   :  { %v2656_v6 = vpop.permute.xlu0 %2655 }
0x2333   :  { %v2658_v48 = vadd.f32 %v2656_v6, %v2595_v27 }
0x2335   :  { %3920 = vtanh.f32 %v2658_v48 }
0x2336   :  { %v2622_v50 = vpop.permute.xlu0 %2621 }
0x2337   :  { %v2624_v53 = vmul.f32 %v3913_v31, %v2622_v50 }
0x233f   :  { %v3921_v49 = vpop.eup %3920 }
0x2340   :  { %2662 = vrot.lane.b32.xlu0 %v3921_v49, %s4158_s6 }
0x2398   :  { %v2618_v52 = vpop.permute.xlu1 %2617 }
0x2399   :  { %v2620_v54 = vmul.f32 %v2618_v52, %v2615_v51 }
0x239b   :  { %v2625_v56 = vadd.f32 %v2624_v53, %v2620_v54 }
0x239c   :  { %v2639_v57 = vpop.permute.xlu1 %2638 }
0x239d   :  { %2669 = vrot.lane.b32.xlu1 %v2625_v56, %s4158_s6  ;;  %v2641_v58 = vadd.f32 %v2639_v57, %v2595_v27 }
0x239f   :  { %v3317_v59 = vmul.f32 -1.442695, %v2641_v58 }
0x23a1   :  { %3922 = vpow2.f32 %v3317_v59 }
0x23ab   :  { %v3923_v55 = vpop.eup %3922 }
0x23ac   :  { %v2645_v60 = vadd.f32 1.0, %v3923_v55  ;;  %v4971_v55 = vld [vmem:[%s5068_s12] ss:$0 sm:$0xff] }
0x23ae   :  { %3924 = vrcp.f32 %v2645_v60 }
0x23b2   :  { %v2663_v2 = vpop.permute.xlu0 %2662 }
0x23b8   :  { %v3925_v61 = vpop.eup %3924 }
0x23b9   :  { %v2660_v1 = vsub.f32 1.0, %v3925_v61  ;;  %v2666_v23 = vmul.f32 %v3925_v61, %v4899_v13  ;;  %v2912_v61 = vld [vmem:[#allocation2 + $0xc] sm:$0x3] }
0x23bb   :  { %v2665_v3 = vmul.f32 %v2663_v2, %v2660_v1 }
0x23bd   :  { %v4925_v4 = vadd.f32 %v2666_v23, %v2665_v3 }
0x240f   :  { %v2670_v5 = vpop.permute.xlu1 %2669 }
0x2410   :  { %2672 = vst.msk [vmem:[#allocation4 + $0x8] sm:$0x3] %vm389_vm1, %v2670_v5  ;;  %v4930_v8 = vsel %vm396_vm2, %v2670_v5, %v4925_v4  ;;  %v2913_v5 = vld [vmem:[#allocation3 + $0x2] sm:$0x3] }
0x2411   :  { %3318 = vmatmul.mubr.msk.f32.vlgmr.msra.gmra.mrb[14].mxu1 %vm236_vm3, %v4930_v8 }
0x2412   :  { %3680 = vmatpush1.bf16.msra.mxu1 %v4732_v16  ;;  %3064 = vmatprep.mubr.f32.mxu1 %v4153_v0 }
0x2413   :  { %3682 = vmatprep.subr.bf16.mxu1 %v4735_v18  ;;  %v2753_v18 = vld [vmem:[#allocation2 + $0xa] sm:$0x3] }
0x2416   :  { %3684 = vmatpush1.bf16.msra.mxu1 %v4741_v28 }
0x2417   :  { %3686 = vmatprep.subr.bf16.mxu1 %v4744_v33 }
0x241a   :  { %3688 = vmatpush1.bf16.msra.mxu1 %v4751_v39 }
0x241b   :  { %3690 = vmatprep.subr.bf16.mxu1 %v4754_v32 }
0x241e   :  { %3692 = vmatpush1.bf16.msra.mxu1 %v4759_v20  ;;  %v2754_v20 = vld [vmem:[#allocation3 + $0x4] sm:$0x3] }
0x24e4   :  { %v2748_v9 = vpop.f32.mrb[14].mxu1 }
0x24e5   :  { %v2762_v7 = vadd.f32 %v2748_v9, %v4785_v47  ;;  %2786 = vrot.lane.b32.xlu1 %v2748_v9, %s4157_s1  ;;  %v2750_v16 = vpop.f32.mrb[15].mxu1  ;;  %v2755_v28 = vadd.f32 %v2753_v18, %v2748_v9 }
0x24e6   :  { %v2807_v0 = vadd.f32 %v4711_v62, %v2750_v16 }
0x24e7   :  { %2764 = vrot.lane.b32.xlu0 %v2762_v7, %s4156_s17  ;;  %v3319_v33 = vmul.f32 -1.442695, %v2755_v28 }
0x24e9   :  { %3926 = vpow2.f32 %v3319_v33 }
0x24eb   :  { %2809 = vrot.lane.b32.xlu0 %v2807_v0, %s4158_s6 }
0x24f3   :  { %v3927_v39 = vpop.eup %3926 }
0x24f4   :  { %v2759_v32 = vadd.f32 1.0, %v3927_v39 }
0x24f6   :  { %3928 = vrcp.f32 %v2759_v32 }
0x2500   :  { %v3929_v14 = vpop.eup %3928 }
0x2501   :  { %v2774_v36 = vsub.f32 1.0, %v3929_v14 }
0x2557   :  { %v2787_v12 = vpop.permute.xlu1 %2786 }
0x2558   :  { %v2789_v13 = vadd.f32 %v2787_v12, %v2754_v20 }
0x2559   :  { %v2765_v17 = vpop.permute.xlu0 %2764 }
0x255a   :  { %v3320_v21 = vmul.f32 -1.442695, %v2789_v13  ;;  %v2767_v10 = vmul.f32 %v3929_v14, %v2765_v17 }
0x255c   :  { %3930 = vpow2.f32 %v3320_v21  ;;  %2769 = vrot.lane.b32.xlu1 %v2767_v10, %s4156_s17 }
0x255d   :  { %v2810_v26 = vpop.permute.xlu0 %2809 }
0x2566   :  { %v3931_v62 = vpop.eup %3930 }
0x2567   :  { %v2793_v11 = vadd.f32 1.0, %v3931_v62 }
0x2569   :  { %3932 = vrcp.f32 %v2793_v11 }
0x2573   :  { %v3933_v15 = vpop.eup %3932 }
0x2574   :  { %v2812_v24 = vmul.f32 %v3933_v15, %v2810_v26 }
0x2576   :  { %2814 = vrot.lane.b32.xlu0 %v2812_v24, %s4156_s17 }
0x257a   :  { %2780 = vrot.lane.b32.xlu0 %v4930_v8, %s4157_s1 }
0x25ce   :  { %v2770_v25 = vpop.permute.xlu1 %2769 }
0x25cf   :  { %v2772_v27 = vadd.f32 %v2770_v25, %v2753_v18 }
0x25d1   :  { %3934 = vtanh.f32 %v2772_v27 }
0x25db   :  { %v3935_v29 = vpop.eup %3934 }
0x25dc   :  { %2776 = vrot.lane.b32.xlu1 %v3935_v29, %s4158_s6 }
0x25e0   :  { %2797 = vrot.lane.b32.xlu1 %v2750_v16, %s4157_s1 }
0x25e8   :  { %v2815_v63 = vpop.permute.xlu0 %2814 }
0x25e9   :  { %v2817_v31 = vadd.f32 %v2815_v63, %v2754_v20 }
0x25eb   :  { %3936 = vtanh.f32 %v2817_v31 }
0x25ec   :  { %v2781_v19 = vpop.permute.xlu0 %2780 }
0x25ed   :  { %v2783_v38 = vmul.f32 %v3929_v14, %v2781_v19 }
0x25f5   :  { %v3937_v34 = vpop.eup %3936 }
0x25f6   :  { %2821 = vrot.lane.b32.xlu0 %v3937_v34, %s4158_s6 }
0x264e   :  { %v2777_v37 = vpop.permute.xlu1 %2776 }
0x264f   :  { %v2779_v40 = vmul.f32 %v2777_v37, %v2774_v36 }
0x2651   :  { %v2784_v41 = vadd.f32 %v2783_v38, %v2779_v40 }
0x2652   :  { %v2798_v42 = vpop.permute.xlu1 %2797 }
0x2653   :  { %2828 = vrot.lane.b32.xlu1 %v2784_v41, %s4158_s6  ;;  %v2800_v43 = vadd.f32 %v2798_v42, %v2754_v20 }
0x2655   :  { %v3321_v44 = vmul.f32 -1.442695, %v2800_v43 }
0x2657   :  { %3938 = vpow2.f32 %v3321_v44 }
0x2661   :  { %v3939_v45 = vpop.eup %3938 }
0x2662   :  { %v2804_v6 = vadd.f32 1.0, %v3939_v45 }
0x2664   :  { %3940 = vrcp.f32 %v2804_v6 }
0x2668   :  { %v2822_v50 = vpop.permute.xlu0 %2821 }
0x266e   :  { %v3941_v48 = vpop.eup %3940 }
0x266f   :  { %v2819_v49 = vsub.f32 1.0, %v3941_v48  ;;  %v2825_v52 = vmul.f32 %v3941_v48, %v4930_v8 }
0x2671   :  { %v2824_v51 = vmul.f32 %v2822_v50, %v2819_v49  ;;  %v3071_v49 = vld [vmem:[#allocation2 + $0xe] sm:$0x3] }
0x2673   :  { %v4956_v53 = vadd.f32 %v2825_v52, %v2824_v51 }
0x26c5   :  { %v2829_v54 = vpop.permute.xlu1 %2828 }
0x26c6   :  { %2831 = vst.msk [vmem:[#allocation4 + $0xa] sm:$0x3] %vm389_vm1, %v2829_v54  ;;  %v4961_v56 = vsel %vm396_vm2, %v2829_v54, %v4956_v53 }
0x26c7   :  { %3322 = vmatmul.mubr.msk.f32.vlgmr.msra.gmra.mrb[16].mxu0 %vm236_vm3, %v4961_v56 }
0x279a   :  { %v2907_v57 = vpop.f32.mrb[16].mxu0 }
0x279b   :  { %v2921_v58 = vadd.f32 %v2907_v57, %v4785_v47  ;;  %2945 = vrot.lane.b32.xlu1 %v2907_v57, %s4157_s1  ;;  %v2909_v59 = vpop.f32.mrb[17].mxu0  ;;  %v2914_v1 = vadd.f32 %v2912_v61, %v2907_v57 }
0x279c   :  { %v2966_v60 = vadd.f32 %v4971_v55, %v2909_v59 }
0x279d   :  { %2923 = vrot.lane.b32.xlu0 %v2921_v58, %s4156_s17  ;;  %v3323_v2 = vmul.f32 -1.442695, %v2914_v1 }
0x279f   :  { %3942 = vpow2.f32 %v3323_v2 }
0x27a1   :  { %2968 = vrot.lane.b32.xlu0 %v2966_v60, %s4158_s6 }
0x27a9   :  { %v3943_v3 = vpop.eup %3942 }
0x27aa   :  { %v2918_v23 = vadd.f32 1.0, %v3943_v3 }
0x27ac   :  { %3944 = vrcp.f32 %v2918_v23 }
0x27b6   :  { %v3945_v7 = vpop.eup %3944 }
0x27b7   :  { %v2933_v11 = vsub.f32 1.0, %v3945_v7 }
0x280d   :  { %v2946_v8 = vpop.permute.xlu1 %2945 }
0x280e   :  { %v2948_v9 = vadd.f32 %v2946_v8, %v2913_v5 }
0x280f   :  { %v2924_v16 = vpop.permute.xlu0 %2923 }
0x2810   :  { %v3324_v0 = vmul.f32 -1.442695, %v2948_v9  ;;  %v2926_v18 = vmul.f32 %v3945_v7, %v2924_v16 }
0x2812   :  { %3946 = vpow2.f32 %v3324_v0  ;;  %2928 = vrot.lane.b32.xlu1 %v2926_v18, %s4156_s17 }
0x2813   :  { %v2969_v32 = vpop.permute.xlu0 %2968 }
0x281c   :  { %v3947_v28 = vpop.eup %3946 }
0x281d   :  { %v2952_v33 = vadd.f32 1.0, %v3947_v28 }
0x281f   :  { %3948 = vrcp.f32 %v2952_v33 }
0x2829   :  { %v3949_v39 = vpop.eup %3948 }
0x282a   :  { %v2971_v20 = vmul.f32 %v3949_v39, %v2969_v32 }
0x282c   :  { %2973 = vrot.lane.b32.xlu0 %v2971_v20, %s4156_s17 }
0x2830   :  { %2939 = vrot.lane.b32.xlu0 %v4961_v56, %s4157_s1 }
0x2884   :  { %v2929_v12 = vpop.permute.xlu1 %2928 }
0x2885   :  { %v2931_v13 = vadd.f32 %v2929_v12, %v2912_v61 }
0x2887   :  { %3950 = vtanh.f32 %v2931_v13 }
0x2891   :  { %v3951_v14 = vpop.eup %3950 }
0x2892   :  { %2935 = vrot.lane.b32.xlu1 %v3951_v14, %s4158_s6 }
0x2896   :  { %2956 = vrot.lane.b32.xlu1 %v2909_v59, %s4157_s1 }
0x289e   :  { %v2974_v17 = vpop.permute.xlu0 %2973 }
0x289f   :  { %v2976_v21 = vadd.f32 %v2974_v17, %v2913_v5 }
0x28a1   :  { %3952 = vtanh.f32 %v2976_v21 }
0x28a2   :  { %v2940_v62 = vpop.permute.xlu0 %2939 }
0x28a3   :  { %v2942_v26 = vmul.f32 %v3945_v7, %v2940_v62 }
0x28ab   :  { %v3953_v10 = vpop.eup %3952 }
0x28ac   :  { %2980 = vrot.lane.b32.xlu0 %v3953_v10, %s4158_s6 }
0x2904   :  { %v2936_v15 = vpop.permute.xlu1 %2935 }
0x2905   :  { %v2938_v24 = vmul.f32 %v2936_v15, %v2933_v11 }
0x2907   :  { %v2943_v25 = vadd.f32 %v2942_v26, %v2938_v24  ;;  %v3330_v26 = vld [vmem:[%s5069_s13] ss:$0 sm:$0xff] }
0x2908   :  { %v2957_v27 = vpop.permute.xlu1 %2956 }
0x2909   :  { %2987 = vrot.lane.b32.xlu1 %v2943_v25, %s4158_s6  ;;  %v2959_v29 = vadd.f32 %v2957_v27, %v2913_v5 }
0x290b   :  { %v3325_v63 = vmul.f32 -1.442695, %v2959_v29 }
0x290d   :  { %3954 = vpow2.f32 %v3325_v63 }
0x2917   :  { %v3955_v31 = vpop.eup %3954 }
0x2918   :  { %v2963_v34 = vadd.f32 1.0, %v3955_v31 }
0x291a   :  { %3956 = vrcp.f32 %v2963_v34  ;;  %v3331_v34 = vld [vmem:[%s5070_s14] ss:$0 sm:$0xff] }
0x291e   :  { %v2981_v37 = vpop.permute.xlu0 %2980 }
0x2924   :  { %v3957_v19 = vpop.eup %3956 }
0x2925   :  { %v2978_v36 = vsub.f32 1.0, %v3957_v19  ;;  %v2984_v40 = vmul.f32 %v3957_v19, %v4961_v56  ;;  %v3072_v56 = vld [vmem:[#allocation3] sm:$0x3] }
0x2927   :  { %v2983_v38 = vmul.f32 %v2981_v37, %v2978_v36 }
0x2929   :  { %v2985_v41 = vadd.f32 %v2984_v40, %v2983_v38  ;;  %v3332_v38 = vld [vmem:[%s5069_s13 + $0x1] ss:$0 sm:$0xff] }
0x297b   :  { %v2988_v42 = vpop.permute.xlu1 %2987 }
0x297c   :  { %2990 = vst.msk [vmem:[#allocation4 + $0xc] sm:$0x3] %vm389_vm1, %v2988_v42  ;;  %v4986_v43 = vsel %vm396_vm2, %v2988_v42, %v2985_v41 }
0x297d   :  { %3326 = vmatmul.mubr.msk.f32.vlgmr.msra.gmra.mrb[16].mxu1 %vm236_vm3, %v4986_v43 }
0x2a50   :  { %v3066_v44 = vpop.f32.mrb[16].mxu1 }
0x2a51   :  { %v3080_v45 = vadd.f32 %v3066_v44, %v4785_v47  ;;  %3104 = vrot.lane.b32.xlu0 %v3066_v44, %s4157_s1  ;;  %v3068_v6 = vpop.f32.mrb[17].mxu1  ;;  %v3073_v50 = vadd.f32 %v3071_v49, %v3066_v44 }
0x2a52   :  { %v3125_v48 = vadd.f32 %v4971_v55, %v3068_v6 }
0x2a53   :  { %3082 = vrot.lane.b32.xlu1 %v3080_v45, %s4156_s17  ;;  %v3327_v51 = vmul.f32 -1.442695, %v3073_v50 }
0x2a55   :  { %3127 = vrot.lane.b32.xlu0 %v3125_v48, %s4158_s6  ;;  %3958 = vpow2.f32 %v3327_v51  ;;  %v3333_v51 = vld [vmem:[%s5070_s14 + $0x1] ss:$0 sm:$0xff] }
0x2a5f   :  { %v3959_v52 = vpop.eup %3958 }
0x2a60   :  { %v3077_v54 = vadd.f32 1.0, %v3959_v52 }
0x2a62   :  { %3960 = vrcp.f32 %v3077_v54 }
0x2a6c   :  { %v3961_v47 = vpop.eup %3960 }
0x2a6d   :  { %v3092_v20 = vsub.f32 1.0, %v3961_v47 }
0x2ac3   :  { %v3105_v57 = vpop.permute.xlu0 %3104 }
0x2ac4   :  { %v3107_v58 = vadd.f32 %v3105_v57, %v3072_v56 }
0x2ac5   :  { %v3083_v59 = vpop.permute.xlu1 %3082 }
0x2ac6   :  { %v3328_v60 = vmul.f32 -1.442695, %v3107_v58  ;;  %v3085_v61 = vmul.f32 %v3961_v47, %v3083_v59 }
0x2ac7   :  { %v3128_v3 = vpop.permute.xlu0 %3127 }
0x2ac8   :  { %3962 = vpow2.f32 %v3328_v60  ;;  %3087 = vrot.lane.b32.xlu1 %v3085_v61, %s4156_s17 }
0x2acc   :  { %3115 = vrot.lane.b32.xlu1 %v3068_v6, %s4157_s1 }
0x2ad0   :  { %3098 = vrot.lane.b32.xlu1 %v4986_v43, %s4157_s1 }
0x2ad2   :  { %v3963_v55 = vpop.eup %3962 }
0x2ad3   :  { %v3111_v1 = vadd.f32 1.0, %v3963_v55 }
0x2ad4   :  { %2038 = vrot.lane.b32.xlu1 %v4798_v35, %s4158_s6 }
0x2ad5   :  { %3964 = vrcp.f32 %v3111_v1 }
0x2ad8   :  { %2356 = vrot.lane.b32.xlu1 %v4862_v22, %s4158_s6 }
0x2adc   :  { %2674 = vrot.lane.b32.xlu1 %v4925_v4, %s4158_s6 }
0x2adf   :  { %v3965_v2 = vpop.eup %3964 }
0x2ae0   :  { %v3130_v23 = vmul.f32 %v3965_v2, %v3128_v3  ;;  %2992 = vrot.lane.b32.xlu1 %v2985_v41, %s4158_s6 }
0x2ae2   :  { %3132 = vrot.lane.b32.xlu0 %v3130_v23, %s4156_s17 }
0x2b3a   :  { %v3088_v5 = vpop.permute.xlu1 %3087 }
0x2b3b   :  { %v3090_v8 = vadd.f32 %v3088_v5, %v3071_v49  ;;  %v3334_v5 = vld [vmem:[%s5071_s15] ss:$0 sm:$0xff] }
0x2b3d   :  { %3966 = vtanh.f32 %v3090_v8 }
0x2b3e   :  { %v3116_v9 = vpop.permute.xlu1 %3115 }
0x2b3f   :  { %v3118_v39 = vadd.f32 %v3116_v9, %v3072_v56 }
0x2b41   :  { %v3329_v32 = vmul.f32 -1.442695, %v3118_v39 }
0x2b42   :  { %v3099_v7 = vpop.permute.xlu1 %3098 }
0x2b43   :  { %v3101_v13 = vmul.f32 %v3961_v47, %v3099_v7 }
0x2b46   :  { %v2039_v35 = vpop.permute.xlu1 %2038 }
0x2b47   :  { %v3967_v16 = vpop.eup %3966  ;;  %2041 = vst.msk [vmem:[#allocation5 + $0xe] sm:$0x3] %vm389_vm1, %v2039_v35 }
0x2b48   :  { %3094 = vrot.lane.b32.xlu0 %v3967_v16, %s4158_s6 }
0x2b4a   :  { %v2357_v22 = vpop.permute.xlu1 %2356 }
0x2b4b   :  { %2359 = vst.msk [vmem:[#allocation5 + $0xa] sm:$0x3] %vm389_vm1, %v2357_v22 }
0x2b4e   :  { %v2675_v4 = vpop.permute.xlu1 %2674 }
0x2b4f   :  { %2677 = vst.msk [vmem:[#allocation5 + $0x6] sm:$0x3] %vm389_vm1, %v2675_v4 }
0x2b52   :  { %v2993_v0 = vpop.permute.xlu1 %2992 }
0x2b53   :  { %2995 = vst.msk [vmem:[#allocation5 + $0x2] sm:$0x3] %vm389_vm1, %v2993_v0 }
0x2b54   :  { %v3133_v18 = vpop.permute.xlu0 %3132 }
0x2b55   :  { %v3135_v28 = vadd.f32 %v3133_v18, %v3072_v56 }
0x2b57   :  { %3968 = vtanh.f32 %v3135_v28 }
0x2b58   :  { %3970 = vpow2.f32 %v3329_v32 }
0x2b61   :  { %v3969_v33 = vpop.eup %3968 }
0x2b62   :  { %3139 = vrot.lane.b32.xlu0 %v3969_v33, %s4158_s6  ;;  %v3971_v21 = vpop.eup %3970 }
0x2b63   :  { %v3122_v10 = vadd.f32 1.0, %v3971_v21 }
0x2b65   :  { %3972 = vrcp.f32 %v3122_v10 }
0x2b66   :  { %2197 = vrot.lane.b32.xlu0 %v4830_v46, %s4158_s6 }
0x2b6a   :  { %2515 = vrot.lane.b32.xlu0 %v4894_v30, %s4158_s6 }
0x2b6e   :  { %2833 = vrot.lane.b32.xlu0 %v4956_v53, %s4158_s6  ;;  %v3155_v53 = vld [vmem:[#allocation4] sm:$0xff] }
0x2b6f   :  { %v3973_v46 = vpop.eup %3972  ;;  %v3164_v27 = vmul.f32 %v3330_v26, %v3155_v53  ;;  %v3192_v40 = vmul.f32 %v3332_v38, %v3155_v53 }
0x2b70   :  { %v3137_v62 = vsub.f32 1.0, %v3973_v46  ;;  %v3143_v30 = vmul.f32 %v3973_v46, %v4986_v43 }
0x2b71   :  { %v3166_v63 = vsel %vm396_vm2, %v3164_v27, 0.0  ;;  %v3194_v41 = vsel %vm396_vm2, %v3192_v40, 0.0 }
0x2bba   :  { %v3095_v12 = vpop.permute.xlu0 %3094 }
0x2bbb   :  { %v3097_v14 = vmul.f32 %v3095_v12, %v3092_v20 }
0x2bbd   :  { %v3102_v17 = vadd.f32 %v3101_v13, %v3097_v14 }
0x2bbf   :  { %3146 = vrot.lane.b32.xlu0 %v3102_v17, %s4158_s6 }
0x2bd4   :  { %v3140_v11 = vpop.permute.xlu0 %3139 }
0x2bd5   :  { %v3142_v15 = vmul.f32 %v3140_v11, %v3137_v62 }
0x2bd7   :  { %v3144_v24 = vadd.f32 %v3143_v30, %v3142_v15 }
0x2bd8   :  { %v2198_v25 = vpop.permute.xlu0 %2197 }
0x2bd9   :  { %2200 = vst.msk [vmem:[#allocation5 + $0xc] sm:$0x3] %vm389_vm1, %v2198_v25  ;;  %3151 = vrot.lane.b32.xlu1 %v3144_v24, %s4158_s6 }
0x2bdc   :  { %v2516_v29 = vpop.permute.xlu0 %2515 }
0x2bdd   :  { %2518 = vst.msk [vmem:[#allocation5 + $0x8] sm:$0x3] %vm389_vm1, %v2516_v29 }
0x2bde   :  { %3167 = vadd.xlane.f32.xlu0 %v3166_v63 }
0x2be0   :  { %v2834_v31 = vpop.permute.xlu0 %2833 }
0x2be1   :  { %2836 = vst.msk [vmem:[#allocation5 + $0x4] sm:$0x3] %vm389_vm1, %v2834_v31 }
0x2be4   :  { %v3158_v19 = vld [vmem:[#allocation5 + $0x8] sm:$0xff] }
0x2be5   :  { %v3178_v36 = vmul.f32 %v3331_v34, %v3158_v19  ;;  %v3206_v58 = vmul.f32 %v3333_v51, %v3158_v19 }
0x2be7   :  { %v3182_v37 = vsel %vm396_vm2, %v3178_v36, 0.0  ;;  %v3210_v47 = vsel %vm396_vm2, %v3206_v58, 0.0 }
0x2be8   :  { %3183 = vadd.xlane.f32.xlu0 %v3182_v37 }
0x2bfd   :  { %3195 = vadd.xlane.f32.xlu1 %v3194_v41 }
0x2c31   :  { %v3147_v42 = vpop.permute.xlu0 %3146 }
0x2c32   :  { %3149 = vst.msk [vmem:[#allocation4 + $0xe] sm:$0x3] %vm389_vm1, %v3147_v42 }
0x2c39   :  { %v3156_v43 = vld [vmem:[#allocation4 + $0x8] sm:$0xff] }
0x2c3a   :  { %v3193_v44 = vmul.f32 %v3332_v38, %v3156_v43  ;;  %v3165_v45 = vmul.f32 %v3330_v26, %v3156_v43 }
0x2c3c   :  { %v3197_v6 = vsel %vm396_vm2, %v3193_v44, 0.0  ;;  %v3169_v48 = vsel %vm396_vm2, %v3165_v45, 0.0 }
0x2c3d   :  { %3198 = vadd.xlane.f32.xlu0 %v3197_v6  ;;  %3170 = vadd.xlane.f32.xlu1 %v3169_v48 }
0x2c4b   :  { %v3152_v49 = vpop.permute.xlu1 %3151 }
0x2c4c   :  { %3154 = vst.msk [vmem:[#allocation5] sm:$0x3] %vm389_vm1, %v3152_v49 }
0x2c53   :  { %v3157_v50 = vld [vmem:[#allocation5] sm:$0xff] }
0x2c54   :  { %v3177_v52 = vmul.f32 %v3331_v34, %v3157_v50  ;;  %v3205_v54 = vmul.f32 %v3333_v51, %v3157_v50 }
0x2c56   :  { %v3179_v56 = vsel %vm396_vm2, %v3177_v52, 0.0  ;;  %v3207_v57 = vsel %vm396_vm2, %v3205_v54, 0.0 }
0x2c57   :  { %3180 = vadd.xlane.f32.xlu0 %v3179_v56  ;;  %3208 = vadd.xlane.f32.xlu1 %v3207_v57 }
0x2c5b   :  { %3211 = vadd.xlane.f32.xlu0 %v3210_v47 }
0x2c6b   :  { %v3168_v59 = vpop.xlane.xlu0 %3167 }
0x2c75   :  { %v3184_v60 = vpop.xlane.xlu0 %3183 }
0x2c8a   :  { %v3196_v61 = vpop.xlane.xlu1 %3195 }
0x2cca   :  { %v3171_v55 = vpop.xlane.xlu1 %3170  ;;  %v3199_v1 = vpop.xlane.xlu0 %3198 }
0x2ccb   :  { %v3186_v16 = vadd.f32 %v3184_v60, %v3171_v55 }
0x2ce4   :  { %v3209_v2 = vpop.xlane.xlu1 %3208  ;;  %v3181_v3 = vpop.xlane.xlu0 %3180 }
0x2ce5   :  { %v3213_v23 = vadd.f32 %v3209_v2, %v3196_v61  ;;  %v3185_v8 = vadd.f32 %v3181_v3, %v3168_v59 }
0x2ce7   :  { %v3216_v9 = vsel %vm3215_vm4, %v3185_v8, %v3213_v23 }
0x2ce8   :  { %v3225_v7 = vadd.f32 %v3334_v5, %v3216_v9  ;;  %v3212_v35 = vpop.xlane.xlu0 %3211 }
0x2ce9   :  { %v3214_v22 = vadd.f32 %v3212_v35, %v3199_v1 }
0x2cea   :  { %v3229_v4 = vmin.f32 %v3225_v7, 0.0  ;;  %vm3227_vm6 = vcmp.gt.f32.partialorder %v3225_v7, 0.0 }
0x2ceb   :  { %v3217_v0 = vsel %vm3215_vm4, %v3186_v16, %v3214_v22 }
0x2cec   :  { %v3231_v18 = vmul.f32 1.442695, %v3229_v4  ;;  %v3226_v28 = vadd.f32 %v3334_v5, %v3217_v0 }
0x2cee   :  { %3974 = vpow2.f32 %v3231_v18  ;;  %v3230_v33 = vmin.f32 %v3226_v28, 0.0  ;;  %vm3228_vm7 = vcmp.gt.f32.partialorder %v3226_v28, 0.0 }
0x2cf0   :  { %v3233_v39 = vmul.f32 1.442695, %v3230_v33 }
0x2cf2   :  { %3976 = vpow2.f32 %v3233_v39 }
0x2cf8   :  { %v3975_v32 = vpop.eup %3974 }
0x2cf9   :  { %v3335_v20 = vadd.f32 -1.0, %v3975_v32 }
0x2cfb   :  { %v3237_v12 = vsel %vm3227_vm6, %v3225_v7, %v3335_v20 }
0x2cfc   :  { %v3977_v13 = vpop.eup %3976  ;;  %3240 = vst.msk [vmem:[%s5072_s16] sm:$0xff] %vm3239_vm5, %v3237_v12 }
0x2cfd   :  { %v3336_v14 = vadd.f32 -1.0, %v3977_v13 }
0x2cff   :  { %v3238_v17 = vsel %vm3228_vm7, %v3226_v28, %v3336_v14 }
0x2d00   :  { %3241 = vst.msk [vmem:[%s5072_s16 + $0x8] sm:$0xff] %vm3239_vm5, %v3238_v17 }
0x2d01   :  { %3246 = vsyncpa [#allocation7], 1 }
0x2d02   :  { %3247 = vsyncpa [#allocation9], 1 }
0x2d03   :  { %3248 = vsyncpa [#allocation12], 1 }
0x2d04   :  { %3249 = vsyncpa [#allocation15], 1 }

</bundles_post_ra>
